<compile_context>
chip_gen: v5e
topology: v5e:2x2
jax: 0.10.0
libtpu: 0.0.40
codegen_flags: <defaults>
</compile_context>

<pallas_src>
import jax
import jax.numpy as jnp
from jax.experimental import pallas as pl
from jax.experimental.pallas import tpu as pltpu

LEAKY_SLOPE = 0.01   # nn.LeakyReLU default negative_slope
BN_EPS = 1e-5        # nn.BatchNorm3d default eps


def _round_up(x, m):
    return -(-x // m) * m


# ----------------------------- Pallas kernel ------------------------------ #
def _make_basic_block_kernel(tap_offsets, cin_p, tile_m):
    """One (Cout, tile_m) slab of 3x3x3 conv + folded BN + LeakyReLU.

    cur_ref   : (Cin_p, tile_m)            current column tile (bf16)
    halo_ref  : (Cin_p, halo_pad)          halo columns just past the tile (bf16)
    w_ref     : (Cout, 27*Cin_p)           K-fused conv weights (bf16)
    scale_ref : (Cout, 1)                  folded BN scale (f32)
    bias_ref  : (Cout, 1)                  folded conv-bias + BN bias (f32)
    out_ref   : (Cout, tile_m)             f32 output
    xext_ref  : (Cin_p, tile_m + halo_pad) VMEM stitch scratch (bf16)
    slab_ref  : (27*Cin_p, tile_m)         VMEM im2col scratch (bf16)
    """
    def kernel(cur_ref, halo_ref, w_ref, scale_ref, bias_ref, out_ref,
               xext_ref, slab_ref):
        # Stitch current tile + small halo once (no 2*tm concat temp).
        xext_ref[:, :tile_m] = cur_ref[...]
        xext_ref[:, tile_m:] = halo_ref[...]
        # im2col: 27 statically lane-shifted slices stacked along K (sublanes).
        for t, off in enumerate(tap_offsets):
            slab_ref[t * cin_p:(t + 1) * cin_p, :] = xext_ref[:, off:off + tile_m]
        # Single K = 27*Cin_p MXU matmul, f32 accumulation.
        acc = jnp.dot(w_ref[...], slab_ref[...],
                      preferred_element_type=jnp.float32)
        # Fused (conv bias + eval-mode BatchNorm) affine + LeakyReLU epilogue.
        y = acc * scale_ref[...] + bias_ref[...]
        out_ref[...] = jnp.where(y > 0.0, y, LEAKY_SLOPE * y).astype(out_ref.dtype)

    return kernel


# ------------------------------ JAX wrapper -------------------------------- #
def basic_block_forward(x_ncdhw, params, stride=1, tile_m=4096,
                        vmem_limit_bytes=None):
    n, cin, d, h, w = x_ncdhw.shape
    w_conv = params["w"]                              # (Cout, Cin, 3, 3, 3)
    cout = w_conv.shape[0]
    dp, hp, wp = d + 2, h + 2, w + 2                  # ConstantPad3d(1)

    cin_p = _round_up(cin, 16)                        # bf16 sublane packing
    k_dim = 27 * cin_p

    # Flattened tap offsets (kd, kh, kw) relative to an output anchor, and the
    # lane-aligned halo width read just past each tile.
    offsets = tuple((kd * hp + kh) * wp + kw
                    for kd in range(3) for kh in range(3) for kw in range(3))
    halo = offsets[-1]
    halo_pad = _round_up(halo, 128)

    mp = n * dp * hp * wp

    # Tile size: multiple of halo_pad (so the halo BlockSpec lands exactly at
    # the end of the tile), capped so the im2col scratch stays well inside
    # scoped VMEM, and shrunk for small problems so the grid has >= 2 steps.
    tm = _round_up(max(tile_m, 128), halo_pad)
    slab_bytes_per_col = k_dim * 2                    # bf16
    tm_cap = max(halo_pad,
                 (12 * 1024 * 1024 // slab_bytes_per_col) // halo_pad * halo_pad)
    tm = min(tm, tm_cap)
    if tm >= mp and mp > halo_pad:
        tm = max(halo_pad, _round_up(-(-mp // 2), halo_pad))
    n_tiles = pl.cdiv(mp, tm)
    halo_blocks_per_tile = tm // halo_pad
    cols = n_tiles * tm + halo_pad                    # last tile's halo stays in-bounds

    # Channel-major, zero-padded, flattened x in bf16 (the streamed operand).
    xt = jnp.transpose(x_ncdhw, (1, 0, 2, 3, 4)).astype(jnp.bfloat16)
    xt = jnp.pad(xt, ((0, cin_p - cin), (0, 0), (1, 1), (1, 1), (1, 1)))
    xs = xt.reshape(cin_p, mp)
    xs = jnp.pad(xs, ((0, 0), (0, cols - mp)))

    # K-fused weights: (Cout, 27*Cin_p), tap-major / channel-minor rows that
    # match the im2col slab layout; channel-padded with zeros, cast to bf16.
    wt = jnp.transpose(w_conv, (2, 3, 4, 1, 0)).reshape(27, cin, cout)
    wt = jnp.pad(wt, ((0, 0), (0, cin_p - cin), (0, 0)))
    w2 = jnp.transpose(wt.reshape(k_dim, cout), (1, 0)).astype(jnp.bfloat16)

    # Fold conv bias + eval-mode BatchNorm into per-channel scale / bias (f32).
    s = params["bn_gamma"] / jnp.sqrt(params["bn_var"] + BN_EPS)
    bias = (params["b"] - params["bn_mean"]) * s + params["bn_beta"]
    scale2 = s.reshape(cout, 1).astype(jnp.float32)
    bias2 = bias.reshape(cout, 1).astype(jnp.float32)

    kernel = _make_basic_block_kernel(offsets, cin_p, tm)
    z = pl.pallas_call(
        kernel,
        out_shape=jax.ShapeDtypeStruct((cout, n_tiles * tm), jnp.float32),
        grid=(n_tiles,),
        in_specs=[
            pl.BlockSpec((cin_p, tm), lambda i: (0, i)),                 # current tile
            pl.BlockSpec((cin_p, halo_pad),                              # small halo block
                         lambda i: (0, (i + 1) * halo_blocks_per_tile)),
            pl.BlockSpec((cout, k_dim), lambda i: (0, 0)),               # fused weights
            pl.BlockSpec((cout, 1), lambda i: (0, 0)),                   # scale
            pl.BlockSpec((cout, 1), lambda i: (0, 0)),                   # bias
        ],
        out_specs=pl.BlockSpec((cout, tm), lambda i: (0, i)),
        scratch_shapes=[
            pltpu.VMEM((cin_p, tm + halo_pad), jnp.bfloat16),            # stitch
            pltpu.VMEM((k_dim, tm), jnp.bfloat16),                       # im2col slab
        ],
        compiler_params=pltpu.CompilerParams(
            dimension_semantics=("parallel",),
            vmem_limit_bytes=vmem_limit_bytes),
    )(xs, xs, w2, scale2, bias2)

    # Drop padded/garbage anchors, restore NCDHW.
    y = z[:, :mp].reshape(cout, n, dp, hp, wp)[:, :, :d, :h, :w]
    y = jnp.transpose(y, (1, 0, 2, 3, 4))
    if stride > 1:
        # A stride-s conv on the padded input equals every s-th stride-1 output.
        y = y[:, :, ::stride, ::stride, ::stride]
    return y


# --------------------------- parameters / reference ------------------------ #
def init_params(key, inplane, outplane):
    ks = jax.random.split(key, 6)
    return {
        "w": 0.2 * jax.random.normal(ks[0], (outplane, inplane, 3, 3, 3), jnp.float32),
        "b": 0.1 * jax.random.normal(ks[1], (outplane,), jnp.float32),
        "bn_gamma": jax.random.uniform(ks[2], (outplane,), jnp.float32, 0.5, 1.5),
        "bn_beta": 0.1 * jax.random.normal(ks[3], (outplane,), jnp.float32),
        "bn_mean": 0.1 * jax.random.normal(ks[4], (outplane,), jnp.float32),
        "bn_var": jax.random.uniform(ks[5], (outplane,), jnp.float32, 0.5, 1.5),
    }


def reference(x_ncdhw, params, stride=1):
    """Pure-JAX reference: pad(1) + conv3x3x3(+bias) + eval BN + LeakyReLU.

    Mirrors the kernel's operand precision (conv operands rounded to bf16,
    f32 accumulation and f32 BN/LeakyReLU epilogue), so any difference is
    accumulation order only.
    """
    x = jnp.transpose(x_ncdhw, (0, 2, 3, 4, 1))                        # NDHWC
    x = x.astype(jnp.bfloat16).astype(jnp.float32)
    wk = jnp.transpose(params["w"], (2, 3, 4, 1, 0))                   # DHWIO
    wk = wk.astype(jnp.bfloat16).astype(jnp.float32)
    y = jax.lax.conv_general_dilated(
        x, wk, (stride,) * 3, [(1, 1)] * 3,
        dimension_numbers=("NDHWC", "DHWIO", "NDHWC"),
        precision=jax.lax.Precision.HIGHEST)
    y = y + params["b"]
    s = params["bn_gamma"] / jnp.sqrt(params["bn_var"] + BN_EPS)
    y = (y - params["bn_mean"]) * s + params["bn_beta"]
    y = jnp.where(y > 0.0, y, LEAKY_SLOPE * y)
    return jnp.transpose(y, (0, 4, 1, 2, 3))


# --------------------------------- main ------------------------------------ #
if __name__ == "__main__":
    key = jax.random.PRNGKey(0)
    kx, kp = jax.random.split(key)

    N, CIN, COUT, D, H, W = 2, 4, 8, 8, 8, 8
    x = jax.random.normal(kx, (N, CIN, D, H, W), jnp.float32)
    params = init_params(kp, CIN, COUT)

    out = jax.jit(basic_block_forward)(x, params)
    out = jax.block_until_ready(out)
    assert out.shape == (N, COUT, D, H, W), out.shape

    ref = reference(x, params)
    max_err = float(jnp.max(jnp.abs(out - ref)))
    if not jnp.allclose(out, ref, atol=2e-3, rtol=2e-3):
        raise AssertionError(f"Pallas output mismatch, max abs err = {max_err}")

    print("KERNEL_OK")
</pallas_src>

<mosaic_0001>
module attributes {stable_mosaic.version = 11 : i64} {
  func.func @kernel(%arg0: i32, %arg1: memref<16x1024xbf16, #tpu.memory_space<vmem>>, %arg2: memref<16x256xbf16, #tpu.memory_space<vmem>>, %arg3: memref<8x432xbf16, #tpu.memory_space<vmem>>, %arg4: memref<8x1xf32, #tpu.memory_space<vmem>>, %arg5: memref<8x1xf32, #tpu.memory_space<vmem>>, %arg6: memref<8x1024xf32, #tpu.memory_space<vmem>>, %arg7: memref<16x1280xbf16, #tpu.memory_space<vmem>>, %arg8: memref<432x1024xbf16, #tpu.memory_space<vmem>>) attributes {dimension_semantics = [#tpu.dimension_semantics<parallel>], iteration_bounds = array<i64: 2>, scalar_prefetch = 0 : i64, scratch_operands = 2 : i64, tpu.core_type = #tpu.core_type<tc>, window_params = [{transform_indices = @transform_0, window_bounds = array<i64: 16, 1024>}, {transform_indices = @transform_1, window_bounds = array<i64: 16, 256>}, {pipeline_mode = #tpu.pipeline_mode<synchronous>, transform_indices = @transform_2, window_bounds = array<i64: 8, 432>}, {pipeline_mode = #tpu.pipeline_mode<synchronous>, transform_indices = @transform_3, window_bounds = array<i64: 8, 1>}, {pipeline_mode = #tpu.pipeline_mode<synchronous>, transform_indices = @transform_4, window_bounds = array<i64: 8, 1>}, {transform_indices = @transform_5, window_bounds = array<i64: 8, 1024>}]} {
    %c0 = arith.constant 0 : index
    %c0_0 = arith.constant 0 : index
    %0 = vector.load %arg1[%c0, %c0_0] : memref<16x1024xbf16, #tpu.memory_space<vmem>>, vector<16x1024xbf16>
    %c0_1 = arith.constant 0 : index
    %c0_2 = arith.constant 0 : index
    %1 = vector.load %arg7[%c0_1, %c0_2] : memref<16x1280xbf16, #tpu.memory_space<vmem>>, vector<16x1024xbf16>
    tpu.vector_store %arg7[%c0_1, %c0_2], %0 {strides = array<i32>} : memref<16x1280xbf16, #tpu.memory_space<vmem>>, vector<16x1024xbf16>,
    %c0_3 = arith.constant 0 : index
    %c0_4 = arith.constant 0 : index
    %2 = vector.load %arg2[%c0_3, %c0_4] : memref<16x256xbf16, #tpu.memory_space<vmem>>, vector<16x256xbf16>
    %c0_5 = arith.constant 0 : index
    %c1024 = arith.constant 1024 : index
    %3 = vector.load %arg7[%c0_5, %c1024] : memref<16x1280xbf16, #tpu.memory_space<vmem>>, vector<16x256xbf16>
    tpu.vector_store %arg7[%c0_5, %c1024], %2 {strides = array<i32>} : memref<16x1280xbf16, #tpu.memory_space<vmem>>, vector<16x256xbf16>,
    %c0_6 = arith.constant 0 : index
    %c0_7 = arith.constant 0 : index
    %4 = vector.load %arg7[%c0_6, %c0_7] : memref<16x1280xbf16, #tpu.memory_space<vmem>>, vector<16x1024xbf16>
    %c0_8 = arith.constant 0 : index
    %c0_9 = arith.constant 0 : index
    %5 = vector.load %arg8[%c0_8, %c0_9] : memref<432x1024xbf16, #tpu.memory_space<vmem>>, vector<16x1024xbf16>
    tpu.vector_store %arg8[%c0_8, %c0_9], %4 {strides = array<i32>} : memref<432x1024xbf16, #tpu.memory_space<vmem>>, vector<16x1024xbf16>,
    %c0_10 = arith.constant 0 : index
    %c1 = arith.constant 1 : index
    %6 = vector.load %arg7[%c0_10, %c1] : memref<16x1280xbf16, #tpu.memory_space<vmem>>, vector<16x1024xbf16>
    %c16 = arith.constant 16 : index
    %c0_11 = arith.constant 0 : index
    %7 = vector.load %arg8[%c16, %c0_11] : memref<432x1024xbf16, #tpu.memory_space<vmem>>, vector<16x1024xbf16>
    tpu.vector_store %arg8[%c16, %c0_11], %6 {strides = array<i32>} : memref<432x1024xbf16, #tpu.memory_space<vmem>>, vector<16x1024xbf16>,
    %c0_12 = arith.constant 0 : index
    %c2 = arith.constant 2 : index
    %8 = vector.load %arg7[%c0_12, %c2] : memref<16x1280xbf16, #tpu.memory_space<vmem>>, vector<16x1024xbf16>
    %c32 = arith.constant 32 : index
    %c0_13 = arith.constant 0 : index
    %9 = vector.load %arg8[%c32, %c0_13] : memref<432x1024xbf16, #tpu.memory_space<vmem>>, vector<16x1024xbf16>
    tpu.vector_store %arg8[%c32, %c0_13], %8 {strides = array<i32>} : memref<432x1024xbf16, #tpu.memory_space<vmem>>, vector<16x1024xbf16>,
    %c0_14 = arith.constant 0 : index
    %c10 = arith.constant 10 : index
    %10 = vector.load %arg7[%c0_14, %c10] : memref<16x1280xbf16, #tpu.memory_space<vmem>>, vector<16x1024xbf16>
    %c48 = arith.constant 48 : index
    %c0_15 = arith.constant 0 : index
    %11 = vector.load %arg8[%c48, %c0_15] : memref<432x1024xbf16, #tpu.memory_space<vmem>>, vector<16x1024xbf16>
    tpu.vector_store %arg8[%c48, %c0_15], %10 {strides = array<i32>} : memref<432x1024xbf16, #tpu.memory_space<vmem>>, vector<16x1024xbf16>,
    %c0_16 = arith.constant 0 : index
    %c11 = arith.constant 11 : index
    %12 = vector.load %arg7[%c0_16, %c11] : memref<16x1280xbf16, #tpu.memory_space<vmem>>, vector<16x1024xbf16>
    %c64 = arith.constant 64 : index
    %c0_17 = arith.constant 0 : index
    %13 = vector.load %arg8[%c64, %c0_17] : memref<432x1024xbf16, #tpu.memory_space<vmem>>, vector<16x1024xbf16>
    tpu.vector_store %arg8[%c64, %c0_17], %12 {strides = array<i32>} : memref<432x1024xbf16, #tpu.memory_space<vmem>>, vector<16x1024xbf16>,
    %c0_18 = arith.constant 0 : index
    %c12 = arith.constant 12 : index
    %14 = vector.load %arg7[%c0_18, %c12] : memref<16x1280xbf16, #tpu.memory_space<vmem>>, vector<16x1024xbf16>
    %c80 = arith.constant 80 : index
    %c0_19 = arith.constant 0 : index
    %15 = vector.load %arg8[%c80, %c0_19] : memref<432x1024xbf16, #tpu.memory_space<vmem>>, vector<16x1024xbf16>
    tpu.vector_store %arg8[%c80, %c0_19], %14 {strides = array<i32>} : memref<432x1024xbf16, #tpu.memory_space<vmem>>, vector<16x1024xbf16>,
    %c0_20 = arith.constant 0 : index
    %c20 = arith.constant 20 : index
    %16 = vector.load %arg7[%c0_20, %c20] : memref<16x1280xbf16, #tpu.memory_space<vmem>>, vector<16x1024xbf16>
    %c96 = arith.constant 96 : index
    %c0_21 = arith.constant 0 : index
    %17 = vector.load %arg8[%c96, %c0_21] : memref<432x1024xbf16, #tpu.memory_space<vmem>>, vector<16x1024xbf16>
    tpu.vector_store %arg8[%c96, %c0_21], %16 {strides = array<i32>} : memref<432x1024xbf16, #tpu.memory_space<vmem>>, vector<16x1024xbf16>,
    %c0_22 = arith.constant 0 : index
    %c21 = arith.constant 21 : index
    %18 = vector.load %arg7[%c0_22, %c21] : memref<16x1280xbf16, #tpu.memory_space<vmem>>, vector<16x1024xbf16>
    %c112 = arith.constant 112 : index
    %c0_23 = arith.constant 0 : index
    %19 = vector.load %arg8[%c112, %c0_23] : memref<432x1024xbf16, #tpu.memory_space<vmem>>, vector<16x1024xbf16>
    tpu.vector_store %arg8[%c112, %c0_23], %18 {strides = array<i32>} : memref<432x1024xbf16, #tpu.memory_space<vmem>>, vector<16x1024xbf16>,
    %c0_24 = arith.constant 0 : index
    %c22 = arith.constant 22 : index
    %20 = vector.load %arg7[%c0_24, %c22] : memref<16x1280xbf16, #tpu.memory_space<vmem>>, vector<16x1024xbf16>
    %c128 = arith.constant 128 : index
    %c0_25 = arith.constant 0 : index
    %21 = vector.load %arg8[%c128, %c0_25] : memref<432x1024xbf16, #tpu.memory_space<vmem>>, vector<16x1024xbf16>
    tpu.vector_store %arg8[%c128, %c0_25], %20 {strides = array<i32>} : memref<432x1024xbf16, #tpu.memory_space<vmem>>, vector<16x1024xbf16>,
    %c0_26 = arith.constant 0 : index
    %c100 = arith.constant 100 : index
    %22 = vector.load %arg7[%c0_26, %c100] : memref<16x1280xbf16, #tpu.memory_space<vmem>>, vector<16x1024xbf16>
    %c144 = arith.constant 144 : index
    %c0_27 = arith.constant 0 : index
    %23 = vector.load %arg8[%c144, %c0_27] : memref<432x1024xbf16, #tpu.memory_space<vmem>>, vector<16x1024xbf16>
    tpu.vector_store %arg8[%c144, %c0_27], %22 {strides = array<i32>} : memref<432x1024xbf16, #tpu.memory_space<vmem>>, vector<16x1024xbf16>,
    %c0_28 = arith.constant 0 : index
    %c101 = arith.constant 101 : index
    %24 = vector.load %arg7[%c0_28, %c101] : memref<16x1280xbf16, #tpu.memory_space<vmem>>, vector<16x1024xbf16>
    %c160 = arith.constant 160 : index
    %c0_29 = arith.constant 0 : index
    %25 = vector.load %arg8[%c160, %c0_29] : memref<432x1024xbf16, #tpu.memory_space<vmem>>, vector<16x1024xbf16>
    tpu.vector_store %arg8[%c160, %c0_29], %24 {strides = array<i32>} : memref<432x1024xbf16, #tpu.memory_space<vmem>>, vector<16x1024xbf16>,
    %c0_30 = arith.constant 0 : index
    %c102 = arith.constant 102 : index
    %26 = vector.load %arg7[%c0_30, %c102] : memref<16x1280xbf16, #tpu.memory_space<vmem>>, vector<16x1024xbf16>
    %c176 = arith.constant 176 : index
    %c0_31 = arith.constant 0 : index
    %27 = vector.load %arg8[%c176, %c0_31] : memref<432x1024xbf16, #tpu.memory_space<vmem>>, vector<16x1024xbf16>
    tpu.vector_store %arg8[%c176, %c0_31], %26 {strides = array<i32>} : memref<432x1024xbf16, #tpu.memory_space<vmem>>, vector<16x1024xbf16>,
    %c0_32 = arith.constant 0 : index
    %c110 = arith.constant 110 : index
    %28 = vector.load %arg7[%c0_32, %c110] : memref<16x1280xbf16, #tpu.memory_space<vmem>>, vector<16x1024xbf16>
    %c192 = arith.constant 192 : index
    %c0_33 = arith.constant 0 : index
    %29 = vector.load %arg8[%c192, %c0_33] : memref<432x1024xbf16, #tpu.memory_space<vmem>>, vector<16x1024xbf16>
    tpu.vector_store %arg8[%c192, %c0_33], %28 {strides = array<i32>} : memref<432x1024xbf16, #tpu.memory_space<vmem>>, vector<16x1024xbf16>,
    %c0_34 = arith.constant 0 : index
    %c111 = arith.constant 111 : index
    %30 = vector.load %arg7[%c0_34, %c111] : memref<16x1280xbf16, #tpu.memory_space<vmem>>, vector<16x1024xbf16>
    %c208 = arith.constant 208 : index
    %c0_35 = arith.constant 0 : index
    %31 = vector.load %arg8[%c208, %c0_35] : memref<432x1024xbf16, #tpu.memory_space<vmem>>, vector<16x1024xbf16>
    tpu.vector_store %arg8[%c208, %c0_35], %30 {strides = array<i32>} : memref<432x1024xbf16, #tpu.memory_space<vmem>>, vector<16x1024xbf16>,
    %c0_36 = arith.constant 0 : index
    %c112_37 = arith.constant 112 : index
    %32 = vector.load %arg7[%c0_36, %c112_37] : memref<16x1280xbf16, #tpu.memory_space<vmem>>, vector<16x1024xbf16>
    %c224 = arith.constant 224 : index
    %c0_38 = arith.constant 0 : index
    %33 = vector.load %arg8[%c224, %c0_38] : memref<432x1024xbf16, #tpu.memory_space<vmem>>, vector<16x1024xbf16>
    tpu.vector_store %arg8[%c224, %c0_38], %32 {strides = array<i32>} : memref<432x1024xbf16, #tpu.memory_space<vmem>>, vector<16x1024xbf16>,
    %c0_39 = arith.constant 0 : index
    %c120 = arith.constant 120 : index
    %34 = vector.load %arg7[%c0_39, %c120] : memref<16x1280xbf16, #tpu.memory_space<vmem>>, vector<16x1024xbf16>
    %c240 = arith.constant 240 : index
    %c0_40 = arith.constant 0 : index
    %35 = vector.load %arg8[%c240, %c0_40] : memref<432x1024xbf16, #tpu.memory_space<vmem>>, vector<16x1024xbf16>
    tpu.vector_store %arg8[%c240, %c0_40], %34 {strides = array<i32>} : memref<432x1024xbf16, #tpu.memory_space<vmem>>, vector<16x1024xbf16>,
    %c0_41 = arith.constant 0 : index
    %c121 = arith.constant 121 : index
    %36 = vector.load %arg7[%c0_41, %c121] : memref<16x1280xbf16, #tpu.memory_space<vmem>>, vector<16x1024xbf16>
    %c256 = arith.constant 256 : index
    %c0_42 = arith.constant 0 : index
    %37 = vector.load %arg8[%c256, %c0_42] : memref<432x1024xbf16, #tpu.memory_space<vmem>>, vector<16x1024xbf16>
    tpu.vector_store %arg8[%c256, %c0_42], %36 {strides = array<i32>} : memref<432x1024xbf16, #tpu.memory_space<vmem>>, vector<16x1024xbf16>,
    %c0_43 = arith.constant 0 : index
    %c122 = arith.constant 122 : index
    %38 = vector.load %arg7[%c0_43, %c122] : memref<16x1280xbf16, #tpu.memory_space<vmem>>, vector<16x1024xbf16>
    %c272 = arith.constant 272 : index
    %c0_44 = arith.constant 0 : index
    %39 = vector.load %arg8[%c272, %c0_44] : memref<432x1024xbf16, #tpu.memory_space<vmem>>, vector<16x1024xbf16>
    tpu.vector_store %arg8[%c272, %c0_44], %38 {strides = array<i32>} : memref<432x1024xbf16, #tpu.memory_space<vmem>>, vector<16x1024xbf16>,
    %c0_45 = arith.constant 0 : index
    %c200 = arith.constant 200 : index
    %40 = vector.load %arg7[%c0_45, %c200] : memref<16x1280xbf16, #tpu.memory_space<vmem>>, vector<16x1024xbf16>
    %c288 = arith.constant 288 : index
    %c0_46 = arith.constant 0 : index
    %41 = vector.load %arg8[%c288, %c0_46] : memref<432x1024xbf16, #tpu.memory_space<vmem>>, vector<16x1024xbf16>
    tpu.vector_store %arg8[%c288, %c0_46], %40 {strides = array<i32>} : memref<432x1024xbf16, #tpu.memory_space<vmem>>, vector<16x1024xbf16>,
    %c0_47 = arith.constant 0 : index
    %c201 = arith.constant 201 : index
    %42 = vector.load %arg7[%c0_47, %c201] : memref<16x1280xbf16, #tpu.memory_space<vmem>>, vector<16x1024xbf16>
    %c304 = arith.constant 304 : index
    %c0_48 = arith.constant 0 : index
    %43 = vector.load %arg8[%c304, %c0_48] : memref<432x1024xbf16, #tpu.memory_space<vmem>>, vector<16x1024xbf16>
    tpu.vector_store %arg8[%c304, %c0_48], %42 {strides = array<i32>} : memref<432x1024xbf16, #tpu.memory_space<vmem>>, vector<16x1024xbf16>,
    %c0_49 = arith.constant 0 : index
    %c202 = arith.constant 202 : index
    %44 = vector.load %arg7[%c0_49, %c202] : memref<16x1280xbf16, #tpu.memory_space<vmem>>, vector<16x1024xbf16>
    %c320 = arith.constant 320 : index
    %c0_50 = arith.constant 0 : index
    %45 = vector.load %arg8[%c320, %c0_50] : memref<432x1024xbf16, #tpu.memory_space<vmem>>, vector<16x1024xbf16>
    tpu.vector_store %arg8[%c320, %c0_50], %44 {strides = array<i32>} : memref<432x1024xbf16, #tpu.memory_space<vmem>>, vector<16x1024xbf16>,
    %c0_51 = arith.constant 0 : index
    %c210 = arith.constant 210 : index
    %46 = vector.load %arg7[%c0_51, %c210] : memref<16x1280xbf16, #tpu.memory_space<vmem>>, vector<16x1024xbf16>
    %c336 = arith.constant 336 : index
    %c0_52 = arith.constant 0 : index
    %47 = vector.load %arg8[%c336, %c0_52] : memref<432x1024xbf16, #tpu.memory_space<vmem>>, vector<16x1024xbf16>
    tpu.vector_store %arg8[%c336, %c0_52], %46 {strides = array<i32>} : memref<432x1024xbf16, #tpu.memory_space<vmem>>, vector<16x1024xbf16>,
    %c0_53 = arith.constant 0 : index
    %c211 = arith.constant 211 : index
    %48 = vector.load %arg7[%c0_53, %c211] : memref<16x1280xbf16, #tpu.memory_space<vmem>>, vector<16x1024xbf16>
    %c352 = arith.constant 352 : index
    %c0_54 = arith.constant 0 : index
    %49 = vector.load %arg8[%c352, %c0_54] : memref<432x1024xbf16, #tpu.memory_space<vmem>>, vector<16x1024xbf16>
    tpu.vector_store %arg8[%c352, %c0_54], %48 {strides = array<i32>} : memref<432x1024xbf16, #tpu.memory_space<vmem>>, vector<16x1024xbf16>,
    %c0_55 = arith.constant 0 : index
    %c212 = arith.constant 212 : index
    %50 = vector.load %arg7[%c0_55, %c212] : memref<16x1280xbf16, #tpu.memory_space<vmem>>, vector<16x1024xbf16>
    %c368 = arith.constant 368 : index
    %c0_56 = arith.constant 0 : index
    %51 = vector.load %arg8[%c368, %c0_56] : memref<432x1024xbf16, #tpu.memory_space<vmem>>, vector<16x1024xbf16>
    tpu.vector_store %arg8[%c368, %c0_56], %50 {strides = array<i32>} : memref<432x1024xbf16, #tpu.memory_space<vmem>>, vector<16x1024xbf16>,
    %c0_57 = arith.constant 0 : index
    %c220 = arith.constant 220 : index
    %52 = vector.load %arg7[%c0_57, %c220] : memref<16x1280xbf16, #tpu.memory_space<vmem>>, vector<16x1024xbf16>
    %c384 = arith.constant 384 : index
    %c0_58 = arith.constant 0 : index
    %53 = vector.load %arg8[%c384, %c0_58] : memref<432x1024xbf16, #tpu.memory_space<vmem>>, vector<16x1024xbf16>
    tpu.vector_store %arg8[%c384, %c0_58], %52 {strides = array<i32>} : memref<432x1024xbf16, #tpu.memory_space<vmem>>, vector<16x1024xbf16>,
    %c0_59 = arith.constant 0 : index
    %c221 = arith.constant 221 : index
    %54 = vector.load %arg7[%c0_59, %c221] : memref<16x1280xbf16, #tpu.memory_space<vmem>>, vector<16x1024xbf16>
    %c400 = arith.constant 400 : index
    %c0_60 = arith.constant 0 : index
    %55 = vector.load %arg8[%c400, %c0_60] : memref<432x1024xbf16, #tpu.memory_space<vmem>>, vector<16x1024xbf16>
    tpu.vector_store %arg8[%c400, %c0_60], %54 {strides = array<i32>} : memref<432x1024xbf16, #tpu.memory_space<vmem>>, vector<16x1024xbf16>,
    %c0_61 = arith.constant 0 : index
    %c222 = arith.constant 222 : index
    %56 = vector.load %arg7[%c0_61, %c222] : memref<16x1280xbf16, #tpu.memory_space<vmem>>, vector<16x1024xbf16>
    %c416 = arith.constant 416 : index
    %c0_62 = arith.constant 0 : index
    %57 = vector.load %arg8[%c416, %c0_62] : memref<432x1024xbf16, #tpu.memory_space<vmem>>, vector<16x1024xbf16>
    tpu.vector_store %arg8[%c416, %c0_62], %56 {strides = array<i32>} : memref<432x1024xbf16, #tpu.memory_space<vmem>>, vector<16x1024xbf16>,
    %c0_63 = arith.constant 0 : index
    %c0_64 = arith.constant 0 : index
    %58 = vector.load %arg3[%c0_63, %c0_64] : memref<8x432xbf16, #tpu.memory_space<vmem>>, vector<8x432xbf16>
    %c0_65 = arith.constant 0 : index
    %c0_66 = arith.constant 0 : index
    %59 = vector.load %arg8[%c0_65, %c0_66] : memref<432x1024xbf16, #tpu.memory_space<vmem>>, vector<432x1024xbf16>
    %cst = arith.constant dense<0.000000e+00> : vector<8x1024xf32>
    %60 = tpu.matmul %58, %59, %cst {dimension_numbers = #tpu.dot_dimension_numbers<[1], [0], [0], [1], [0, 0, 1, 1], [], []>} : vector<8x432xbf16>, vector<432x1024xbf16>, vector<8x1024xf32> -> vector<8x1024xf32>
    %c0_67 = arith.constant 0 : index
    %c0_68 = arith.constant 0 : index
    %61 = vector.load %arg4[%c0_67, %c0_68] : memref<8x1xf32, #tpu.memory_space<vmem>>, vector<8x1xf32>
    %62 = vector.broadcast %61 : vector<8x1xf32> to vector<8x1024xf32>
    %63 = arith.mulf %60, %62 : vector<8x1024xf32>
    %c0_69 = arith.constant 0 : index
    %c0_70 = arith.constant 0 : index
    %64 = vector.load %arg5[%c0_69, %c0_70] : memref<8x1xf32, #tpu.memory_space<vmem>>, vector<8x1xf32>
    %65 = vector.broadcast %64 : vector<8x1xf32> to vector<8x1024xf32>
    %66 = arith.addf %63, %65 : vector<8x1024xf32>
    %cst_71 = arith.constant 0.000000e+00 : f32
    %67 = vector.broadcast %cst_71 : f32 to vector<8x1024xf32>
    %68 = arith.cmpf ogt, %66, %67 : vector<8x1024xf32>
    %cst_72 = arith.constant 0.00999999977 : f32
    %69 = vector.broadcast %cst_72 : f32 to vector<8x1024xf32>
    %70 = arith.mulf %69, %66 : vector<8x1024xf32>
    %71 = arith.select %68, %66, %70 : vector<8x1024xi1>, vector<8x1024xf32>
    %c0_73 = arith.constant 0 : index
    %c0_74 = arith.constant 0 : index
    %72 = vector.load %arg6[%c0_73, %c0_74] : memref<8x1024xf32, #tpu.memory_space<vmem>>, vector<8x1024xf32>
    tpu.vector_store %arg6[%c0_73, %c0_74], %71 {strides = array<i32>} : memref<8x1024xf32, #tpu.memory_space<vmem>>, vector<8x1024xf32>,
    return
  }
  func.func @transform_0(%arg0: i32) -> (i32, i32) {
    %c0_i32 = arith.constant 0 : i32
    %c0_i32_0 = arith.constant 0 : i32
    return %c0_i32, %arg0 : i32, i32
  }
  func.func @transform_1(%arg0: i32) -> (i32, i32) {
    %c1_i32 = arith.constant 1 : i32
    %0 = arith.addi %arg0, %c1_i32 : i32
    %c4_i32 = arith.constant 4 : i32
    %1 = arith.muli %0, %c4_i32 : i32
    %c0_i32 = arith.constant 0 : i32
    %c0_i32_0 = arith.constant 0 : i32
    return %c0_i32, %1 : i32, i32
  }
  func.func @transform_2(%arg0: i32) -> (i32, i32) {
    %c0_i32 = arith.constant 0 : i32
    %c0_i32_0 = arith.constant 0 : i32
    %c0_i32_1 = arith.constant 0 : i32
    return %c0_i32, %c0_i32_0 : i32, i32
  }
  func.func @transform_3(%arg0: i32) -> (i32, i32) {
    %c0_i32 = arith.constant 0 : i32
    %c0_i32_0 = arith.constant 0 : i32
    %c0_i32_1 = arith.constant 0 : i32
    return %c0_i32, %c0_i32_0 : i32, i32
  }
  func.func @transform_4(%arg0: i32) -> (i32, i32) {
    %c0_i32 = arith.constant 0 : i32
    %c0_i32_0 = arith.constant 0 : i32
    %c0_i32_1 = arith.constant 0 : i32
    return %c0_i32, %c0_i32_0 : i32, i32
  }
  func.func @transform_5(%arg0: i32) -> (i32, i32) {
    %c0_i32 = arith.constant 0 : i32
    %c0_i32_0 = arith.constant 0 : i32
    return %c0_i32, %arg0 : i32, i32
  }
}

</mosaic_0001>

<bundles_post_ra>
// kernel: basic_block_forward.1
= control target key start
LH: loop header
LB: loop body
LE: loop exit
PB: predicated region body
PF: predicated region fallthrough
CT: control target
= control target key end

     0   :  { %s8307_s0 = inlined_call_operand.vmem [shape: bf16[16,2304], index: 0, kind: input, shape index: {}, may-alias: {0,1}]   ;;  %s8308_s1 = inlined_call_operand.vmem [shape: bf16[16,2304], index: 1, kind: input, shape index: {}, may-alias: {0,1}]   ;;  %s8309_s2 = inlined_call_operand.vmem [shape: bf16[8,432], index: 2, kind: input, shape index: {}]   ;;  %s8310_s3 = inlined_call_operand.vmem [shape: f32[8,1], index: 3, kind: input, shape index: {}]   ;;  %s8311_s4 = inlined_call_operand.vmem [shape: f32[8,1], index: 4, kind: input, shape index: {}]   ;;  %s8312_s5 = inlined_call_operand.vmem [shape: f32[8,2048], index: 5, kind: output, shape index: {}]  }
   0x1   :  { %8328 = sst [smem:[#allocation8_spill]] %s8307_s0 }
   0x2   :  { %s6304_s18 = smov 0   ;;  %s6306_s19 = smov 0  }
   0x3   :  { %s6308_s20 = smov 0   ;;  %s6310_s21 = smov 0  }
   0x4   :  { %s6312_s22 = smov 0  }
   0x5 LB: > { %8329 = sst [smem:[#allocation6_spill]] %s6175_s21  ;;  %s6331_s24 = sadd.s32 1, %s6179_s22   ;;  %s6179_s22 = sphi %s6312_s22, %s8362_s22   ;;  %s6175_s21 = sphi %s6310_s21, %s8359_s21   ;;  %s6171_s20 = sphi %s6308_s20, %s8358_s20   ;;  %s6167_s19 = sphi %s6306_s19, %s8361_s19   ;;  %s6163_s18 = sphi %s6304_s18, %s8360_s18  }
   0x6   : > { %s19_s25 = ssub.s32 %s6179_s22, %s6331_s24  ;;  %s22_s26 = sadd.s32 1, %s6175_s21 }
   0x7   : > { %p20_p0 = scmp.eq.s32.totalorder %s19_s25, 0  ;;  %p29_p1 = scmp.ne.s32.totalorder %s6175_s21, %s6171_s20 }
   0x8   : > { %p30_p2 = scmp.eq.s32.totalorder %s6179_s22, 0  ;;  %s5651_s27 = sshll.u32 %s6179_s22, 2 }
   0x9   : > { %s6341_s28 = scalar_select %p20_p0, %s6175_s21, %s22_s26  }
   0xa   : > { %p31_p3 = por %p30_p2, %p29_p1  ;;  %s5652_s29 = sadd.s32 4, %s5651_s27 }
   0xb   : > { %8330 = sst [smem:[#allocation7_spill]] %s6341_s28  ;;  %s5654_s30 = sadd.s32 4, %s5652_s29 }
   0xc   : > { %s52_s6 = sadd.s32 1, %s6167_s19  ;;  %s49_s7 = ssub.s32 %s5652_s29, %s5654_s30 }
   0xd   : > { %p59_p4 = scmp.ne.s32.totalorder %s6167_s19, %s6163_s18  ;;  %p50_p5 = scmp.eq.s32.totalorder %s49_s7, 0 }
   0xe   : > { %p4738_p7 = scmp.ge.s32.totalorder %s6179_s22, 2 }
   0xf   : > { %p6346_p6 = por %p59_p4, %p30_p2 }
  0x10   : > { %s6351_s9 = scalar_select %p50_p5, %s6167_s19, %s52_s6  }
  0x11   : > { %183 = sbr.rel (%p4738_p7) target bundleno = 159 (0x9f), region = 28 }
  0x16   : > { %186 = sbr.rel (!%p31_p3) target bundleno = 153 (0x99), region = 32  ;;  %s188_s10 = sand.u32 (%p31_p3), 1, %s6175_s21  }
  0x17   : > { %s4740_s11 = sshll.u32 (%p31_p3), %s6179_s22, 3  ;;  %s4739_s12 = sshll.u32 (%p31_p3), %s188_s10, 6 }
  0x18   : > { %s192_s13 = ssub.s32 (%p31_p3), 18, %s4740_s11  ;;  %s5655_s14 = sshll.u32 (%p31_p3), %s6179_s22, 5 }
  0x19   : > { %p193_p8 = scmp.lt.s32.totalorder (%p31_p3), %s192_s13, 8  ;;  %s8332_s0 = sld [smem:[#allocation8_spill]] (%p31_p3) }
  0x1a   : > { %s6364_s27 = scalar_lea.vmem (%p31_p3), [#allocation4], %s4739_s12  }
  0x1b   : > { %s8364_s13 = smov (!%p193_p8, %s192_s13), 8 }
  0x1c   : > { %s4741_s25 = sshll.u32 %s8364_s13, 3  ;;  %s6362_s26 = sshll.u32 %s8364_s13, 2 }
  0x1d   : > { %p4745_p9 = scmp.eq.s32.totalorder %s4741_s25, 0 }
  0x1e   : > { %p203_p10 = scmp.lt.u32.totalorder (!%p4745_p9), %s6362_s26, 8 }
  0x1f   : > { %s6360_s17 = scalar_lea.vmem %s8332_s0, %s5655_s14   ;;  %202 = sbr.rel (%p4745_p9) target bundleno = 153 (0x99), region = 36 }
  0x24   : > { %206 = sbr.rel (%p203_p10) target bundleno = 143 (0x8f), region = 40  ;;  %s6368_s29 = sand.u32 (!%p203_p10), 7, %s6362_s26  }
  0x25   : > { %p225_p11 = scmp.eq.s32.totalorder (!%p203_p10), %s6368_s29, 0  ;;  %p4746_p12 = scmp.ne.s32.totalorder (!%p203_p10), %s6368_s29, 0 }
  0x29   : > { %228 = sbr.rel (%p4746_p12) target bundleno = 89 (0x59), region = 55  ;;  %s229_s30 = sshrl.u32 (!%p4746_p12), %s6362_s26, 3 }
  0x2a   : > { %s6375_s6 = sshrl.u32 (!%p4746_p12), %s229_s30, 4 }
  0x2b   : > { %p4747_p13 = scmp.le.s32.totalorder (!%p4746_p12), %s6375_s6, 0 }
  0x2e   : > { %4656 = sbr.rel (%p4747_p13) target bundleno = 72 (0x48), region = 199  ;;  %s8333_s7 = smov (!%p4747_p13), %s6364_s27 }
  0x2f   : > { %s8334_s10 = smov (!%p4747_p13), %s6360_s17  ;;  %s6384_s11 = smov (!%p4747_p13), 0  }
  0x30   : > { %s6386_s12 = smov (!%p4747_p13), 0  }
  0x33 LB: >> { %v258_v0 = vld [vmem:[%s6187_s10 + $0x48] sm:$0xff]  ;;  %v260_v1 = vld [vmem:[%s6187_s10 + $0x50] sm:$0xff]  ;;  %v240_v2 = vld [vmem:[%s6187_s10] sm:$0xff]  ;;  %s304_s13 = sadd.s32 1, %s6191_s11  ;;  %s234_s12 = sadd.s32 1, %s6195_s12   ;;  %s6195_s12 = sphi %s6386_s12, %s234_s12   ;;  %s6191_s11 = sphi %s6384_s11, %s8337_s11   ;;  %s6187_s10 = sphi %s8334_s10, %s8336_s10   ;;  %s6183_s7 = sphi %s8333_s7, %s8335_s7  }
  0x34   : >> { %273 = vst [vmem:[%s6183_s7 + $0x20] sm:$0xff] %v258_v0  ;;  %v242_v3 = vld [vmem:[%s6187_s10 + $0x8] sm:$0xff]  ;;  %v244_v4 = vld [vmem:[%s6187_s10 + $0x10] sm:$0xff]  ;;  %v246_v5 = vld [vmem:[%s6187_s10 + $0x18] sm:$0xff]  ;;  %p305_p0 = scmp.ge.s32.totalorder %s304_s13, %s6375_s6  ;;  %p233_p1 = scmp.ge.s32.totalorder %s234_s12, %s6375_s6 }
  0x35   : >> { %275 = vst [vmem:[%s6183_s7 + $0x28] sm:$0xff] %v260_v1  ;;  %v262_v6 = vld [vmem:[%s6187_s10 + $0x58] sm:$0xff]  ;;  %v264_v7 = vld [vmem:[%s6187_s10 + $0x60] sm:$0xff]  ;;  %v266_v8 = vld [vmem:[%s6187_s10 + $0x68] sm:$0xff] }
  0x36   : >> { %241 = vst [vmem:[%s6183_s7] sm:$0xff] %v240_v2  ;;  %s8366_s13 = smov (%p305_p0, %s304_s13), 0  ;;  %v268_v9 = vld [vmem:[%s6187_s10 + $0x70] sm:$0xff]  ;;  %v270_v10 = vld [vmem:[%s6187_s10 + $0x78] sm:$0xff]  ;;  %v286_v11 = vld [vmem:[%s6187_s10 + $0x80] sm:$0xff] }
  0x37   : >> { %243 = vst [vmem:[%s6183_s7 + $0x8] sm:$0xff] %v242_v3  ;;  %s4748_s14 = sshll.u32 %s8366_s13, 7  ;;  %v288_v12 = vld [vmem:[%s6187_s10 + $0x88] sm:$0xff]  ;;  %v290_v13 = vld [vmem:[%s6187_s10 + $0x90] sm:$0xff]  ;;  %v292_v14 = vld [vmem:[%s6187_s10 + $0x98] sm:$0xff]  ;;  %s8337_s11 = smov %s8366_s13 }
  0x38   : >> { %245 = vst [vmem:[%s6183_s7 + $0x10] sm:$0xff] %v244_v4  ;;  %s309_s15 = scalar_lea.vmem %s6360_s17, %s4748_s14   ;;  %s310_s16 = scalar_lea.vmem %s6364_s27, %s4748_s14 [#allocation4]   ;;  %v294_v15 = vld [vmem:[%s6187_s10 + $0xa0] sm:$0xff]  ;;  %v296_v16 = vld [vmem:[%s6187_s10 + $0xa8] sm:$0xff]  ;;  %v298_v17 = vld [vmem:[%s6187_s10 + $0xb0] sm:$0xff] }
  0x39   : >> { %247 = vst [vmem:[%s6183_s7 + $0x18] sm:$0xff] %v246_v5  ;;  %v300_v18 = vld [vmem:[%s6187_s10 + $0xb8] sm:$0xff]  ;;  %v302_v19 = vld [vmem:[%s6187_s10 + $0xc0] sm:$0xff]  ;;  %s8336_s10 = smov %s309_s15 }
  0x3a   : >> { %277 = vst [vmem:[%s6183_s7 + $0x30] sm:$0xff] %v262_v6 }
  0x3b   : >> { %279 = vst [vmem:[%s6183_s7 + $0x38] sm:$0xff] %v264_v7 }
  0x3c   : >> { %281 = vst [vmem:[%s6183_s7 + $0x40] sm:$0xff] %v266_v8 }
  0x3d   : >> { %283 = vst [vmem:[%s6183_s7 + $0x48] sm:$0xff] %v268_v9 }
  0x3e   : >> { %285 = vst [vmem:[%s6183_s7 + $0x50] sm:$0xff] %v270_v10 }
  0x3f   : >> { %287 = vst [vmem:[%s6183_s7 + $0x58] sm:$0xff] %v286_v11 }
  0x40   : >> { %289 = vst [vmem:[%s6183_s7 + $0x60] sm:$0xff] %v288_v12 }
  0x41   : >> { %291 = vst [vmem:[%s6183_s7 + $0x68] sm:$0xff] %v290_v13 }
  0x42   : >> { %293 = vst [vmem:[%s6183_s7 + $0x70] sm:$0xff] %v292_v14 }
  0x43   : >> { %295 = vst [vmem:[%s6183_s7 + $0x78] sm:$0xff] %v294_v15  ;;  %236 = sbr.rel (!%p233_p1) target bundleno = 51 (0x33), region = 205 }
  0x44   : >> { %297 = vst [vmem:[%s6183_s7 + $0x80] sm:$0xff] %v296_v16 }
  0x45   : >> { %299 = vst [vmem:[%s6183_s7 + $0x88] sm:$0xff] %v298_v17 }
  0x46   : >> { %301 = vst [vmem:[%s6183_s7 + $0x90] sm:$0xff] %v300_v18 }
  0x47   : >> { %303 = vst [vmem:[%s6183_s7 + $0x98] sm:$0xff] %v302_v19  ;;  %s8335_s7 = smov %s310_s16 }
  0x48 PF: > { %s6457_s25 = sand.u32 15, %s229_s30   ;;  %s5656_s14 = sshll.u32 %s6375_s6, 7 }
  0x49   : > { %s6461_s23 = scalar_lea.vmem %s6360_s17, %s5656_s14   ;;  %s317_s0 = scalar_lea.vmem %s6364_s27, %s5656_s14 [#allocation4]  }
  0x4a   : > { %p4753_p2 = scmp.le.s32.totalorder %s6457_s25, 0 }
  0x4b   : > { %s6197_s15 = smov (!%p4753_p2), %s317_s0   ;;  %s6201_s13 = smov (!%p4753_p2), %s6461_s23  }
  0x4c   : > { %4670 = sbr.rel (%p4753_p2) target bundleno = 89 (0x59), region = 210  ;;  %s6205_s12 = smov (!%p4753_p2), 0  }
  0x4d   : > { %s6209_s16 = smov (!%p4753_p2), 0  }
  0x51 LB: >> { %v327_v20 = vld [vmem:[%s6203_s13] sm:$0xff]  ;;  %v329_v21 = vld [vmem:[%s6203_s13 + $0x48] sm:$0xff]  ;;  %s331_s30 = sadd.s32 1, %s6207_s12  ;;  %s321_s16 = sadd.s32 1, %s6211_s16   ;;  %s6211_s16 = sphi %s6209_s16, %s321_s16   ;;  %s6207_s12 = sphi %s6205_s12, %s6206_s12   ;;  %s6203_s13 = sphi %s6201_s13, %s336_s13   ;;  %s6199_s15 = sphi %s6197_s15, %s337_s15  }
  0x52   : >> { %328 = vst [vmem:[%s6199_s15] sm:$0xff] %v327_v20  ;;  %p332_p3 = scmp.ge.s32.totalorder %s331_s30, %s6457_s25  ;;  %p320_p4 = scmp.ge.s32.totalorder %s321_s16, %s6457_s25 }
  0x53   : >> { %330 = vst [vmem:[%s6199_s15 + $0x20] sm:$0xff] %v329_v21 }
  0x54   : >> { %s8368_s30 = smov (%p332_p3, %s331_s30), 0  ;;  %323 = sbr.rel (!%p320_p4) target bundleno = 81 (0x51), region = 216 }
  0x55   : >> { %s4754_s6 = sshll.u32 %s8368_s30, 3  ;;  %s6206_s12 = smov %s8368_s30  }
  0x56   : >> { %s336_s13 = scalar_lea.vmem %s6461_s23, %s4754_s6   ;;  %s337_s15 = scalar_lea.vmem %s317_s0, %s4754_s6 [#allocation4]  }
  0x59 PF: > { %340 = sbr.rel (%p225_p11) target bundleno = 143 (0x8f), region = 73  ;;  %s342_s7 = ssub.s32 (!%p225_p11), %s6362_s26, %s6368_s29 }
  0x5a   : > { %s346_s10 = sshrl.u32 (!%p225_p11), %s6362_s26, 3  ;;  %s6475_s11 = scalar_lea.vmem (!%p225_p11), %s6360_s17, %s342_s7 }
  0x5b   : > { %s6478_s14 = scalar_lea.vmem (!%p225_p11), %s6364_s27, %s342_s7 [#allocation4]  ;;  %s6482_s15 = sshrl.u32 (!%p225_p11), %s346_s10, 4 }
  0x5c   : > { %p4756_p5 = scmp.le.s32.totalorder (!%p225_p11), %s6482_s15, 0 }
  0x5e   : > { %4684 = sbr.rel (%p4756_p5) target bundleno = 120 (0x78), region = 221  ;;  %s8338_s0 = smov (!%p4756_p5), %s6364_s27 }
  0x5f   : > { %s8339_s23 = smov (!%p4756_p5), %s6360_s17  ;;  %s6491_s25 = smov (!%p4756_p5), 0  }
  0x60   : > { %s6493_s13 = smov (!%p4756_p5), 0  }
  0x63 LB: >> { %v375_v22 = vld [vmem:[%s6219_s23 + $0x48] sm:$0xff]  ;;  %v377_v23 = vld [vmem:[%s6219_s23 + $0x50] sm:$0xff]  ;;  %v357_v24 = vld [vmem:[%s6219_s23] sm:$0xff]  ;;  %s421_s12 = sadd.s32 1, %s6223_s25  ;;  %s351_s13 = sadd.s32 1, %s6227_s13   ;;  %s6227_s13 = sphi %s6493_s13, %s351_s13   ;;  %s6223_s25 = sphi %s6491_s25, %s8342_s25   ;;  %s6219_s23 = sphi %s8339_s23, %s8341_s23   ;;  %s6215_s0 = sphi %s8338_s0, %s8340_s0  }
  0x64   : >> { %390 = vst [vmem:[%s6215_s0 + $0x20] sm:$0xff] %v375_v22  ;;  %v359_v25 = vld [vmem:[%s6219_s23 + $0x8] sm:$0xff]  ;;  %v361_v26 = vld [vmem:[%s6219_s23 + $0x10] sm:$0xff]  ;;  %v363_v27 = vld [vmem:[%s6219_s23 + $0x18] sm:$0xff]  ;;  %p422_p7 = scmp.ge.s32.totalorder %s421_s12, %s6482_s15  ;;  %p350_p8 = scmp.ge.s32.totalorder %s351_s13, %s6482_s15 }
  0x65   : >> { %392 = vst [vmem:[%s6215_s0 + $0x28] sm:$0xff] %v377_v23  ;;  %v379_v28 = vld [vmem:[%s6219_s23 + $0x58] sm:$0xff]  ;;  %v381_v29 = vld [vmem:[%s6219_s23 + $0x60] sm:$0xff]  ;;  %v383_v30 = vld [vmem:[%s6219_s23 + $0x68] sm:$0xff] }
  0x66   : >> { %358 = vst [vmem:[%s6215_s0] sm:$0xff] %v357_v24  ;;  %s8370_s12 = smov (%p422_p7, %s421_s12), 0  ;;  %v385_v31 = vld [vmem:[%s6219_s23 + $0x70] sm:$0xff]  ;;  %v387_v32 = vld [vmem:[%s6219_s23 + $0x78] sm:$0xff]  ;;  %v403_v33 = vld [vmem:[%s6219_s23 + $0x80] sm:$0xff] }
  0x67   : >> { %360 = vst [vmem:[%s6215_s0 + $0x8] sm:$0xff] %v359_v25  ;;  %s4757_s16 = sshll.u32 %s8370_s12, 7  ;;  %v405_v34 = vld [vmem:[%s6219_s23 + $0x88] sm:$0xff]  ;;  %v407_v35 = vld [vmem:[%s6219_s23 + $0x90] sm:$0xff]  ;;  %v409_v36 = vld [vmem:[%s6219_s23 + $0x98] sm:$0xff]  ;;  %s8342_s25 = smov %s8370_s12 }
  0x68   : >> { %362 = vst [vmem:[%s6215_s0 + $0x10] sm:$0xff] %v361_v26  ;;  %s426_s30 = scalar_lea.vmem %s6360_s17, %s4757_s16   ;;  %s427_s6 = scalar_lea.vmem %s6364_s27, %s4757_s16 [#allocation4]   ;;  %v411_v37 = vld [vmem:[%s6219_s23 + $0xa0] sm:$0xff]  ;;  %v413_v38 = vld [vmem:[%s6219_s23 + $0xa8] sm:$0xff]  ;;  %v415_v39 = vld [vmem:[%s6219_s23 + $0xb0] sm:$0xff] }
  0x69   : >> { %364 = vst [vmem:[%s6215_s0 + $0x18] sm:$0xff] %v363_v27  ;;  %v417_v40 = vld [vmem:[%s6219_s23 + $0xb8] sm:$0xff]  ;;  %v419_v41 = vld [vmem:[%s6219_s23 + $0xc0] sm:$0xff]  ;;  %s8341_s23 = smov %s426_s30 }
  0x6a   : >> { %394 = vst [vmem:[%s6215_s0 + $0x30] sm:$0xff] %v379_v28 }
  0x6b   : >> { %396 = vst [vmem:[%s6215_s0 + $0x38] sm:$0xff] %v381_v29 }
  0x6c   : >> { %398 = vst [vmem:[%s6215_s0 + $0x40] sm:$0xff] %v383_v30 }
  0x6d   : >> { %400 = vst [vmem:[%s6215_s0 + $0x48] sm:$0xff] %v385_v31 }
  0x6e   : >> { %402 = vst [vmem:[%s6215_s0 + $0x50] sm:$0xff] %v387_v32 }
  0x6f   : >> { %404 = vst [vmem:[%s6215_s0 + $0x58] sm:$0xff] %v403_v33 }
  0x70   : >> { %406 = vst [vmem:[%s6215_s0 + $0x60] sm:$0xff] %v405_v34 }
  0x71   : >> { %408 = vst [vmem:[%s6215_s0 + $0x68] sm:$0xff] %v407_v35 }
  0x72   : >> { %410 = vst [vmem:[%s6215_s0 + $0x70] sm:$0xff] %v409_v36 }
  0x73   : >> { %412 = vst [vmem:[%s6215_s0 + $0x78] sm:$0xff] %v411_v37  ;;  %353 = sbr.rel (!%p350_p8) target bundleno = 99 (0x63), region = 227 }
  0x74   : >> { %414 = vst [vmem:[%s6215_s0 + $0x80] sm:$0xff] %v413_v38 }
  0x75   : >> { %416 = vst [vmem:[%s6215_s0 + $0x88] sm:$0xff] %v415_v39 }
  0x76   : >> { %418 = vst [vmem:[%s6215_s0 + $0x90] sm:$0xff] %v417_v40 }
  0x77   : >> { %420 = vst [vmem:[%s6215_s0 + $0x98] sm:$0xff] %v419_v41  ;;  %s8340_s0 = smov %s427_s6 }
  0x78 PF: > { %s6564_s7 = sand.u32 15, %s346_s10   ;;  %s5658_s16 = sshll.u32 %s6482_s15, 7 }
  0x79   : > { %s6568_s28 = scalar_lea.vmem %s6360_s17, %s5658_s16   ;;  %s434_s21 = scalar_lea.vmem %s6364_s27, %s5658_s16 [#allocation4]  }
  0x7a   : > { %p4762_p9 = scmp.le.s32.totalorder %s6564_s7, 0 }
  0x7b   : > { %s6229_s30 = smov (!%p4762_p9), %s434_s21   ;;  %s6233_s12 = smov (!%p4762_p9), %s6568_s28  }
  0x7c   : > { %4698 = sbr.rel (%p4762_p9) target bundleno = 137 (0x89), region = 232  ;;  %s6237_s13 = smov (!%p4762_p9), 0  }
  0x7d   : > { %s6241_s6 = smov (!%p4762_p9), 0  }
  0x81 LB: >> { %v444_v42 = vld [vmem:[%s6235_s12] sm:$0xff]  ;;  %v446_v43 = vld [vmem:[%s6235_s12 + $0x48] sm:$0xff]  ;;  %s448_s10 = sadd.s32 1, %s6239_s13  ;;  %s438_s6 = sadd.s32 1, %s6243_s6   ;;  %s6243_s6 = sphi %s6241_s6, %s438_s6   ;;  %s6239_s13 = sphi %s6237_s13, %s6238_s13   ;;  %s6235_s12 = sphi %s6233_s12, %s453_s12   ;;  %s6231_s30 = sphi %s6229_s30, %s454_s30  }
  0x82   : >> { %445 = vst [vmem:[%s6231_s30] sm:$0xff] %v444_v42  ;;  %p449_p10 = scmp.ge.s32.totalorder %s448_s10, %s6564_s7  ;;  %p437_p11 = scmp.ge.s32.totalorder %s438_s6, %s6564_s7 }
  0x83   : >> { %447 = vst [vmem:[%s6231_s30 + $0x20] sm:$0xff] %v446_v43 }
  0x84   : >> { %s8372_s10 = smov (%p449_p10, %s448_s10), 0  ;;  %440 = sbr.rel (!%p437_p11) target bundleno = 129 (0x81), region = 238 }
  0x85   : >> { %s4763_s15 = sshll.u32 %s8372_s10, 3  ;;  %s6238_s13 = smov %s8372_s10  }
  0x86   : >> { %s453_s12 = scalar_lea.vmem %s6568_s28, %s4763_s15   ;;  %s454_s30 = scalar_lea.vmem %s434_s21, %s4763_s15 [#allocation4]  }
  0x89 PF: > { %s6245_s0 = smov 1  }
  0x8a   : > { %s455_s23 = sshll.u32 %s6245_s0, %s6368_s29 }
  0x8b   : > { %s4765_s25 = sadd.s32 4294967295, %s455_s23 }
  0x8c   : > { %v465_v44 = vld [vmem:[%s6475_s11] sm:%s4765_s25]  ;;  %v467_v45 = vld [vmem:[%s6475_s11 + $0x48] sm:%s4765_s25] }
  0x8d   : > { %466 = vst [vmem:[%s6478_s14] sm:%s4765_s25] %v465_v44 }
  0x8e   : > { %468 = vst [vmem:[%s6478_s14 + $0x20] sm:%s4765_s25] %v467_v45 }
  0x8f PF: > { %p4766_p12 = scmp.ge.u32.totalorder %s6362_s26, 8 }
  0x90   : > { %s6246_s16 = smov (!%p4766_p12), 1  }
  0x91   : > { %209 = sbr.rel (%p4766_p12) target bundleno = 153 (0x99), region = 44  ;;  %s210_s21 = sshll.u32 (!%p4766_p12), %s6246_s16, %s6362_s26 }
  0x92   : > { %s4767_s28 = sadd.s32 (!%p4766_p12), 4294967295, %s210_s21 }
  0x96   : > { %v220_v46 = vld [vmem:[%s6360_s17] sm:%s4767_s28]  ;;  %v222_v47 = vld [vmem:[%s6360_s17 + $0x48] sm:%s4767_s28] }
  0x97   : > { %221 = vst [vmem:[%s6364_s27] sm:%s4767_s28] %v220_v46 }
  0x98   : > { %223 = vst [vmem:[%s6364_s27 + $0x20] sm:%s4767_s28] %v222_v47 }
  0x99 PF: > { %472 = sbr.rel (!%p6346_p6) target bundleno = 159 (0x9f), region = 98  ;;  %s474_s29 = sand.u32 (%p6346_p6), 1, %s6167_s19  }
  0x9a   : > { %s4769_s11 = sshll.u32 (%p6346_p6), %s6179_s22, 5  ;;  %s4768_s14 = sshll.u32 (%p6346_p6), %s474_s29, 4 }
  0x9b   : > { %s4621_s26 = scalar_lea.vmem (%p6346_p6), %s8308_s1, %s4769_s11  ;;  %s476_s17 = scalar_lea.vmem (%p6346_p6), [#allocation5], %s4768_s14 }
  0x9c   : > { %v4770_v48 = vld [vmem:[%s4621_s26 + $0x20] sm:$0xff] (%p6346_p6)  ;;  %v4771_v49 = vld [vmem:[%s4621_s26 + $0x68] sm:$0xff] (%p6346_p6) }
  0x9d   : > { %513 = vst [vmem:[%s476_s17] sm:$0xff] (%p6346_p6), %v4770_v48 }
  0x9e   : > { %515 = vst [vmem:[%s476_s17 + $0x8] sm:$0xff] %v4771_v49 }
  0x9f PF: > { %p4772_p13 = scmp.ge.s32.totalorder %s6179_s22, 1  ;;  %p520_p6 = scmp.lt.s32.totalorder %s6179_s22, 3 }
  0xa1   : > { %p521_p0 = pnand %p4772_p13, %p520_p6 }
  0xa2   : > { %s534_s8 = sand.u32 (!%p521_p0), 1, %s6163_s18   ;;  %s527_s12 = sand.u32 (!%p521_p0), 1, %s6171_s20  }
  0xa3   : > { %524 = sbr.rel (%p521_p0) target bundleno = 1185 (0x4a1), region = 136  ;;  %s4774_s27 = sshll.u32 (!%p521_p0), %s534_s8, 4 }
  0xa4   : > { %s4773_s13 = sshll.u32 (!%p521_p0), %s527_s12, 6  ;;  %s536_s6 = scalar_lea.vmem (!%p521_p0), [#allocation5], %s4774_s27 }
  0xa5   : > { %s529_s10 = scalar_lea.vmem (!%p521_p0), [#allocation4], %s4773_s13  ;;  %s6247_s15 = smov (!%p521_p0), 127  }
  0xa6   : > { %s6248_s18 = smov (!%p521_p0), 126   ;;  %s6249_s20 = smov (!%p521_p0), 118  }
  0xa7   : > { %s6250_s0 = smov (!%p521_p0), 117   ;;  %s6251_s23 = smov (!%p521_p0), 116  }
  0xa8   : > { %v596_v50 = vld [vmem:[%s536_s6] sm:$0xff]  ;;  %v6609_v54 = vld [vmem:[%s529_s10 + $0x18] sm:$0xff]  ;;  %v6612_v55 = vld [vmem:[%s529_s10 + $0x8] sm:$0xff]  ;;  %vm666_vm0 = vcmask 1043456   ;;  %vm668_vm1 = vcmask 1039360   ;;  %s6252_s25 = smov 108  }
  0xa9   : > { %598 = vst [vmem:[#allocation2 + $0x20] sm:$0xff] %v596_v50  ;;  %v6598_v51 = vld [vmem:[%s529_s10 + $0x10] sm:$0xff]  ;;  %v6600_v52 = vld [vmem:[%s529_s10] sm:$0xff]  ;;  %v6615_v56 = vld [vmem:[%s529_s10 + $0x38] sm:$0xff]  ;;  %vm751_vm2 = vcmask 1031168   ;;  %s6253_s16 = smov 107  }
  0xaa   : > { %590 = vst [vmem:[#allocation2 + $0x10] sm:$0xff] %v6598_v51  ;;  %640 = vrot.lane.b32.xlu1 %v6598_v51, %s6247_s15  ;;  %636 = vrot.lane.b32.xlu0 %v6600_v52, %s6247_s15  ;;  %v6606_v53 = vld [vmem:[%s529_s10 + $0x20] sm:$0xff]  ;;  %v6618_v57 = vld [vmem:[%s529_s10 + $0x30] sm:$0xff]  ;;  %vm834_vm3 = vcmask 965632   ;;  %s6254_s21 = smov 106   ;;  %vm917_vm4 = vcmask 957440  }
  0xab   : > { %588 = vst [vmem:[#allocation2] sm:$0xff] %v6600_v52  ;;  %v597_v58 = vld [vmem:[%s536_s6 + $0x8] sm:$0xff]  ;;  %s6255_s28 = smov 28   ;;  %vm1000_vm5 = vcmask 949248   ;;  %s6256_s29 = smov 27   ;;  %vm1083_vm6 = vcmask 883712  }
  0xac   : > { %592 = vst [vmem:[#allocation2 + $0x28] sm:$0xff] %v6606_v53  ;;  %v6621_v60 = vld [vmem:[%s529_s10 + $0x28] sm:$0xff]  ;;  %s6257_s11 = smov 26   ;;  %vm1166_vm7 = vcmask 875520   ;;  %s6258_s14 = smov 18   ;;  %vm1249_vm8 = vcmask 867328  }
  0xad   : > { %591 = vst [vmem:[#allocation2 + $0x18] sm:$0xff] %v6609_v54  ;;  %s6259_s7 = smov 17   ;;  %vm1332_vm9 = vcmask 228352   ;;  %s6260_s30 = smov 16   ;;  %vm1415_vm10 = vcmask 220160   ;;  %vm1498_vm11 = vcmask 211968  }
  0xae   : > { %589 = vst [vmem:[#allocation2 + $0x8] sm:$0xff] %v6612_v55  ;;  %s6261_s26 = smov 8   ;;  %s6262_s17 = smov 44   ;;  %vm1581_vm12 = vcmask 146432   ;;  %vm1664_vm13 = vcmask 138240   ;;  %vm1747_vm14 = vcmask 130048  }
  0xaf   : > { %595 = vst [vmem:[#allocation2 + $0x40] sm:$0xff] %v6615_v56  ;;  %s6263_s8 = smov 7   ;;  %s6264_s27 = smov 45   ;;  %vm1830_vm15 = vcmask 64512  }
  0xb0   : > { %v620_v59 = vld [vmem:[#allocation2 + $0x20] sm:$0xf]  ;;  %594 = vst [vmem:[#allocation2 + $0x38] sm:$0xff] %v6618_v57  ;;  %s6265_s12 = smov 46   ;;  %s6266_s13 = smov 54  }
  0xb1   : > { %644 = vrot.lane.b32.xlu2 %v620_v59, %s6247_s15  ;;  %593 = vst [vmem:[#allocation2 + $0x30] sm:$0xff] %v6621_v60  ;;  %v704_v62 = vld [vmem:[#allocation2 + $0x20] sm:$0xf]  ;;  %s6267_s6 = smov 55   ;;  %s6268_s10 = smov 56  }
  0xb2   : > { %642 = vrot.lane.b32.xlu1 %v6609_v54, %s6247_s15  ;;  %638 = vrot.lane.b32.xlu0 %v6612_v55, %s6247_s15  ;;  %599 = vst [vmem:[#allocation2 + $0x48] sm:$0xff] %v597_v58  ;;  %v787_v0 = vld [vmem:[#allocation2 + $0x20] sm:$0xf] }
  0xb3   : > { %v870_v2 = vld [vmem:[#allocation2 + $0x20] sm:$0xf] }
  0xb4   : > { %v953_v9 = vld [vmem:[#allocation2 + $0x20] sm:$0xf] }
  0xb5   : > { %v1036_v48 = vld [vmem:[#allocation2 + $0x20] sm:$0xf] }
  0xb9   : > { %646 = vrot.lane.b32.xlu2 %v6606_v53, %s6247_s15  ;;  %v625_v61 = vld [vmem:[#allocation2 + $0x48] sm:$0xf] }
  0xba   : > { %650 = vrot.lane.b32.xlu1 %v6618_v57, %s6247_s15  ;;  %648 = vrot.lane.b32.xlu0 %v6621_v60, %s6247_s15  ;;  %v709_v63 = vld [vmem:[#allocation2 + $0x48] sm:$0xf] }
  0xbb   : > { %v792_v1 = vld [vmem:[#allocation2 + $0x48] sm:$0xf] }
  0xbc   : > { %v875_v4 = vld [vmem:[#allocation2 + $0x48] sm:$0xf] }
  0xbd   : > { %v958_v22 = vld [vmem:[#allocation2 + $0x48] sm:$0xf] }
  0xc1   : > { %652 = vrot.lane.b32.xlu2 %v6615_v56, %s6247_s15 }
  0xc2   : > { %720 = vrot.lane.b32.xlu1 %v6600_v52, %s6248_s18  ;;  %654 = vrot.lane.b32.xlu0 %v625_v61, %s6247_s15  ;;  %s6269_s15 = smov 34  }
  0xc9   : > { %722 = vrot.lane.b32.xlu2 %v6612_v55, %s6248_s18 }
  0xca   : > { %726 = vrot.lane.b32.xlu1 %v6609_v54, %s6248_s18  ;;  %724 = vrot.lane.b32.xlu0 %v6598_v51, %s6248_s18 }
  0xd1   : > { %728 = vrot.lane.b32.xlu2 %v704_v62, %s6248_s18 }
  0xd2   : > { %732 = vrot.lane.b32.xlu1 %v6621_v60, %s6248_s18  ;;  %730 = vrot.lane.b32.xlu0 %v6606_v53, %s6248_s18 }
  0xd9   : > { %734 = vrot.lane.b32.xlu2 %v6618_v57, %s6248_s18 }
  0xda   : > { %738 = vrot.lane.b32.xlu1 %v709_v63, %s6248_s18  ;;  %736 = vrot.lane.b32.xlu0 %v6615_v56, %s6248_s18  ;;  %s6270_s18 = smov 6  }
  0xe1   : > { %803 = vrot.lane.b32.xlu2 %v6600_v52, %s6249_s20 }
  0xe2   : > { %807 = vrot.lane.b32.xlu1 %v6598_v51, %s6249_s20  ;;  %805 = vrot.lane.b32.xlu0 %v6612_v55, %s6249_s20 }
  0xe9   : > { %809 = vrot.lane.b32.xlu2 %v6609_v54, %s6249_s20 }
  0xea   : > { %813 = vrot.lane.b32.xlu1 %v6606_v53, %s6249_s20  ;;  %811 = vrot.lane.b32.xlu0 %v787_v0, %s6249_s20 }
  0xf1   : > { %815 = vrot.lane.b32.xlu2 %v6621_v60, %s6249_s20 }
  0xf2   : > { %819 = vrot.lane.b32.xlu1 %v6615_v56, %s6249_s20  ;;  %817 = vrot.lane.b32.xlu0 %v6618_v57, %s6249_s20 }
  0xf9   : > { %821 = vrot.lane.b32.xlu2 %v792_v1, %s6249_s20  ;;  %s6271_s20 = smov 35  }
  0xfa   : > { %888 = vrot.lane.b32.xlu1 %v6612_v55, %s6250_s0  ;;  %886 = vrot.lane.b32.xlu0 %v6600_v52, %s6250_s0 }
 0x101   : > { %890 = vrot.lane.b32.xlu2 %v6598_v51, %s6250_s0 }
 0x102   : > { %894 = vrot.lane.b32.xlu1 %v870_v2, %s6250_s0  ;;  %892 = vrot.lane.b32.xlu0 %v6609_v54, %s6250_s0 }
 0x109   : > { %896 = vrot.lane.b32.xlu2 %v6606_v53, %s6250_s0 }
 0x10a   : > { %900 = vrot.lane.b32.xlu1 %v6618_v57, %s6250_s0  ;;  %898 = vrot.lane.b32.xlu0 %v6621_v60, %s6250_s0 }
 0x10b   : > { %v645_v3 = vpop.permute.xlu2 %644 }
 0x10c   : > { %v660_v10 = vrot.slane %v645_v3, 4 }
 0x111   : > { %902 = vrot.lane.b32.xlu2 %v6615_v56, %s6250_s0 }
 0x112   : > { %969 = vrot.lane.b32.xlu1 %v6600_v52, %s6251_s23  ;;  %904 = vrot.lane.b32.xlu0 %v875_v4, %s6250_s0  ;;  %s6272_s0 = smov 36  }
 0x113   : > { %v647_v5 = vpop.permute.xlu2 %646 }
 0x114   : > { %v661_v27 = vrot.slane %v647_v5, 4 }
 0x119   : > { %971 = vrot.lane.b32.xlu2 %v6612_v55, %s6251_s23 }
 0x11a   : > { %975 = vrot.lane.b32.xlu1 %v6609_v54, %s6251_s23  ;;  %973 = vrot.lane.b32.xlu0 %v6598_v51, %s6251_s23 }
 0x11b   : > { %v6662_v6 = vpop.permute.xlu2 %652 }
 0x11c   : > { %v641_v7 = vpop.permute.xlu1 %640  ;;  %v637_v8 = vpop.permute.xlu0 %636  ;;  %v664_v28 = vrot.slane %v6662_v6, 4 }
 0x11d   : > { %v658_v14 = vrot.slane %v641_v7, 4  ;;  %v656_v15 = vrot.slane %v637_v8, 4 }
 0x121   : > { %977 = vrot.lane.b32.xlu2 %v953_v9, %s6251_s23 }
 0x122   : > { %981 = vrot.lane.b32.xlu1 %v6621_v60, %s6251_s23  ;;  %979 = vrot.lane.b32.xlu0 %v6606_v53, %s6251_s23 }
 0x123   : > { %v6669_v11 = vpop.permute.xlu2 %722 }
 0x124   : > { %v643_v12 = vpop.permute.xlu1 %642  ;;  %v639_v13 = vpop.permute.xlu0 %638  ;;  %v741_v40 = vrot.slane %v6669_v11, 4 }
 0x125   : > { %v659_v16 = vrot.slane %v643_v12, 4  ;;  %v657_v17 = vrot.slane %v639_v13, 4 }
 0x127   : > { %v672_v18 = vsel %vm666_vm0, %v658_v14, %v659_v16  ;;  %v674_v19 = vsel %vm666_vm0, %v659_v16, %v660_v10  ;;  %v667_v20 = vsel %vm666_vm0, %v656_v15, %v657_v17  ;;  %v670_v21 = vsel %vm666_vm0, %v657_v17, %v658_v14 }
 0x128   : > { %v673_v23 = vsel %vm668_vm1, %v641_v7, %v672_v18  ;;  %v675_v24 = vsel %vm668_vm1, %v643_v12, %v674_v19  ;;  %v669_v25 = vsel %vm668_vm1, %v637_v8, %v667_v20  ;;  %v671_v26 = vsel %vm668_vm1, %v639_v13, %v670_v21  ;;  %v1041_v13 = vld [vmem:[#allocation2 + $0x48] sm:$0xf] }
 0x129   : > { %983 = vrot.lane.b32.xlu2 %v6618_v57, %s6251_s23  ;;  %694 = vst [vmem:[#allocation3 + $0x50] sm:$0xff] %v673_v23 }
 0x12a   : > { %695 = vst [vmem:[#allocation3 + $0x58] sm:$0xff] %v675_v24  ;;  %987 = vrot.lane.b32.xlu1 %v958_v22, %s6251_s23  ;;  %985 = vrot.lane.b32.xlu0 %v6615_v56, %s6251_s23 }
 0x12b   : > { %v729_v29 = vpop.permute.xlu2 %728  ;;  %692 = vst [vmem:[#allocation3 + $0x40] sm:$0xff] %v669_v25  ;;  %v1119_v25 = vld [vmem:[#allocation2 + $0x20] sm:$0xf] }
 0x12c   : > { %693 = vst [vmem:[#allocation3 + $0x48] sm:$0xff] %v671_v26  ;;  %v651_v30 = vpop.permute.xlu1 %650  ;;  %v649_v31 = vpop.permute.xlu0 %648  ;;  %v744_v58 = vrot.slane %v729_v29, 4 }
 0x12d   : > { %v663_v32 = vrot.slane %v651_v30, 4  ;;  %v662_v33 = vrot.slane %v649_v31, 4 }
 0x12f   : > { %v680_v34 = vsel %vm666_vm0, %v663_v32, %v664_v28  ;;  %v676_v35 = vsel %vm666_vm0, %v661_v27, %v662_v33  ;;  %v678_v36 = vsel %vm666_vm0, %v662_v33, %v663_v32 }
 0x130   : > { %v681_v37 = vsel %vm668_vm1, %v651_v30, %v680_v34  ;;  %v677_v38 = vsel %vm668_vm1, %v647_v5, %v676_v35  ;;  %v679_v39 = vsel %vm668_vm1, %v649_v31, %v678_v36 }
 0x131   : > { %1052 = vrot.lane.b32.xlu2 %v6600_v52, %s6252_s25  ;;  %698 = vst [vmem:[#allocation3 + $0x70] sm:$0xff] %v681_v37 }
 0x132   : > { %696 = vst [vmem:[#allocation3 + $0x60] sm:$0xff] %v677_v38  ;;  %1056 = vrot.lane.b32.xlu1 %v6598_v51, %s6252_s25  ;;  %1054 = vrot.lane.b32.xlu0 %v6612_v55, %s6252_s25 }
 0x133   : > { %v735_v41 = vpop.permute.xlu2 %734  ;;  %697 = vst [vmem:[#allocation3 + $0x68] sm:$0xff] %v679_v39 }
 0x134   : > { %v721_v42 = vpop.permute.xlu1 %720  ;;  %v655_v43 = vpop.permute.xlu0 %654  ;;  %v747_v7 = vrot.slane %v735_v41, 4 }
 0x135   : > { %v740_v44 = vrot.slane %v721_v42, 4  ;;  %v665_v45 = vrot.slane %v655_v43, 4 }
 0x137   : > { %v750_v46 = vsel %vm666_vm0, %v740_v44, %v741_v40  ;;  %v682_v47 = vsel %vm666_vm0, %v664_v28, %v665_v45 }
 0x138   : > { %v752_v49 = vsel %vm751_vm2, %v721_v42, %v750_v46  ;;  %v683_v50 = vsel %vm668_vm1, %v6662_v6, %v682_v47  ;;  %vm2494_vm1 = vcmask 359424  }
 0x139   : > { %1058 = vrot.lane.b32.xlu2 %v6609_v54, %s6252_s25  ;;  %775 = vst [vmem:[#allocation3 + $0x80] sm:$0xff] %v752_v49  ;;  %v1124_v49 = vld [vmem:[#allocation2 + $0x48] sm:$0xf] }
 0x13a   : > { %699 = vst [vmem:[#allocation3 + $0x78] sm:$0xff] %v683_v50  ;;  %1062 = vrot.lane.b32.xlu1 %v6606_v53, %s6252_s25  ;;  %1060 = vrot.lane.b32.xlu0 %v1036_v48, %s6252_s25 }
 0x13b   : > { %v804_v59 = vpop.permute.xlu2 %803 }
 0x13c   : > { %v727_v61 = vpop.permute.xlu1 %726  ;;  %v725_v62 = vpop.permute.xlu0 %724  ;;  %v823_v28 = vrot.slane %v804_v59, 4 }
 0x13d   : > { %v743_v63 = vrot.slane %v727_v61, 4  ;;  %v742_v0 = vrot.slane %v725_v62, 4 }
 0x13f   : > { %v757_v1 = vsel %vm666_vm0, %v743_v63, %v744_v58  ;;  %v753_v2 = vsel %vm666_vm0, %v741_v40, %v742_v0  ;;  %v755_v3 = vsel %vm666_vm0, %v742_v0, %v743_v63 }
 0x140   : > { %v758_v4 = vsel %vm751_vm2, %v727_v61, %v757_v1  ;;  %v754_v5 = vsel %vm751_vm2, %v6669_v11, %v753_v2  ;;  %v756_v6 = vsel %vm751_vm2, %v725_v62, %v755_v3 }
 0x141   : > { %1064 = vrot.lane.b32.xlu2 %v6621_v60, %s6252_s25  ;;  %778 = vst [vmem:[#allocation3 + $0x98] sm:$0xff] %v758_v4 }
 0x142   : > { %776 = vst [vmem:[#allocation3 + $0x88] sm:$0xff] %v754_v5  ;;  %1068 = vrot.lane.b32.xlu1 %v6615_v56, %s6252_s25  ;;  %1066 = vrot.lane.b32.xlu0 %v6618_v57, %s6252_s25 }
 0x143   : > { %v6721_v8 = vpop.permute.xlu2 %809  ;;  %777 = vst [vmem:[#allocation3 + $0x90] sm:$0xff] %v756_v6 }
 0x144   : > { %v733_v9 = vpop.permute.xlu1 %732  ;;  %v731_v10 = vpop.permute.xlu0 %730  ;;  %v826_v29 = vrot.slane %v6721_v8, 4 }
 0x145   : > { %v746_v11 = vrot.slane %v733_v9, 4  ;;  %v745_v12 = vrot.slane %v731_v10, 4 }
 0x147   : > { %v761_v14 = vsel %vm666_vm0, %v746_v11, %v747_v7  ;;  %v759_v15 = vsel %vm666_vm0, %v745_v12, %v746_v11 }
 0x148   : > { %v762_v16 = vsel %vm751_vm2, %v733_v9, %v761_v14  ;;  %v760_v17 = vsel %vm751_vm2, %v731_v10, %v759_v15  ;;  %v1202_v14 = vld [vmem:[#allocation2 + $0x20] sm:$0xf] }
 0x149   : > { %1070 = vrot.lane.b32.xlu2 %v1041_v13, %s6252_s25  ;;  %780 = vst [vmem:[#allocation3 + $0xa8] sm:$0xff] %v762_v16 }
 0x14a   : > { %779 = vst [vmem:[#allocation3 + $0xa0] sm:$0xff] %v760_v17  ;;  %1137 = vrot.lane.b32.xlu1 %v6612_v55, %s6253_s16  ;;  %1135 = vrot.lane.b32.xlu0 %v6600_v52, %s6253_s16 }
 0x14b   : > { %v6732_v18 = vpop.permute.xlu2 %815 }
 0x14c   : > { %v739_v19 = vpop.permute.xlu1 %738  ;;  %v737_v20 = vpop.permute.xlu0 %736 }
 0x14d   : > { %v749_v21 = vrot.slane %v739_v19, 4  ;;  %v748_v22 = vrot.slane %v737_v20, 4 }
 0x14f   : > { %v763_v23 = vsel %vm666_vm0, %v747_v7, %v748_v22  ;;  %v765_v24 = vsel %vm666_vm0, %v748_v22, %v749_v21 }
 0x150   : > { %v764_v26 = vsel %vm751_vm2, %v735_v41, %v763_v23  ;;  %v766_v27 = vsel %vm751_vm2, %v737_v20, %v765_v24  ;;  %v829_v41 = vrot.slane %v6732_v18, 4  ;;  %vm2411_vm2 = vcmask 367616  }
 0x151   : > { %1139 = vrot.lane.b32.xlu2 %v6598_v51, %s6253_s16  ;;  %781 = vst [vmem:[#allocation3 + $0xb0] sm:$0xff] %v764_v26  ;;  %v1207_v26 = vld [vmem:[#allocation2 + $0x48] sm:$0xf] }
 0x152   : > { %782 = vst [vmem:[#allocation3 + $0xb8] sm:$0xff] %v766_v27  ;;  %1143 = vrot.lane.b32.xlu1 %v1119_v25, %s6253_s16  ;;  %1141 = vrot.lane.b32.xlu0 %v6609_v54, %s6253_s16 }
 0x153   : > { %v822_v30 = vpop.permute.xlu2 %821 }
 0x154   : > { %v808_v31 = vpop.permute.xlu1 %807  ;;  %v806_v32 = vpop.permute.xlu0 %805 }
 0x155   : > { %v825_v33 = vrot.slane %v808_v31, 4  ;;  %v824_v34 = vrot.slane %v806_v32, 4 }
 0x157   : > { %v838_v35 = vsel %vm666_vm0, %v825_v33, %v826_v29  ;;  %v833_v36 = vsel %vm666_vm0, %v823_v28, %v824_v34  ;;  %v836_v37 = vsel %vm666_vm0, %v824_v34, %v825_v33 }
 0x158   : > { %v839_v38 = vsel %vm834_vm3, %v808_v31, %v838_v35  ;;  %v835_v39 = vsel %vm834_vm3, %v804_v59, %v833_v36  ;;  %v837_v40 = vsel %vm834_vm3, %v806_v32, %v836_v37  ;;  %v832_v59 = vrot.slane %v822_v30, 4 }
 0x159   : > { %1145 = vrot.lane.b32.xlu2 %v6606_v53, %s6253_s16  ;;  %860 = vst [vmem:[#allocation3 + $0xd0] sm:$0xff] %v839_v38 }
 0x15a   : > { %858 = vst [vmem:[#allocation3 + $0xc0] sm:$0xff] %v835_v39  ;;  %1149 = vrot.lane.b32.xlu1 %v6618_v57, %s6253_s16  ;;  %1147 = vrot.lane.b32.xlu0 %v6621_v60, %s6253_s16 }
 0x15b   : > { %v891_v42 = vpop.permute.xlu2 %890  ;;  %859 = vst [vmem:[#allocation3 + $0xc8] sm:$0xff] %v837_v40 }
 0x15c   : > { %v814_v43 = vpop.permute.xlu1 %813  ;;  %v812_v44 = vpop.permute.xlu0 %811 }
 0x15d   : > { %v828_v45 = vrot.slane %v814_v43, 4  ;;  %v827_v46 = vrot.slane %v812_v44, 4 }
 0x15f   : > { %v842_v47 = vsel %vm666_vm0, %v828_v45, %v829_v41  ;;  %v840_v48 = vsel %vm666_vm0, %v826_v29, %v827_v46 }
 0x160   : > { %v843_v50 = vsel %vm834_vm3, %v814_v43, %v842_v47  ;;  %v841_v58 = vsel %vm834_vm3, %v6721_v8, %v840_v48  ;;  %v908_v8 = vrot.slane %v891_v42, 4 }
 0x161   : > { %1151 = vrot.lane.b32.xlu2 %v6615_v56, %s6253_s16  ;;  %862 = vst [vmem:[#allocation3 + $0xe0] sm:$0xff] %v843_v50  ;;  %v1285_v50 = vld [vmem:[#allocation2 + $0x20] sm:$0xf] }
 0x162   : > { %861 = vst [vmem:[#allocation3 + $0xd8] sm:$0xff] %v841_v58  ;;  %1218 = vrot.lane.b32.xlu1 %v6600_v52, %s6254_s21  ;;  %1153 = vrot.lane.b32.xlu0 %v1124_v49, %s6253_s16 }
 0x163   : > { %v897_v61 = vpop.permute.xlu2 %896 }
 0x164   : > { %v820_v62 = vpop.permute.xlu1 %819  ;;  %v818_v63 = vpop.permute.xlu0 %817  ;;  %v911_v29 = vrot.slane %v897_v61, 4 }
 0x165   : > { %v831_v0 = vrot.slane %v820_v62, 4  ;;  %v830_v1 = vrot.slane %v818_v63, 4 }
 0x167   : > { %v848_v2 = vsel %vm666_vm0, %v831_v0, %v832_v59  ;;  %v844_v3 = vsel %vm666_vm0, %v829_v41, %v830_v1  ;;  %v846_v4 = vsel %vm666_vm0, %v830_v1, %v831_v0 }
 0x168   : > { %v849_v5 = vsel %vm834_vm3, %v820_v62, %v848_v2  ;;  %v845_v6 = vsel %vm834_vm3, %v6732_v18, %v844_v3  ;;  %v847_v7 = vsel %vm834_vm3, %v818_v63, %v846_v4  ;;  %vm2328_vm3 = vcmask 375808  }
 0x169   : > { %1220 = vrot.lane.b32.xlu2 %v6612_v55, %s6254_s21  ;;  %865 = vst [vmem:[#allocation3 + $0xf8] sm:$0xff] %v849_v5 }
 0x16a   : > { %863 = vst [vmem:[#allocation3 + $0xe8] sm:$0xff] %v845_v6  ;;  %1224 = vrot.lane.b32.xlu1 %v6609_v54, %s6254_s21  ;;  %1222 = vrot.lane.b32.xlu0 %v6598_v51, %s6254_s21 }
 0x16b   : > { %v6780_v9 = vpop.permute.xlu2 %902  ;;  %864 = vst [vmem:[#allocation3 + $0xf0] sm:$0xff] %v847_v7 }
 0x16c   : > { %v889_v10 = vpop.permute.xlu1 %888  ;;  %v887_v11 = vpop.permute.xlu0 %886  ;;  %v914_v30 = vrot.slane %v6780_v9, 4 }
 0x16d   : > { %v907_v12 = vrot.slane %v889_v10, 4  ;;  %v906_v13 = vrot.slane %v887_v11, 4 }
 0x16f   : > { %v919_v15 = vsel %vm666_vm0, %v907_v12, %v908_v8  ;;  %v916_v16 = vsel %vm666_vm0, %v906_v13, %v907_v12 }
 0x170   : > { %v920_v17 = vsel %vm917_vm4, %v889_v10, %v919_v15  ;;  %v918_v18 = vsel %vm917_vm4, %v887_v11, %v916_v16  ;;  %v1290_v15 = vld [vmem:[#allocation2 + $0x48] sm:$0xf] }
 0x171   : > { %1226 = vrot.lane.b32.xlu2 %v1202_v14, %s6254_s21  ;;  %942 = vst [vmem:[#allocation3 + $0x108] sm:$0xff] %v920_v17 }
 0x172   : > { %941 = vst [vmem:[#allocation3 + $0x100] sm:$0xff] %v918_v18  ;;  %1230 = vrot.lane.b32.xlu1 %v6621_v60, %s6254_s21  ;;  %1228 = vrot.lane.b32.xlu0 %v6606_v53, %s6254_s21 }
 0x173   : > { %v6791_v19 = vpop.permute.xlu2 %971 }
 0x174   : > { %v895_v20 = vpop.permute.xlu1 %894  ;;  %v893_v21 = vpop.permute.xlu0 %892 }
 0x175   : > { %v910_v22 = vrot.slane %v895_v20, 4  ;;  %v909_v23 = vrot.slane %v893_v21, 4 }
 0x177   : > { %v921_v24 = vsel %vm666_vm0, %v908_v8, %v909_v23  ;;  %v923_v25 = vsel %vm666_vm0, %v909_v23, %v910_v22 }
 0x178   : > { %v922_v27 = vsel %vm917_vm4, %v891_v42, %v921_v24  ;;  %v924_v28 = vsel %vm917_vm4, %v893_v21, %v923_v25  ;;  %v990_v42 = vrot.slane %v6791_v19, 4 }
 0x179   : > { %1232 = vrot.lane.b32.xlu2 %v6618_v57, %s6254_s21  ;;  %943 = vst [vmem:[#allocation3 + $0x110] sm:$0xff] %v922_v27  ;;  %v1368_v27 = vld [vmem:[#allocation2 + $0x20] sm:$0xf] }
 0x17a   : > { %944 = vst [vmem:[#allocation3 + $0x118] sm:$0xff] %v924_v28  ;;  %1236 = vrot.lane.b32.xlu1 %v1207_v26, %s6254_s21  ;;  %1234 = vrot.lane.b32.xlu0 %v6615_v56, %s6254_s21 }
 0x17b   : > { %v978_v31 = vpop.permute.xlu2 %977 }
 0x17c   : > { %v901_v32 = vpop.permute.xlu1 %900  ;;  %v899_v33 = vpop.permute.xlu0 %898 }
 0x17d   : > { %v913_v34 = vrot.slane %v901_v32, 4  ;;  %v912_v35 = vrot.slane %v899_v33, 4 }
 0x17f   : > { %v929_v36 = vsel %vm666_vm0, %v913_v34, %v914_v30  ;;  %v925_v37 = vsel %vm666_vm0, %v911_v29, %v912_v35  ;;  %v927_v38 = vsel %vm666_vm0, %v912_v35, %v913_v34 }
 0x180   : > { %v930_v39 = vsel %vm917_vm4, %v901_v32, %v929_v36  ;;  %v926_v40 = vsel %vm917_vm4, %v897_v61, %v925_v37  ;;  %v928_v41 = vsel %vm917_vm4, %v899_v33, %v927_v38  ;;  %v993_v61 = vrot.slane %v978_v31, 4 }
 0x181   : > { %1301 = vrot.lane.b32.xlu2 %v6600_v52, %s6255_s28  ;;  %947 = vst [vmem:[#allocation3 + $0x130] sm:$0xff] %v930_v39 }
 0x182   : > { %945 = vst [vmem:[#allocation3 + $0x120] sm:$0xff] %v926_v40  ;;  %1305 = vrot.lane.b32.xlu1 %v6598_v51, %s6255_s28  ;;  %1303 = vrot.lane.b32.xlu0 %v6612_v55, %s6255_s28 }
 0x183   : > { %v984_v43 = vpop.permute.xlu2 %983  ;;  %946 = vst [vmem:[#allocation3 + $0x128] sm:$0xff] %v928_v41 }
 0x184   : > { %v970_v44 = vpop.permute.xlu1 %969  ;;  %v905_v45 = vpop.permute.xlu0 %904 }
 0x185   : > { %v989_v46 = vrot.slane %v970_v44, 4  ;;  %v915_v47 = vrot.slane %v905_v45, 4 }
 0x187   : > { %v999_v48 = vsel %vm666_vm0, %v989_v46, %v990_v42  ;;  %v931_v49 = vsel %vm666_vm0, %v914_v30, %v915_v47 }
 0x188   : > { %v1001_v58 = vsel %vm1000_vm5, %v970_v44, %v999_v48  ;;  %v932_v59 = vsel %vm917_vm4, %v6780_v9, %v931_v49  ;;  %v996_v9 = vrot.slane %v984_v43, 4  ;;  %vm2245_vm4 = vcmask 441344  }
 0x189   : > { %1307 = vrot.lane.b32.xlu2 %v6609_v54, %s6255_s28  ;;  %1024 = vst [vmem:[#allocation3 + $0x140] sm:$0xff] %v1001_v58 }
 0x18a   : > { %948 = vst [vmem:[#allocation3 + $0x138] sm:$0xff] %v932_v59  ;;  %1311 = vrot.lane.b32.xlu1 %v6606_v53, %s6255_s28  ;;  %1309 = vrot.lane.b32.xlu0 %v1285_v50, %s6255_s28  ;;  %v1373_v50 = vld [vmem:[#allocation2 + $0x48] sm:$0xf] }
 0x18b   : > { %v1053_v62 = vpop.permute.xlu2 %1052 }
 0x18c   : > { %v976_v63 = vpop.permute.xlu1 %975  ;;  %v974_v0 = vpop.permute.xlu0 %973  ;;  %v1072_v30 = vrot.slane %v1053_v62, 4 }
 0x18d   : > { %v992_v1 = vrot.slane %v976_v63, 4  ;;  %v991_v2 = vrot.slane %v974_v0, 4 }
 0x18f   : > { %v1006_v3 = vsel %vm666_vm0, %v992_v1, %v993_v61  ;;  %v1002_v4 = vsel %vm666_vm0, %v990_v42, %v991_v2  ;;  %v1004_v5 = vsel %vm666_vm0, %v991_v2, %v992_v1 }
 0x190   : > { %v1007_v6 = vsel %vm1000_vm5, %v976_v63, %v1006_v3  ;;  %v1003_v7 = vsel %vm1000_vm5, %v6791_v19, %v1002_v4  ;;  %v1005_v8 = vsel %vm1000_vm5, %v974_v0, %v1004_v5 }
 0x191   : > { %1313 = vrot.lane.b32.xlu2 %v6621_v60, %s6255_s28  ;;  %1027 = vst [vmem:[#allocation3 + $0x158] sm:$0xff] %v1007_v6 }
 0x192   : > { %1025 = vst [vmem:[#allocation3 + $0x148] sm:$0xff] %v1003_v7  ;;  %1317 = vrot.lane.b32.xlu1 %v6615_v56, %s6255_s28  ;;  %1315 = vrot.lane.b32.xlu0 %v6618_v57, %s6255_s28 }
 0x193   : > { %v6839_v10 = vpop.permute.xlu2 %1058  ;;  %1026 = vst [vmem:[#allocation3 + $0x150] sm:$0xff] %v1005_v8 }
 0x194   : > { %v982_v11 = vpop.permute.xlu1 %981  ;;  %v980_v12 = vpop.permute.xlu0 %979  ;;  %v1075_v31 = vrot.slane %v6839_v10, 4 }
 0x195   : > { %v995_v13 = vrot.slane %v982_v11, 4  ;;  %v994_v14 = vrot.slane %v980_v12, 4 }
 0x197   : > { %v1010_v16 = vsel %vm666_vm0, %v995_v13, %v996_v9  ;;  %v1008_v17 = vsel %vm666_vm0, %v994_v14, %v995_v13  ;;  %v1451_v13 = vld [vmem:[#allocation2 + $0x20] sm:$0xf] }
 0x198   : > { %v1011_v18 = vsel %vm1000_vm5, %v982_v11, %v1010_v16  ;;  %v1009_v19 = vsel %vm1000_vm5, %v980_v12, %v1008_v17 }
 0x199   : > { %1319 = vrot.lane.b32.xlu2 %v1290_v15, %s6255_s28  ;;  %1029 = vst [vmem:[#allocation3 + $0x168] sm:$0xff] %v1011_v18  ;;  %v6907_v15 = vld [vmem:[#allocation2 + $0x28] sm:$0xff] }
 0x19a   : > { %1028 = vst [vmem:[#allocation3 + $0x160] sm:$0xff] %v1009_v19  ;;  %1386 = vrot.lane.b32.xlu1 %v6612_v55, %s6256_s29  ;;  %1384 = vrot.lane.b32.xlu0 %v6600_v52, %s6256_s29 }
 0x19b   : > { %v6850_v20 = vpop.permute.xlu2 %1064 }
 0x19c   : > { %v988_v21 = vpop.permute.xlu1 %987  ;;  %v986_v22 = vpop.permute.xlu0 %985 }
 0x19d   : > { %v998_v23 = vrot.slane %v988_v21, 4  ;;  %v997_v24 = vrot.slane %v986_v22, 4 }
 0x19f   : > { %v1012_v25 = vsel %vm666_vm0, %v996_v9, %v997_v24  ;;  %v1014_v26 = vsel %vm666_vm0, %v997_v24, %v998_v23  ;;  %v1456_v23 = vld [vmem:[#allocation2 + $0x48] sm:$0xf]  ;;  %v6920_v24 = vld [vmem:[#allocation2 + $0x40] sm:$0xff] }
 0x1a0   : > { %v1013_v28 = vsel %vm1000_vm5, %v984_v43, %v1012_v25  ;;  %v1015_v29 = vsel %vm1000_vm5, %v986_v22, %v1014_v26  ;;  %v1078_v43 = vrot.slane %v6850_v20, 4  ;;  %vm2162_vm5 = vcmask 449536  }
 0x1a1   : > { %1388 = vrot.lane.b32.xlu2 %v6598_v51, %s6256_s29  ;;  %1030 = vst [vmem:[#allocation3 + $0x170] sm:$0xff] %v1013_v28 }
 0x1a2   : > { %1031 = vst [vmem:[#allocation3 + $0x178] sm:$0xff] %v1015_v29  ;;  %1392 = vrot.lane.b32.xlu1 %v1368_v27, %s6256_s29  ;;  %1390 = vrot.lane.b32.xlu0 %v6609_v54, %s6256_s29 }
 0x1a3   : > { %v1071_v32 = vpop.permute.xlu2 %1070 }
 0x1a4   : > { %v1057_v33 = vpop.permute.xlu1 %1056  ;;  %v1055_v34 = vpop.permute.xlu0 %1054  ;;  %v1081_v61 = vrot.slane %v1071_v32, 4 }
 0x1a5   : > { %v1074_v35 = vrot.slane %v1057_v33, 4  ;;  %v1073_v36 = vrot.slane %v1055_v34, 4 }
 0x1a7   : > { %v1087_v37 = vsel %vm666_vm0, %v1074_v35, %v1075_v31  ;;  %v1082_v38 = vsel %vm666_vm0, %v1072_v30, %v1073_v36  ;;  %v1085_v39 = vsel %vm666_vm0, %v1073_v36, %v1074_v35  ;;  %v6937_v36 = vld [vmem:[#allocation2 + $0x10] sm:$0xff] }
 0x1a8   : > { %v1088_v40 = vsel %vm1083_vm6, %v1057_v33, %v1087_v37  ;;  %v1084_v41 = vsel %vm1083_vm6, %v1053_v62, %v1082_v38  ;;  %v1086_v42 = vsel %vm1083_vm6, %v1055_v34, %v1085_v39  ;;  %v6932_v33 = vld [vmem:[#allocation2] sm:$0xff]  ;;  %v6939_v37 = vld [vmem:[#allocation2 + $0x8] sm:$0xff] }
 0x1a9   : > { %1394 = vrot.lane.b32.xlu2 %v6606_v53, %s6256_s29  ;;  %1109 = vst [vmem:[#allocation3 + $0x190] sm:$0xff] %v1088_v40 }
 0x1aa   : > { %1107 = vst [vmem:[#allocation3 + $0x180] sm:$0xff] %v1084_v41  ;;  %1398 = vrot.lane.b32.xlu1 %v6618_v57, %s6256_s29  ;;  %1396 = vrot.lane.b32.xlu0 %v6621_v60, %s6256_s29 }
 0x1ab   : > { %v6875_v44 = vpop.permute.xlu2 %1139  ;;  %1108 = vst [vmem:[#allocation3 + $0x188] sm:$0xff] %v1086_v42 }
 0x1ac   : > { %v1063_v45 = vpop.permute.xlu1 %1062  ;;  %v1061_v46 = vpop.permute.xlu0 %1060  ;;  %v1157_v7 = vrot.slane %v6875_v44, 4 }
 0x1ad   : > { %v1077_v47 = vrot.slane %v1063_v45, 4  ;;  %v1076_v48 = vrot.slane %v1061_v46, 4 }
 0x1af   : > { %v1091_v49 = vsel %vm666_vm0, %v1077_v47, %v1078_v43  ;;  %v1089_v53 = vsel %vm666_vm0, %v1075_v31, %v1076_v48  ;;  %v6954_v47 = vld [vmem:[#allocation2 + $0x18] sm:$0xff] }
 0x1b0   : > { %v1092_v58 = vsel %vm1083_vm6, %v1063_v45, %v1091_v49  ;;  %v1090_v59 = vsel %vm1083_vm6, %v6839_v10, %v1089_v53  ;;  %v1534_v53 = vld [vmem:[#allocation2 + $0x20] sm:$0xf] }
 0x1b1   : > { %1400 = vrot.lane.b32.xlu2 %v6615_v56, %s6256_s29  ;;  %1111 = vst [vmem:[#allocation3 + $0x1a0] sm:$0xff] %v1092_v58 }
 0x1b2   : > { %1110 = vst [vmem:[#allocation3 + $0x198] sm:$0xff] %v1090_v59  ;;  %1467 = vrot.lane.b32.xlu1 %v6600_v52, %s6257_s11  ;;  %1402 = vrot.lane.b32.xlu0 %v1373_v50, %s6256_s29 }
 0x1b3   : > { %v6887_v62 = vpop.permute.xlu2 %1145 }
 0x1b4   : > { %v1069_v63 = vpop.permute.xlu1 %1068  ;;  %v1067_v0 = vpop.permute.xlu0 %1066  ;;  %v1160_v26 = vrot.slane %v6887_v62, 4 }
 0x1b5   : > { %v1080_v1 = vrot.slane %v1069_v63, 4  ;;  %v1079_v2 = vrot.slane %v1067_v0, 4 }
 0x1b7   : > { %v1097_v3 = vsel %vm666_vm0, %v1080_v1, %v1081_v61  ;;  %v1093_v4 = vsel %vm666_vm0, %v1078_v43, %v1079_v2  ;;  %v1095_v56 = vsel %vm666_vm0, %v1079_v2, %v1080_v1 }
 0x1b8   : > { %v1098_v5 = vsel %vm1083_vm6, %v1069_v63, %v1097_v3  ;;  %v1094_v52 = vsel %vm1083_vm6, %v6850_v20, %v1093_v4  ;;  %v1096_v6 = vsel %vm1083_vm6, %v1067_v0, %v1095_v56  ;;  %v5712_v1 = vld [vmem:[#allocation3 + $0x19c] sm:$0xf0]  ;;  %vm2079_vm6 = vcmask 457728  }
 0x1b9   : > { %1469 = vrot.lane.b32.xlu2 %v6612_v55, %s6257_s11  ;;  %1114 = vst [vmem:[#allocation3 + $0x1b8] sm:$0xff] %v1098_v5  ;;  %v4971_v5 = vld [vmem:[#allocation3 + $0x180] sm:$0xf] }
 0x1ba   : > { %1112 = vst [vmem:[#allocation3 + $0x1a8] sm:$0xff] %v1094_v52  ;;  %1473 = vrot.lane.b32.xlu1 %v6609_v54, %s6257_s11  ;;  %1471 = vrot.lane.b32.xlu0 %v6598_v51, %s6257_s11  ;;  %v6968_v52 = vld [vmem:[#allocation2 + $0x30] sm:$0xff] }
 0x1bb   : > { %v6903_v8 = vpop.permute.xlu2 %1151  ;;  %1113 = vst [vmem:[#allocation3 + $0x1b0] sm:$0xff] %v1096_v6  ;;  %v4972_v6 = vor.u32 %v5712_v1, %v4971_v5 }
 0x1bc   : > { %v1138_v9 = vpop.permute.xlu1 %1137  ;;  %v1136_v10 = vpop.permute.xlu0 %1135  ;;  %v1163_v27 = vrot.slane %v6903_v8, 4 }
 0x1bd   : > { %v1156_v11 = vrot.slane %v1138_v9, 4  ;;  %v1155_v12 = vrot.slane %v1136_v10, 4 }
 0x1bf   : > { %v1168_v55 = vsel %vm666_vm0, %v1156_v11, %v1157_v7  ;;  %v1165_v14 = vsel %vm666_vm0, %v1155_v12, %v1156_v11  ;;  %v5704_v11 = vld [vmem:[#allocation3 + $0x15c] sm:$0xf0] }
 0x1c0   : > { %v1169_v54 = vsel %vm1166_vm7, %v1138_v9, %v1168_v55  ;;  %v1167_v51 = vsel %vm1166_vm7, %v1136_v10, %v1165_v14  ;;  %v6973_v10 = vld [vmem:[#allocation2 + $0x38] sm:$0xff]  ;;  %v4939_v14 = vld [vmem:[#allocation3 + $0x140] sm:$0xf] }
 0x1c1   : > { %1475 = vrot.lane.b32.xlu2 %v1451_v13, %s6257_s11  ;;  %1191 = vst [vmem:[#allocation3 + $0x1c8] sm:$0xff] %v1169_v54  ;;  %v4940_v54 = vor.u32 %v5704_v11, %v4939_v14  ;;  %v1622_v14 = vld [vmem:[#allocation2 + $0x48] sm:$0xf] }
 0x1c2   : > { %1190 = vst [vmem:[#allocation3 + $0x1c0] sm:$0xff] %v1167_v51  ;;  %1479 = vrot.lane.b32.xlu1 %v6621_v60, %s6257_s11  ;;  %1477 = vrot.lane.b32.xlu0 %v6907_v15, %s6257_s11 }
 0x1c3   : > { %v6916_v16 = vpop.permute.xlu2 %1220 }
 0x1c4   : > { %v1144_v17 = vpop.permute.xlu1 %1143  ;;  %v1142_v18 = vpop.permute.xlu0 %1141  ;;  %v1239_v41 = vrot.slane %v6916_v16, 4 }
 0x1c5   : > { %v1159_v19 = vrot.slane %v1144_v17, 4  ;;  %v1158_v20 = vrot.slane %v1142_v18, 4 }
 0x1c7   : > { %v1170_v21 = vsel %vm666_vm0, %v1157_v7, %v1158_v20  ;;  %v1172_v22 = vsel %vm666_vm0, %v1158_v20, %v1159_v19 }
 0x1c8   : > { %v1171_v25 = vsel %vm1166_vm7, %v6875_v44, %v1170_v21  ;;  %v1173_v60 = vsel %vm1166_vm7, %v1142_v18, %v1172_v22  ;;  %v4907_v22 = vld [vmem:[#allocation3 + $0x100] sm:$0xf] }
 0x1c9   : > { %1481 = vrot.lane.b32.xlu2 %v6618_v57, %s6257_s11  ;;  %1192 = vst [vmem:[#allocation3 + $0x1d0] sm:$0xff] %v1171_v25  ;;  %v5003_v59 = vld [vmem:[#allocation3 + $0x1c0] sm:$0xf] }
 0x1ca   : > { %1193 = vst [vmem:[#allocation3 + $0x1d8] sm:$0xff] %v1173_v60  ;;  %1485 = vrot.lane.b32.xlu1 %v1456_v23, %s6257_s11  ;;  %1483 = vrot.lane.b32.xlu0 %v6920_v24, %s6257_s11  ;;  %v1539_v23 = vld [vmem:[#allocation2 + $0x48] sm:$0xf] }
 0x1cb   : > { %v1227_v28 = vpop.permute.xlu2 %1226 }
 0x1cc   : > { %v1150_v29 = vpop.permute.xlu1 %1149  ;;  %v1148_v30 = vpop.permute.xlu0 %1147  ;;  %v1242_v63 = vrot.slane %v1227_v28, 4 }
 0x1cd   : > { %v1162_v31 = vrot.slane %v1150_v29, 4  ;;  %v1161_v32 = vrot.slane %v1148_v30, 4 }
 0x1cf   : > { %v1178_v57 = vsel %vm666_vm0, %v1162_v31, %v1163_v27  ;;  %v1174_v34 = vsel %vm666_vm0, %v1160_v26, %v1161_v32  ;;  %v1176_v35 = vsel %vm666_vm0, %v1161_v32, %v1162_v31 }
 0x1d0   : > { %v1179_v38 = vsel %vm1166_vm7, %v1150_v29, %v1178_v57  ;;  %v1175_v39 = vsel %vm1166_vm7, %v6887_v62, %v1174_v34  ;;  %v1177_v40 = vsel %vm1166_vm7, %v1148_v30, %v1176_v35  ;;  %v4875_v30 = vld [vmem:[#allocation3 + $0xc0] sm:$0xf] }
 0x1d1   : > { %1550 = vrot.lane.b32.xlu2 %v6932_v33, %s6258_s14  ;;  %1196 = vst [vmem:[#allocation3 + $0x1f0] sm:$0xff] %v1179_v38  ;;  %v5680_v57 = vld [vmem:[#allocation3 + $0x9c] sm:$0xf0] }
 0x1d2   : > { %1194 = vst [vmem:[#allocation3 + $0x1e0] sm:$0xff] %v1175_v39  ;;  %1554 = vrot.lane.b32.xlu1 %v6937_v36, %s6258_s14  ;;  %1552 = vrot.lane.b32.xlu0 %v6939_v37, %s6258_s14 }
 0x1d3   : > { %v6952_v42 = vpop.permute.xlu2 %1232  ;;  %1195 = vst [vmem:[#allocation3 + $0x1e8] sm:$0xff] %v1177_v40  ;;  %v4843_v40 = vld [vmem:[#allocation3 + $0x80] sm:$0xf] }
 0x1d4   : > { %v1219_v43 = vpop.permute.xlu1 %1218  ;;  %v1154_v44 = vpop.permute.xlu0 %1153  ;;  %v1245_v51 = vrot.slane %v6952_v42, 4 }
 0x1d5   : > { %v1238_v45 = vrot.slane %v1219_v43, 4  ;;  %v1164_v46 = vrot.slane %v1154_v44, 4 }
 0x1d7   : > { %v1248_v48 = vsel %vm666_vm0, %v1238_v45, %v1239_v41  ;;  %v1180_v49 = vsel %vm666_vm0, %v1163_v27, %v1164_v46  ;;  %v5688_v27 = vld [vmem:[#allocation3 + $0xdc] sm:$0xf0]  ;;  %v1617_v45 = vld [vmem:[#allocation2 + $0x20] sm:$0xf] }
 0x1d8   : > { %v1250_v50 = vsel %vm1249_vm8, %v1219_v43, %v1248_v48  ;;  %v1181_v58 = vsel %vm1166_vm7, %v6903_v8, %v1180_v49  ;;  %v4876_v31 = vor.u32 %v5688_v27, %v4875_v30  ;;  %v5672_v46 = vld [vmem:[#allocation3 + $0x5c] sm:$0xf0]  ;;  %vm2743_vm7 = vcmask 277504  }
 0x1d9   : > { %1556 = vrot.lane.b32.xlu2 %v6954_v47, %s6258_s14  ;;  %1273 = vst [vmem:[#allocation3 + $0x200] sm:$0xff] %v1250_v50  ;;  %v5720_v61 = vld [vmem:[#allocation3 + $0x1dc] sm:$0xf0] }
 0x1da   : > { %1197 = vst [vmem:[#allocation3 + $0x1f8] sm:$0xff] %v1181_v58  ;;  %1560 = vrot.lane.b32.xlu1 %v6907_v15, %s6258_s14  ;;  %1558 = vrot.lane.b32.xlu0 %v1534_v53, %s6258_s14  ;;  %v5004_v62 = vor.u32 %v5720_v61, %v5003_v59  ;;  %v4811_v53 = vld [vmem:[#allocation3 + $0x40] sm:$0xf] }
 0x1db   : > { %v6966_v0 = vpop.permute.xlu2 %1301  ;;  %v4812_v50 = vor.u32 %v5672_v46, %v4811_v53  ;;  %v1705_v53 = vld [vmem:[#allocation2 + $0x48] sm:$0xf] }
 0x1dc   : > { %4090 = vmatpush.bf16.msra.mxu0 %v5004_v62  ;;  %v1225_v2 = vpop.permute.xlu1 %1224  ;;  %v1223_v3 = vpop.permute.xlu0 %1222  ;;  %v1321_v58 = vrot.slane %v6966_v0, 4 }
 0x1dd   : > { %v1241_v4 = vrot.slane %v1225_v2, 4  ;;  %v1240_v56 = vrot.slane %v1223_v3, 4 }
 0x1df   : > { %v1255_v7 = vsel %vm666_vm0, %v1241_v4, %v1242_v63  ;;  %v1251_v8 = vsel %vm666_vm0, %v1239_v41, %v1240_v56  ;;  %v1253_v9 = vsel %vm666_vm0, %v1240_v56, %v1241_v4  ;;  %v4844_v41 = vor.u32 %v5680_v57, %v4843_v40 }
 0x1e0   : > { %v1256_v12 = vsel %vm1249_vm8, %v1225_v2, %v1255_v7  ;;  %v1252_v13 = vsel %vm1249_vm8, %v6916_v16, %v1251_v8  ;;  %v1254_v55 = vsel %vm1249_vm8, %v1223_v3, %v1253_v9  ;;  %4091 = vmatpush.bf16.msra.mxu0 %v4972_v6  ;;  %v5696_v16 = vld [vmem:[#allocation3 + $0x11c] sm:$0xf0] }
 0x1e1   : > { %1562 = vrot.lane.b32.xlu2 %v6968_v52, %s6258_s14  ;;  %1276 = vst [vmem:[#allocation3 + $0x218] sm:$0xff] %v1256_v12  ;;  %v4908_v25 = vor.u32 %v5696_v16, %v4907_v22 }
 0x1e2   : > { %1274 = vst [vmem:[#allocation3 + $0x208] sm:$0xff] %v1252_v13  ;;  %1566 = vrot.lane.b32.xlu1 %v6920_v24, %s6258_s14  ;;  %1564 = vrot.lane.b32.xlu0 %v6973_v10, %s6258_s14 }
 0x1e3   : > { %v6986_v17 = vpop.permute.xlu2 %1307  ;;  %1275 = vst [vmem:[#allocation3 + $0x210] sm:$0xff] %v1254_v55 }
 0x1e4   : > { %4092 = vmatpush.bf16.msra.mxu0 %v4940_v54  ;;  %v1231_v18 = vpop.permute.xlu1 %1230  ;;  %v1229_v19 = vpop.permute.xlu0 %1228  ;;  %v1324_v59 = vrot.slane %v6986_v17, 4 }
 0x1e5   : > { %v1244_v20 = vrot.slane %v1231_v18, 4  ;;  %v1243_v21 = vrot.slane %v1229_v19, 4 }
 0x1e7   : > { %v1259_v60 = vsel %vm666_vm0, %v1244_v20, %v1245_v51  ;;  %v1257_v26 = vsel %vm666_vm0, %v1243_v21, %v1244_v20 }
 0x1e8   : > { %v1260_v28 = vsel %vm1249_vm8, %v1231_v18, %v1259_v60  ;;  %v1258_v29 = vsel %vm1249_vm8, %v1229_v19, %v1257_v26  ;;  %4093 = vmatpush.bf16.msra.mxu0 %v4908_v25 }
 0x1e9   : > { %1568 = vrot.lane.b32.xlu2 %v1539_v23, %s6258_s14  ;;  %1278 = vst [vmem:[#allocation3 + $0x228] sm:$0xff] %v1260_v28 }
 0x1ea   : > { %1277 = vst [vmem:[#allocation3 + $0x220] sm:$0xff] %v1258_v29  ;;  %1635 = vrot.lane.b32.xlu1 %v6939_v37, %s6259_s7  ;;  %1633 = vrot.lane.b32.xlu0 %v6932_v33, %s6259_s7 }
 0x1eb   : > { %v6997_v32 = vpop.permute.xlu2 %1313 }
 0x1ec   : > { %4094 = vmatpush.bf16.msra.mxu0 %v4876_v31  ;;  %v1237_v34 = vpop.permute.xlu1 %1236  ;;  %v1235_v35 = vpop.permute.xlu0 %1234  ;;  %v1327_v7 = vrot.slane %v6997_v32, 4 }
 0x1ed   : > { %v1247_v38 = vrot.slane %v1237_v34, 4  ;;  %v1246_v39 = vrot.slane %v1235_v35, 4  ;;  %v1700_v34 = vld [vmem:[#allocation2 + $0x20] sm:$0xf] }
 0x1ef   : > { %v1261_v43 = vsel %vm666_vm0, %v1245_v51, %v1246_v39  ;;  %v1263_v44 = vsel %vm666_vm0, %v1246_v39, %v1247_v38 }
 0x1f0   : > { %v1262_v48 = vsel %vm1249_vm8, %v6952_v42, %v1261_v43  ;;  %v1264_v49 = vsel %vm1249_vm8, %v1235_v35, %v1263_v44  ;;  %4095 = vmatpush.bf16.msra.mxu0 %v4844_v41  ;;  %vm1996_vm8 = vcmask 48128  }
 0x1f1   : > { %1637 = vrot.lane.b32.xlu2 %v6937_v36, %s6259_s7  ;;  %1279 = vst [vmem:[#allocation3 + $0x230] sm:$0xff] %v1262_v48 }
 0x1f2   : > { %1280 = vst [vmem:[#allocation3 + $0x238] sm:$0xff] %v1264_v49  ;;  %1641 = vrot.lane.b32.xlu1 %v1617_v45, %s6259_s7  ;;  %1639 = vrot.lane.b32.xlu0 %v6954_v47, %s6259_s7 }
 0x1f3   : > { %v1320_v42 = vpop.permute.xlu2 %1319 }
 0x1f4   : > { %4096 = vmatpush.bf16.msra.mxu0 %v4812_v50  ;;  %v1306_v61 = vpop.permute.xlu1 %1305  ;;  %v1304_v62 = vpop.permute.xlu0 %1303  ;;  %v1330_v16 = vrot.slane %v1320_v42, 4 }
 0x1f5   : > { %v1323_v63 = vrot.slane %v1306_v61, 4  ;;  %v1322_v1 = vrot.slane %v1304_v62, 4 }
 0x1f7   : > { %v1336_v2 = vsel %vm666_vm0, %v1323_v63, %v1324_v59  ;;  %v1331_v3 = vsel %vm666_vm0, %v1321_v58, %v1322_v1  ;;  %v1334_v4 = vsel %vm666_vm0, %v1322_v1, %v1323_v63 }
 0x1f8   : > { %v1337_v56 = vsel %vm1332_vm9, %v1306_v61, %v1336_v2  ;;  %v1333_v5 = vsel %vm1332_vm9, %v6966_v0, %v1331_v3  ;;  %v1335_v6 = vsel %vm1332_vm9, %v1304_v62, %v1334_v4 }
 0x1f9   : > { %1643 = vrot.lane.b32.xlu2 %v6907_v15, %s6259_s7  ;;  %1358 = vst [vmem:[#allocation3 + $0x250] sm:$0xff] %v1337_v56 }
 0x1fa   : > { %1356 = vst [vmem:[#allocation3 + $0x240] sm:$0xff] %v1333_v5  ;;  %1647 = vrot.lane.b32.xlu1 %v6973_v10, %s6259_s7  ;;  %1645 = vrot.lane.b32.xlu0 %v6968_v52, %s6259_s7 }
 0x1fb   : > { %v1389_v8 = vpop.permute.xlu2 %1388  ;;  %1357 = vst [vmem:[#allocation3 + $0x248] sm:$0xff] %v1335_v6 }
 0x1fc   : > { %v1312_v9 = vpop.permute.xlu1 %1311  ;;  %v1310_v11 = vpop.permute.xlu0 %1309  ;;  %v1406_v28 = vrot.slane %v1389_v8, 4 }
 0x1fd   : > { %v1326_v0 = vrot.slane %v1312_v9, 4  ;;  %v1325_v12 = vrot.slane %v1310_v11, 4 }
 0x1ff   : > { %v1340_v13 = vsel %vm666_vm0, %v1326_v0, %v1327_v7  ;;  %v1338_v55 = vsel %vm666_vm0, %v1324_v59, %v1325_v12 }
 0x200   : > { %v1341_v54 = vsel %vm1332_vm9, %v1312_v9, %v1340_v13  ;;  %v1339_v51 = vsel %vm1332_vm9, %v6986_v17, %v1338_v55 }
 0x201   : > { %1649 = vrot.lane.b32.xlu2 %v6920_v24, %s6259_s7  ;;  %1360 = vst [vmem:[#allocation3 + $0x260] sm:$0xff] %v1341_v54  ;;  %v1783_v54 = vld [vmem:[#allocation2 + $0x20] sm:$0xf] }
 0x202   : > { %1359 = vst [vmem:[#allocation3 + $0x258] sm:$0xff] %v1339_v51  ;;  %1716 = vrot.lane.b32.xlu1 %v6932_v33, %s6260_s30  ;;  %1651 = vrot.lane.b32.xlu0 %v1622_v14, %s6259_s7  ;;  %s8357_s7 = sadd.s32 4294967295, %s6179_s22  }
 0x203   : > { %v1395_v18 = vpop.permute.xlu2 %1394 }
 0x204   : > { %v1318_v19 = vpop.permute.xlu1 %1317  ;;  %v1316_v20 = vpop.permute.xlu0 %1315  ;;  %v1409_v59 = vrot.slane %v1395_v18, 4 }
 0x205   : > { %v1329_v21 = vrot.slane %v1318_v19, 4  ;;  %v1328_v22 = vrot.slane %v1316_v20, 4 }
 0x207   : > { %v1346_v23 = vsel %vm666_vm0, %v1329_v21, %v1330_v16  ;;  %v1342_v17 = vsel %vm666_vm0, %v1327_v7, %v1328_v22  ;;  %v1344_v25 = vsel %vm666_vm0, %v1328_v22, %v1329_v21 }
 0x208   : > { %v1347_v60 = vsel %vm1332_vm9, %v1318_v19, %v1346_v23  ;;  %v1343_v26 = vsel %vm1332_vm9, %v6997_v32, %v1342_v17  ;;  %v1345_v27 = vsel %vm1332_vm9, %v1316_v20, %v1344_v25  ;;  %vm2660_vm9 = vcmask 285696  }
 0x209   : > { %1718 = vrot.lane.b32.xlu2 %v6939_v37, %s6260_s30  ;;  %1363 = vst [vmem:[#allocation3 + $0x278] sm:$0xff] %v1347_v60 }
 0x20a   : > { %1361 = vst [vmem:[#allocation3 + $0x268] sm:$0xff] %v1343_v26  ;;  %1722 = vrot.lane.b32.xlu1 %v6954_v47, %s6260_s30  ;;  %1720 = vrot.lane.b32.xlu0 %v6937_v36, %s6260_s30 }
 0x20b   : > { %v7048_v29 = vpop.permute.xlu2 %1400  ;;  %1362 = vst [vmem:[#allocation3 + $0x270] sm:$0xff] %v1345_v27 }
 0x20c   : > { %v1387_v30 = vpop.permute.xlu1 %1386  ;;  %v1385_v31 = vpop.permute.xlu0 %1384  ;;  %v1412_v42 = vrot.slane %v7048_v29, 4 }
 0x20d   : > { %v1405_v32 = vrot.slane %v1387_v30, 4  ;;  %v1404_v57 = vrot.slane %v1385_v31, 4 }
 0x20f   : > { %v1417_v35 = vsel %vm666_vm0, %v1405_v32, %v1406_v28  ;;  %v1414_v38 = vsel %vm666_vm0, %v1404_v57, %v1405_v32  ;;  %v1788_v32 = vld [vmem:[#allocation2 + $0x48] sm:$0xf] }
 0x210   : > { %v1418_v39 = vsel %vm1415_vm10, %v1387_v30, %v1417_v35  ;;  %v1416_v40 = vsel %vm1415_vm10, %v1385_v31, %v1414_v38  ;;  %v7116_v35 = vld [vmem:[#allocation2 + $0x4] sm:$0xff] }
 0x211   : > { %1724 = vrot.lane.b32.xlu2 %v1700_v34, %s6260_s30  ;;  %1440 = vst [vmem:[#allocation3 + $0x288] sm:$0xff] %v1418_v39 }
 0x212   : > { %1439 = vst [vmem:[#allocation3 + $0x280] sm:$0xff] %v1416_v40  ;;  %1728 = vrot.lane.b32.xlu1 %v6968_v52, %s6260_s30  ;;  %1726 = vrot.lane.b32.xlu0 %v6907_v15, %s6260_s30 }
 0x213   : > { %v7059_v41 = vpop.permute.xlu2 %1469 }
 0x214   : > { %v1393_v43 = vpop.permute.xlu1 %1392  ;;  %v1391_v44 = vpop.permute.xlu0 %1390 }
 0x215   : > { %v1408_v45 = vrot.slane %v1393_v43, 4  ;;  %v1407_v46 = vrot.slane %v1391_v44, 4 }
 0x217   : > { %v1419_v48 = vsel %vm666_vm0, %v1406_v28, %v1407_v46  ;;  %v1421_v49 = vsel %vm666_vm0, %v1407_v46, %v1408_v45 }
 0x218   : > { %v1420_v50 = vsel %vm1415_vm10, %v1389_v8, %v1419_v48  ;;  %v1422_v58 = vsel %vm1415_vm10, %v1391_v44, %v1421_v49  ;;  %v1488_v8 = vrot.slane %v7059_v41, 4  ;;  %v7127_v44 = vld [vmem:[#allocation2 + $0xc] sm:$0xff]  ;;  %v7131_v48 = vld [vmem:[#allocation2 + $0x34] sm:$0xff] }
 0x219   : > { %1730 = vrot.lane.b32.xlu2 %v6973_v10, %s6260_s30  ;;  %1441 = vst [vmem:[#allocation3 + $0x290] sm:$0xff] %v1420_v50  ;;  %v7133_v49 = vld [vmem:[#allocation2 + $0x2c] sm:$0xff] }
 0x21a   : > { %1442 = vst [vmem:[#allocation3 + $0x298] sm:$0xff] %v1422_v58  ;;  %1734 = vrot.lane.b32.xlu1 %v1705_v53, %s6260_s30  ;;  %1732 = vrot.lane.b32.xlu0 %v6920_v24, %s6260_s30  ;;  %s8228_s30 = sshll.u32 %s8357_s7, 3 }
 0x21b   : > { %v1476_v61 = vpop.permute.xlu2 %1475  ;;  %p574_p1 = scmp.lt.s32.totalorder %s8228_s30, 15 }
 0x21c   : > { %v1399_v62 = vpop.permute.xlu1 %1398  ;;  %v1397_v63 = vpop.permute.xlu0 %1396  ;;  %v1491_v16 = vrot.slane %v1476_v61, 4 }
 0x21d   : > { %v1411_v1 = vrot.slane %v1399_v62, 4  ;;  %v1410_v2 = vrot.slane %v1397_v63, 4  ;;  %s8374_s30 = smov (!%p574_p1, %s8228_s30), 15 }
 0x21e   : > { %s4776_s22 = sshll.u32 %s8374_s30, 3 }
 0x21f   : > { %v1427_v3 = vsel %vm666_vm0, %v1411_v1, %v1412_v42  ;;  %v1423_v4 = vsel %vm666_vm0, %v1409_v59, %v1410_v2  ;;  %v1425_v56 = vsel %vm666_vm0, %v1410_v2, %v1411_v1 }
 0x220   : > { %v1428_v5 = vsel %vm1415_vm10, %v1399_v62, %v1427_v3  ;;  %v1424_v6 = vsel %vm1415_vm10, %v1395_v18, %v1423_v4  ;;  %v1426_v7 = vsel %vm1415_vm10, %v1397_v63, %v1425_v56 }
 0x221   : > { %1799 = vrot.lane.b32.xlu2 %v6932_v33, %s6261_s26  ;;  %1445 = vst [vmem:[#allocation3 + $0x2b0] sm:$0xff] %v1428_v5 }
 0x222   : > { %1443 = vst [vmem:[#allocation3 + $0x2a0] sm:$0xff] %v1424_v6  ;;  %1803 = vrot.lane.b32.xlu1 %v6937_v36, %s6261_s26  ;;  %1801 = vrot.lane.b32.xlu0 %v6939_v37, %s6261_s26 }
 0x223   : > { %v7084_v9 = vpop.permute.xlu2 %1481  ;;  %1444 = vst [vmem:[#allocation3 + $0x2a8] sm:$0xff] %v1426_v7 }
 0x224   : > { %v1468_v11 = vpop.permute.xlu1 %1467  ;;  %v1403_v0 = vpop.permute.xlu0 %1402  ;;  %v1494_v26 = vrot.slane %v7084_v9, 4 }
 0x225   : > { %v1487_v12 = vrot.slane %v1468_v11, 4  ;;  %v1413_v13 = vrot.slane %v1403_v0, 4 }
 0x227   : > { %v1497_v55 = vsel %vm666_vm0, %v1487_v12, %v1488_v8  ;;  %v1429_v14 = vsel %vm666_vm0, %v1412_v42, %v1413_v13 }
 0x228   : > { %v1499_v36 = vsel %vm1498_vm11, %v1468_v11, %v1497_v55  ;;  %v1430_v51 = vsel %vm1415_vm10, %v7048_v29, %v1429_v14  ;;  %vm1913_vm10 = vcmask 56320  }
 0x229   : > { %1805 = vrot.lane.b32.xlu2 %v6954_v47, %s6261_s26  ;;  %1522 = vst [vmem:[#allocation3 + $0x2c0] sm:$0xff] %v1499_v36 }
 0x22a   : > { %1446 = vst [vmem:[#allocation3 + $0x2b8] sm:$0xff] %v1430_v51  ;;  %1809 = vrot.lane.b32.xlu1 %v6907_v15, %s6261_s26  ;;  %1807 = vrot.lane.b32.xlu0 %v1783_v54, %s6261_s26 }
 0x22b   : > { %v7096_v18 = vpop.permute.xlu2 %1550 }
 0x22c   : > { %v1474_v19 = vpop.permute.xlu1 %1473  ;;  %v1472_v20 = vpop.permute.xlu0 %1471  ;;  %v1570_v58 = vrot.slane %v7096_v18, 4 }
 0x22d   : > { %v1490_v21 = vrot.slane %v1474_v19, 4  ;;  %v1489_v22 = vrot.slane %v1472_v20, 4 }
 0x22f   : > { %v1504_v23 = vsel %vm666_vm0, %v1490_v21, %v1491_v16  ;;  %v1500_v17 = vsel %vm666_vm0, %v1488_v8, %v1489_v22  ;;  %v1502_v47 = vsel %vm666_vm0, %v1489_v22, %v1490_v21 }
 0x230   : > { %v1505_v25 = vsel %vm1498_vm11, %v1474_v19, %v1504_v23  ;;  %v1501_v15 = vsel %vm1498_vm11, %v7059_v41, %v1500_v17  ;;  %v1503_v60 = vsel %vm1498_vm11, %v1472_v20, %v1502_v47 }
 0x231   : > { %1811 = vrot.lane.b32.xlu2 %v6968_v52, %s6261_s26  ;;  %1525 = vst [vmem:[#allocation3 + $0x2d8] sm:$0xff] %v1505_v25 }
 0x232   : > { %1523 = vst [vmem:[#allocation3 + $0x2c8] sm:$0xff] %v1501_v15  ;;  %1815 = vrot.lane.b32.xlu1 %v6920_v24, %s6261_s26  ;;  %1813 = vrot.lane.b32.xlu0 %v6973_v10, %s6261_s26 }
 0x233   : > { %v7112_v27 = vpop.permute.xlu2 %1556  ;;  %1524 = vst [vmem:[#allocation3 + $0x2d0] sm:$0xff] %v1503_v60 }
 0x234   : > { %v1480_v28 = vpop.permute.xlu1 %1479  ;;  %v1478_v29 = vpop.permute.xlu0 %1477  ;;  %v1573_v59 = vrot.slane %v7112_v27, 4 }
 0x235   : > { %v1493_v30 = vrot.slane %v1480_v28, 4  ;;  %v1492_v31 = vrot.slane %v1478_v29, 4 }
 0x237   : > { %v1508_v57 = vsel %vm666_vm0, %v1493_v30, %v1494_v26  ;;  %v1506_v34 = vsel %vm666_vm0, %v1492_v31, %v1493_v30 }
 0x238   : > { %v1509_v24 = vsel %vm1498_vm11, %v1480_v28, %v1508_v57  ;;  %v1507_v10 = vsel %vm1498_vm11, %v1478_v29, %v1506_v34 }
 0x239   : > { %1817 = vrot.lane.b32.xlu2 %v1788_v32, %s6261_s26  ;;  %1527 = vst [vmem:[#allocation3 + $0x2e8] sm:$0xff] %v1509_v24 }
 0x23a   : > { %1526 = vst [vmem:[#allocation3 + $0x2e0] sm:$0xff] %v1507_v10  ;;  %2463 = vrot.lane.b32.xlu1 %v7116_v35, %s6262_s17  ;;  %1882 = vrot.lane.b32.xlu0 %v6932_v33, %s6263_s8 }
 0x23b   : > { %v7125_v38 = vpop.permute.xlu2 %1562 }
 0x23c   : > { %v1486_v39 = vpop.permute.xlu1 %1485  ;;  %v1484_v40 = vpop.permute.xlu0 %1483  ;;  %v1576_v7 = vrot.slane %v7125_v38, 4 }
 0x23d   : > { %v1496_v41 = vrot.slane %v1486_v39, 4  ;;  %v1495_v43 = vrot.slane %v1484_v40, 4 }
 0x23f   : > { %v1510_v45 = vsel %vm666_vm0, %v1494_v26, %v1495_v43  ;;  %v1512_v46 = vsel %vm666_vm0, %v1495_v43, %v1496_v41 }
 0x240   : > { %v1511_v53 = vsel %vm1498_vm11, %v7084_v9, %v1510_v45  ;;  %v1513_v50 = vsel %vm1498_vm11, %v1484_v40, %v1512_v46  ;;  %vm2577_vm11 = vcmask 293888  }
 0x241   : > { %2465 = vrot.lane.b32.xlu2 %v7127_v44, %s6262_s17  ;;  %1528 = vst [vmem:[#allocation3 + $0x2f0] sm:$0xff] %v1511_v53 }
 0x242   : > { %1529 = vst [vmem:[#allocation3 + $0x2f8] sm:$0xff] %v1513_v50  ;;  %2475 = vrot.lane.b32.xlu1 %v7131_v48, %s6262_s17  ;;  %2473 = vrot.lane.b32.xlu0 %v7133_v49, %s6262_s17 }
 0x243   : > { %v1569_v42 = vpop.permute.xlu2 %1568 }
 0x244   : > { %v1555_v61 = vpop.permute.xlu1 %1554  ;;  %v1553_v62 = vpop.permute.xlu0 %1552  ;;  %v1579_v36 = vrot.slane %v1569_v42, 4  ;;  %v7212_v42 = vld [vmem:[#allocation2 + $0x28] sm:$0xff] }
 0x245   : > { %v1572_v63 = vrot.slane %v1555_v61, 4  ;;  %v1571_v1 = vrot.slane %v1553_v62, 4  ;;  %612 = vst [vmem:[#allocation3 + $0x20] sm:$0xff] %v7212_v42 }
 0x247   : > { %v1585_v2 = vsel %vm666_vm0, %v1572_v63, %v1573_v59  ;;  %v1580_v3 = vsel %vm666_vm0, %v1570_v58, %v1571_v1  ;;  %v1583_v4 = vsel %vm666_vm0, %v1571_v1, %v1572_v63 }
 0x248   : > { %v1586_v56 = vsel %vm1581_vm12, %v1555_v61, %v1585_v2  ;;  %v1582_v5 = vsel %vm1581_vm12, %v7096_v18, %v1580_v3  ;;  %v1584_v6 = vsel %vm1581_vm12, %v1553_v62, %v1583_v4 }
 0x249   : > { %2380 = vrot.lane.b32.xlu2 %v7116_v35, %s6264_s27  ;;  %1607 = vst [vmem:[#allocation3 + $0x310] sm:$0xff] %v1586_v56 }
 0x24a   : > { %1605 = vst [vmem:[#allocation3 + $0x300] sm:$0xff] %v1582_v5  ;;  %2390 = vrot.lane.b32.xlu1 %v7133_v49, %s6264_s27  ;;  %2382 = vrot.lane.b32.xlu0 %v7127_v44, %s6264_s27 }
 0x24b   : > { %v1638_v8 = vpop.permute.xlu2 %1637  ;;  %1606 = vst [vmem:[#allocation3 + $0x308] sm:$0xff] %v1584_v6 }
 0x24c   : > { %v1561_v9 = vpop.permute.xlu1 %1560  ;;  %v1559_v11 = vpop.permute.xlu0 %1558  ;;  %v1655_v15 = vrot.slane %v1638_v8, 4 }
 0x24d   : > { %v1575_v0 = vrot.slane %v1561_v9, 4  ;;  %v1574_v12 = vrot.slane %v1559_v11, 4 }
 0x24f   : > { %v1589_v13 = vsel %vm666_vm0, %v1575_v0, %v1576_v7  ;;  %v1587_v55 = vsel %vm666_vm0, %v1573_v59, %v1574_v12 }
 0x250   : > { %v1590_v14 = vsel %vm1581_vm12, %v1561_v9, %v1589_v13  ;;  %v1588_v54 = vsel %vm1581_vm12, %v7112_v27, %v1587_v55 }
 0x251   : > { %2392 = vrot.lane.b32.xlu2 %v7131_v48, %s6264_s27  ;;  %1609 = vst [vmem:[#allocation3 + $0x320] sm:$0xff] %v1590_v14 }
 0x252   : > { %1608 = vst [vmem:[#allocation3 + $0x318] sm:$0xff] %v1588_v54  ;;  %2299 = vrot.lane.b32.xlu1 %v7127_v44, %s6265_s12  ;;  %2297 = vrot.lane.b32.xlu0 %v7116_v35, %s6265_s12 }
 0x253   : > { %v7171_v51 = vpop.permute.xlu2 %1643 }
 0x254   : > { %v1567_v16 = vpop.permute.xlu1 %1566  ;;  %v1565_v18 = vpop.permute.xlu0 %1564  ;;  %v1658_v46 = vrot.slane %v7171_v51, 4 }
 0x255   : > { %v1578_v19 = vrot.slane %v1567_v16, 4  ;;  %v1577_v20 = vrot.slane %v1565_v18, 4 }
 0x257   : > { %v1595_v21 = vsel %vm666_vm0, %v1578_v19, %v1579_v36  ;;  %v1591_v22 = vsel %vm666_vm0, %v1576_v7, %v1577_v20  ;;  %v1593_v23 = vsel %vm666_vm0, %v1577_v20, %v1578_v19 }
 0x258   : > { %v1596_v17 = vsel %vm1581_vm12, %v1567_v16, %v1595_v21  ;;  %v1592_v47 = vsel %vm1581_vm12, %v7125_v38, %v1591_v22  ;;  %v1594_v25 = vsel %vm1581_vm12, %v1565_v18, %v1593_v23  ;;  %vm4086_vm12 = vcmask 392192  }
 0x259   : > { %2307 = vrot.lane.b32.xlu2 %v7133_v49, %s6265_s12  ;;  %1612 = vst [vmem:[#allocation3 + $0x338] sm:$0xff] %v1596_v17 }
 0x25a   : > { %1610 = vst [vmem:[#allocation3 + $0x328] sm:$0xff] %v1592_v47  ;;  %2214 = vrot.lane.b32.xlu1 %v7116_v35, %s6266_s13  ;;  %2309 = vrot.lane.b32.xlu0 %v7131_v48, %s6265_s12  ;;  %v600_v47 = vld [vmem:[#allocation2] sm:$0xff] }
 0x25b   : > { %v7186_v60 = vpop.permute.xlu2 %1649  ;;  %1611 = vst [vmem:[#allocation3 + $0x330] sm:$0xff] %v1594_v25 }
 0x25c   : > { %v1636_v26 = vpop.permute.xlu1 %1635  ;;  %v1634_v27 = vpop.permute.xlu0 %1633  ;;  %v1661_v53 = vrot.slane %v7186_v60, 4  ;;  %608 = vst [vmem:[#allocation3] sm:$0xff] %v600_v47 }
 0x25d   : > { %v1654_v28 = vrot.slane %v1636_v26, 4  ;;  %v1653_v29 = vrot.slane %v1634_v27, 4 }
 0x25f   : > { %v1666_v30 = vsel %vm666_vm0, %v1654_v28, %v1655_v15  ;;  %v1663_v31 = vsel %vm666_vm0, %v1653_v29, %v1654_v28 }
 0x260   : > { %v1667_v32 = vsel %vm1664_vm13, %v1636_v26, %v1666_v30  ;;  %v1665_v57 = vsel %vm1664_vm13, %v1634_v27, %v1663_v31 }
 0x261   : > { %2216 = vrot.lane.b32.xlu2 %v7127_v44, %s6266_s13  ;;  %1689 = vst [vmem:[#allocation3 + $0x348] sm:$0xff] %v1667_v32 }
 0x262   : > { %1688 = vst [vmem:[#allocation3 + $0x340] sm:$0xff] %v1665_v57  ;;  %2226 = vrot.lane.b32.xlu1 %v7131_v48, %s6266_s13  ;;  %2224 = vrot.lane.b32.xlu0 %v7133_v49, %s6266_s13  ;;  %v5664_v57 = vld [vmem:[#allocation3 + $0x1c] sm:$0xf0] }
 0x263   : > { %v7198_v34 = vpop.permute.xlu2 %1718 }
 0x264   : > { %v1642_v24 = vpop.permute.xlu1 %1641  ;;  %v1640_v10 = vpop.permute.xlu0 %1639  ;;  %v1737_v5 = vrot.slane %v7198_v34, 4 }
 0x265   : > { %v1657_v38 = vrot.slane %v1642_v24, 4  ;;  %v1656_v39 = vrot.slane %v1640_v10, 4  ;;  %v4779_v24 = vld [vmem:[#allocation3] sm:$0xf] }
 0x267   : > { %v1668_v40 = vsel %vm666_vm0, %v1655_v15, %v1656_v39  ;;  %v1670_v41 = vsel %vm666_vm0, %v1656_v39, %v1657_v38  ;;  %v4780_v39 = vor.u32 %v5664_v57, %v4779_v24 }
 0x268   : > { %v1669_v43 = vsel %vm1664_vm13, %v1638_v8, %v1668_v40  ;;  %v1671_v45 = vsel %vm1664_vm13, %v1640_v10, %v1670_v41 }
 0x269   : > { %2131 = vrot.lane.b32.xlu2 %v7116_v35, %s6267_s6  ;;  %1690 = vst [vmem:[#allocation3 + $0x350] sm:$0xff] %v1669_v43  ;;  %4097 = vmatpush.bf16.msra.mxu0 %v4780_v39 }
 0x26a   : > { %1691 = vst [vmem:[#allocation3 + $0x358] sm:$0xff] %v1671_v45  ;;  %2141 = vrot.lane.b32.xlu1 %v7133_v49, %s6267_s6  ;;  %2133 = vrot.lane.b32.xlu0 %v7127_v44, %s6267_s6 }
 0x26b   : > { %v1725_v50 = vpop.permute.xlu2 %1724 }
 0x26c   : > { %v1648_v58 = vpop.permute.xlu1 %1647  ;;  %v1646_v59 = vpop.permute.xlu0 %1645  ;;  %v1740_v14 = vrot.slane %v1725_v50, 4 }
 0x26d   : > { %v1660_v61 = vrot.slane %v1648_v58, 4  ;;  %v1659_v62 = vrot.slane %v1646_v59, 4 }
 0x26f   : > { %v1676_v63 = vsel %vm666_vm0, %v1660_v61, %v1661_v53  ;;  %v1672_v1 = vsel %vm666_vm0, %v1658_v46, %v1659_v62  ;;  %v1674_v2 = vsel %vm666_vm0, %v1659_v62, %v1660_v61 }
 0x270   : > { %v1677_v3 = vsel %vm1664_vm13, %v1648_v58, %v1676_v63  ;;  %v1673_v4 = vsel %vm1664_vm13, %v7171_v51, %v1672_v1  ;;  %v1675_v56 = vsel %vm1664_vm13, %v1646_v59, %v1674_v2  ;;  %v1863_v2 = vld [vmem:[#allocation2 + $0x8] sm:$0xff] }
 0x271   : > { %2143 = vrot.lane.b32.xlu2 %v7131_v48, %s6267_s6  ;;  %1694 = vst [vmem:[#allocation3 + $0x370] sm:$0xff] %v1677_v3 }
 0x272   : > { %1692 = vst [vmem:[#allocation3 + $0x360] sm:$0xff] %v1673_v4  ;;  %2050 = vrot.lane.b32.xlu1 %v7127_v44, %s6268_s10  ;;  %2048 = vrot.lane.b32.xlu0 %v7116_v35, %s6268_s10 }
 0x273   : > { %v7229_v6 = vpop.permute.xlu2 %1730  ;;  %1693 = vst [vmem:[#allocation3 + $0x368] sm:$0xff] %v1675_v56 }
 0x274   : > { %v1717_v7 = vpop.permute.xlu1 %1716  ;;  %v1652_v8 = vpop.permute.xlu0 %1651  ;;  %v1743_v25 = vrot.slane %v7229_v6, 4 }
 0x275   : > { %v1736_v9 = vrot.slane %v1717_v7, 4  ;;  %v1662_v11 = vrot.slane %v1652_v8, 4 }
 0x277   : > { %v1746_v0 = vsel %vm666_vm0, %v1736_v9, %v1737_v5  ;;  %v1678_v12 = vsel %vm666_vm0, %v1661_v53, %v1662_v11 }
 0x278   : > { %v1748_v13 = vsel %vm1747_vm14, %v1717_v7, %v1746_v0  ;;  %v1679_v55 = vsel %vm1664_vm13, %v7186_v60, %v1678_v12 }
 0x279   : > { %2058 = vrot.lane.b32.xlu2 %v7133_v49, %s6268_s10  ;;  %1771 = vst [vmem:[#allocation3 + $0x380] sm:$0xff] %v1748_v13  ;;  %v1868_v13 = vld [vmem:[#allocation2 + $0x30] sm:$0xff] }
 0x27a   : > { %1695 = vst [vmem:[#allocation3 + $0x378] sm:$0xff] %v1679_v55  ;;  %2712 = vrot.lane.b32.xlu1 %v7116_v35, %s6269_s15  ;;  %2060 = vrot.lane.b32.xlu0 %v7131_v48, %s6268_s10 }
 0x27b   : > { %v7242_v54 = vpop.permute.xlu2 %1799 }
 0x27c   : > { %v1723_v36 = vpop.permute.xlu1 %1722  ;;  %v1721_v51 = vpop.permute.xlu0 %1720 }
 0x27d   : > { %v1739_v16 = vrot.slane %v1723_v36, 4  ;;  %v1738_v18 = vrot.slane %v1721_v51, 4 }
 0x27f   : > { %v1753_v19 = vsel %vm666_vm0, %v1739_v16, %v1740_v14  ;;  %v1749_v20 = vsel %vm666_vm0, %v1737_v5, %v1738_v18  ;;  %v1751_v21 = vsel %vm666_vm0, %v1738_v18, %v1739_v16 }
 0x280   : > { %v1754_v22 = vsel %vm1747_vm14, %v1723_v36, %v1753_v19  ;;  %v1750_v23 = vsel %vm1747_vm14, %v7198_v34, %v1749_v20  ;;  %v1752_v17 = vsel %vm1747_vm14, %v1721_v51, %v1751_v21  ;;  %v5772_v57 = vld [vmem:[#allocation3 + $0x384] sm:$0xf] }
 0x281   : > { %2714 = vrot.lane.b32.xlu2 %v7127_v44, %s6269_s15  ;;  %1774 = vst [vmem:[#allocation3 + $0x398] sm:$0xff] %v1754_v22 }
 0x282   : > { %1772 = vst [vmem:[#allocation3 + $0x388] sm:$0xff] %v1750_v23  ;;  %2724 = vrot.lane.b32.xlu1 %v7131_v48, %s6269_s15  ;;  %2722 = vrot.lane.b32.xlu0 %v7133_v49, %s6269_s15 }
 0x283   : > { %v7258_v15 = vpop.permute.xlu2 %1805  ;;  %1773 = vst [vmem:[#allocation3 + $0x390] sm:$0xff] %v1752_v17 }
 0x284   : > { %v1729_v60 = vpop.permute.xlu1 %1728  ;;  %v1727_v26 = vpop.permute.xlu0 %1726  ;;  %v1822_v53 = vrot.slane %v7258_v15, 4 }
 0x285   : > { %v1742_v27 = vrot.slane %v1729_v60, 4  ;;  %v1741_v28 = vrot.slane %v1727_v26, 4 }
 0x287   : > { %v1757_v29 = vsel %vm666_vm0, %v1742_v27, %v1743_v25  ;;  %v1755_v30 = vsel %vm666_vm0, %v1741_v28, %v1742_v27 }
 0x288   : > { %v1758_v31 = vsel %vm1747_vm14, %v1729_v60, %v1757_v29  ;;  %v1756_v32 = vsel %vm1747_vm14, %v1727_v26, %v1755_v30 }
 0x289   : > { %1965 = vrot.lane.b32.xlu2 %v6932_v33, %s6270_s18  ;;  %1776 = vst [vmem:[#allocation3 + $0x3a8] sm:$0xff] %v1758_v31 }
 0x28a   : > { %1775 = vst [vmem:[#allocation3 + $0x3a0] sm:$0xff] %v1756_v32  ;;  %1975 = vrot.lane.b32.xlu1 %v7212_v42, %s6270_s18  ;;  %1967 = vrot.lane.b32.xlu0 %v6939_v37, %s6270_s18  ;;  %v1819_v37 = vrot.slane %v7242_v54, 4  ;;  %v5227_v32 = vld [vmem:[#allocation3 + $0x380] sm:$0xf] }
 0x28b   : > { %v7270_v34 = vpop.permute.xlu2 %1811 }
 0x28c   : > { %v1735_v10 = vpop.permute.xlu1 %1734  ;;  %v1733_v38 = vpop.permute.xlu0 %1732  ;;  %v1825_v5 = vrot.slane %v7270_v34, 4 }
 0x28d   : > { %v1745_v40 = vrot.slane %v1735_v10, 4  ;;  %v1744_v41 = vrot.slane %v1733_v38, 4  ;;  %v7330_v10 = vld [vmem:[#allocation2 + $0x14] sm:$0xff] }
 0x28f   : > { %v1759_v33 = vsel %vm666_vm0, %v1743_v25, %v1744_v41  ;;  %v1761_v43 = vsel %vm666_vm0, %v1744_v41, %v1745_v40  ;;  %v7335_v40 = vld [vmem:[#allocation2 + $0x3c] sm:$0xff] }
 0x290   : > { %v1760_v45 = vsel %vm1747_vm14, %v7229_v6, %v1759_v33  ;;  %v1762_v46 = vsel %vm1747_vm14, %v1733_v38, %v1761_v43  ;;  %v5197_v38 = vld [vmem:[#allocation3 + $0x360] sm:$0xf0]  ;;  %v5195_v33 = vld [vmem:[#allocation3 + $0x340] sm:$0xf] }
 0x291   : > { %1977 = vrot.lane.b32.xlu2 %v6968_v52, %s6270_s18  ;;  %1777 = vst [vmem:[#allocation3 + $0x3b0] sm:$0xff] %v1760_v45  ;;  %v5776_v27 = vld [vmem:[#allocation3 + $0x39c] sm:$0xf0]  ;;  %v5229_v28 = vld [vmem:[#allocation3 + $0x3a0] sm:$0xf0] }
 0x292   : > { %1778 = vst [vmem:[#allocation3 + $0x3b8] sm:$0xff] %v1762_v46  ;;  %2631 = vrot.lane.b32.xlu1 %v7127_v44, %s6271_s20  ;;  %2629 = vrot.lane.b32.xlu0 %v7116_v35, %s6271_s20  ;;  %v5232_v24 = vor.u32 %v5772_v57, %v5229_v28  ;;  %v5764_v43 = vld [vmem:[#allocation3 + $0x344] sm:$0xf]  ;;  %v5728_v57 = vld [vmem:[#allocation3 + $0x21c] sm:$0xf0] }
 0x293   : > { %v1818_v50 = vpop.permute.xlu2 %1817  ;;  %v5200_v46 = vor.u32 %v5764_v43, %v5197_v38  ;;  %v5035_v38 = vld [vmem:[#allocation3 + $0x200] sm:$0xf] }
 0x294   : > { %v1804_v58 = vpop.permute.xlu1 %1803  ;;  %v1802_v59 = vpop.permute.xlu0 %1801  ;;  %v5036_v43 = vor.u32 %v5728_v57, %v5035_v38 }
 0x295   : > { %v1821_v61 = vrot.slane %v1804_v58, 4  ;;  %v1820_v62 = vrot.slane %v1802_v59, 4 }
 0x297   : > { %v1834_v52 = vsel %vm666_vm0, %v1821_v61, %v1822_v53  ;;  %v1829_v63 = vsel %vm666_vm0, %v1819_v37, %v1820_v62  ;;  %v1832_v1 = vsel %vm666_vm0, %v1820_v62, %v1821_v61  ;;  %v5760_v37 = vld [vmem:[#allocation3 + $0x31c] sm:$0xf0]  ;;  %v5756_v62 = vld [vmem:[#allocation3 + $0x304] sm:$0xf] }
 0x298   : > { %v1835_v3 = vsel %vm1830_vm15, %v1804_v58, %v1834_v52  ;;  %v1831_v4 = vsel %vm1830_vm15, %v7242_v54, %v1829_v63  ;;  %v1833_v56 = vsel %vm1830_vm15, %v1802_v59, %v1832_v1  ;;  %v1828_v54 = vrot.slane %v1818_v50, 4  ;;  %v5163_v61 = vld [vmem:[#allocation3 + $0x300] sm:$0xf] }
 0x299   : > { %2639 = vrot.lane.b32.xlu2 %v7133_v49, %s6271_s20  ;;  %1856 = vst [vmem:[#allocation3 + $0x3d0] sm:$0xff] %v1835_v3  ;;  %v5164_v1 = vor.u32 %v5760_v37, %v5163_v61  ;;  %v5752_v3 = vld [vmem:[#allocation3 + $0x2dc] sm:$0xf0] }
 0x29a   : > { %1854 = vst [vmem:[#allocation3 + $0x3c0] sm:$0xff] %v1831_v4  ;;  %1884 = vrot.lane.b32.xlu1 %v1863_v2, %s6263_s8  ;;  %2641 = vrot.lane.b32.xlu0 %v7131_v48, %s6271_s20  ;;  %v5133_v4 = vld [vmem:[#allocation3 + $0x2e0] sm:$0xf0] }
 0x29b   : > { %v7298_v6 = vpop.permute.xlu2 %2465  ;;  %1855 = vst [vmem:[#allocation3 + $0x3c8] sm:$0xff] %v1833_v56 }
 0x29c   : > { %v1810_v7 = vpop.permute.xlu1 %1809  ;;  %v1808_v8 = vpop.permute.xlu0 %1807  ;;  %v2484_v29 = vrot.slane %v7298_v6, 4 }
 0x29d   : > { %v1824_v9 = vrot.slane %v1810_v7, 4  ;;  %v1823_v11 = vrot.slane %v1808_v8, 4  ;;  %v5748_v8 = vld [vmem:[#allocation3 + $0x2c4] sm:$0xf] }
 0x29f   : > { %v1838_v0 = vsel %vm666_vm0, %v1824_v9, %v1825_v5  ;;  %v1836_v12 = vsel %vm666_vm0, %v1822_v53, %v1823_v11  ;;  %v5165_v53 = vld [vmem:[#allocation3 + $0x320] sm:$0xf0]  ;;  %v5136_v11 = vor.u32 %v5748_v8, %v5133_v4 }
 0x2a0   : > { %v1839_v55 = vsel %vm1830_vm15, %v1810_v7, %v1838_v0  ;;  %v1837_v14 = vsel %vm1830_vm15, %v7258_v15, %v1836_v12  ;;  %v5168_v2 = vor.u32 %v5756_v62, %v5165_v53  ;;  %v5131_v7 = vld [vmem:[#allocation3 + $0x2c0] sm:$0xf]  ;;  %v5101_v12 = vld [vmem:[#allocation3 + $0x2a0] sm:$0xf0] }
 0x2a1   : > { %1892 = vrot.lane.b32.xlu2 %v7212_v42, %s6263_s8  ;;  %1858 = vst [vmem:[#allocation3 + $0x3e0] sm:$0xff] %v1839_v55  ;;  %v5259_v22 = vld [vmem:[#allocation3 + $0x3c0] sm:$0xf]  ;;  %v5780_v25 = vld [vmem:[#allocation3 + $0x3c4] sm:$0xf]  ;;  %v5132_v9 = vor.u32 %v5752_v3, %v5131_v7 }
 0x2a2   : > { %1857 = vst [vmem:[#allocation3 + $0x3d8] sm:$0xff] %v1837_v14  ;;  %2546 = vrot.lane.b32.xlu1 %v7116_v35, %s6272_s0  ;;  %1894 = vrot.lane.b32.xlu0 %v1868_v13, %s6263_s8  ;;  %v5744_v0 = vld [vmem:[#allocation3 + $0x29c] sm:$0xf0] }
 0x2a3   : > { %v7310_v36 = vpop.permute.xlu2 %2380 }
 0x2a4   : > { %v1816_v51 = vpop.permute.xlu1 %1815  ;;  %v1814_v16 = vpop.permute.xlu0 %1813  ;;  %v2400_v13 = vrot.slane %v7310_v36, 4 }
 0x2a5   : > { %v1827_v18 = vrot.slane %v1816_v51, 4  ;;  %v1826_v19 = vrot.slane %v1814_v16, 4 }
 0x2a7   : > { %v1844_v20 = vsel %vm666_vm0, %v1827_v18, %v1828_v54  ;;  %v1840_v21 = vsel %vm666_vm0, %v1825_v5, %v1826_v19  ;;  %v1842_v42 = vsel %vm666_vm0, %v1826_v19, %v1827_v18  ;;  %v5099_v54 = vld [vmem:[#allocation3 + $0x280] sm:$0xf]  ;;  %v5740_v19 = vld [vmem:[#allocation3 + $0x284] sm:$0xf] }
 0x2a8   : > { %v1845_v23 = vsel %vm1830_vm15, %v1816_v51, %v1844_v20  ;;  %v1841_v35 = vsel %vm1830_vm15, %v7270_v34, %v1840_v21  ;;  %v1843_v17 = vsel %vm1830_vm15, %v1814_v16, %v1842_v42  ;;  %v5784_v47 = vld [vmem:[#allocation3 + $0x3dc] sm:$0xf0]  ;;  %v5261_v15 = vld [vmem:[#allocation3 + $0x3e0] sm:$0xf0]  ;;  %v5100_v18 = vor.u32 %v5744_v0, %v5099_v54 }
 0x2a9   : > { %2548 = vrot.lane.b32.xlu2 %v7127_v44, %s6272_s0  ;;  %1861 = vst [vmem:[#allocation3 + $0x3f8] sm:$0xff] %v1845_v23  ;;  %v5260_v60 = vor.u32 %v5784_v47, %v5259_v22  ;;  %v5264_v26 = vor.u32 %v5780_v25, %v5261_v15  ;;  %v5104_v42 = vor.u32 %v5740_v19, %v5101_v12  ;;  %v5736_v22 = vld [vmem:[#allocation3 + $0x25c] sm:$0xf0] }
 0x2aa   : > { %1859 = vst [vmem:[#allocation3 + $0x3e8] sm:$0xff] %v1841_v35  ;;  %2558 = vrot.lane.b32.xlu1 %v7131_v48, %s6272_s0  ;;  %2556 = vrot.lane.b32.xlu0 %v7133_v49, %s6272_s0  ;;  %v5228_v48 = vor.u32 %v5776_v27, %v5227_v32  ;;  %v5768_v49 = vld [vmem:[#allocation3 + $0x35c] sm:$0xf0] }
 0x2ab   : > { %v7326_v30 = vpop.permute.xlu2 %2392  ;;  %1860 = vst [vmem:[#allocation3 + $0x3f0] sm:$0xff] %v1843_v17  ;;  %4103 = vmatpush.bf16.msra.mxu1 %v5260_v60  ;;  %4155 = vmatpush.bf16.msrb.mxu0 %v5264_v26  ;;  %v5196_v45 = vor.u32 %v5768_v49, %v5195_v33  ;;  %v5069_v17 = vld [vmem:[#allocation3 + $0x260] sm:$0xf0]  ;;  %v5067_v15 = vld [vmem:[#allocation3 + $0x240] sm:$0xf] }
 0x2ac   : > { %v2464_v44 = vpop.permute.xlu1 %2463  ;;  %v7328_v31 = vpop.permute.xlu0 %1882  ;;  %v2406_v55 = vrot.slane %v7326_v30, 4  ;;  %v5068_v27 = vor.u32 %v5736_v22, %v5067_v15 }
 0x2ad   : > { %v2483_v34 = vrot.slane %v2464_v44, 4 }
 0x2af   : > { %v2493_v39 = vsel %vm666_vm0, %v2483_v34, %v2484_v29  ;;  %4104 = vmatpush.bf16.msra.mxu1 %v5228_v48  ;;  %4156 = vmatpush.bf16.msrb.mxu0 %v5232_v24  ;;  %v5037_v34 = vld [vmem:[#allocation3 + $0x220] sm:$0xf0] }
 0x2b0   : > { %v2495_v41 = vsel %vm2494_vm1, %v2464_v44, %v2493_v39  ;;  %v5732_v44 = vld [vmem:[#allocation3 + $0x244] sm:$0xf] }
 0x2b1   : > { %2467 = vrot.lane.b32.xlu2 %v7330_v10, %s6262_s17  ;;  %2518 = vst [vmem:[#allocation3 + $0x5c0] sm:$0xff] %v2495_v41  ;;  %v5072_v32 = vor.u32 %v5732_v44, %v5069_v17  ;;  %v5724_v39 = vld [vmem:[#allocation3 + $0x204] sm:$0xf] }
 0x2b2   : > { %2384 = vrot.lane.b32.xlu1 %v7330_v10, %s6264_s27  ;;  %2477 = vrot.lane.b32.xlu0 %v7335_v40, %s6262_s17 }
 0x2b3   : > { %v7344_v50 = vpop.permute.xlu2 %2307  ;;  %4105 = vmatpush.bf16.msra.mxu1 %v5196_v45  ;;  %4157 = vmatpush.bf16.msrb.mxu0 %v5200_v46  ;;  %v5040_v46 = vor.u32 %v5724_v39, %v5037_v34 }
 0x2b4   : > { %v7346_v58 = vpop.permute.xlu1 %2475  ;;  %v2474_v59 = vpop.permute.xlu0 %2473  ;;  %v2322_v4 = vrot.slane %v7344_v50, 4 }
 0x2b5   : > { %v2489_v52 = vrot.slane %v7346_v58, 4  ;;  %v2488_v63 = vrot.slane %v2474_v59, 4 }
 0x2b7   : > { %v2502_v56 = vsel %vm666_vm0, %v2488_v63, %v2489_v52  ;;  %4106 = vmatpush.bf16.msra.mxu1 %v5164_v1  ;;  %4158 = vmatpush.bf16.msrb.mxu0 %v5168_v2 }
 0x2b8   : > { %v2503_v5 = vsel %vm2494_vm1, %v2474_v59, %v2502_v56  ;;  %v5515_v60 = vld [vmem:[#allocation3 + $0x5c0] sm:$0xf]  ;;  %v5844_v45 = vld [vmem:[#allocation3 + $0x5c4] sm:$0xf] }
 0x2b9   : > { %2394 = vrot.lane.b32.xlu2 %v7335_v40, %s6264_s27  ;;  %2522 = vst [vmem:[#allocation3 + $0x5e0] sm:$0xff] %v2503_v5 }
 0x2ba   : > { %2311 = vrot.lane.b32.xlu1 %v7335_v40, %s6265_s12  ;;  %2301 = vrot.lane.b32.xlu0 %v7330_v10, %s6265_s12 }
 0x2bb   : > { %v7361_v14 = vpop.permute.xlu2 %2216  ;;  %4107 = vmatpush.bf16.msra.mxu1 %v5132_v9  ;;  %4159 = vmatpush.bf16.msrb.mxu0 %v5136_v11 }
 0x2bc   : > { %v2391_v51 = vpop.permute.xlu1 %2390  ;;  %v7363_v16 = vpop.permute.xlu0 %2382  ;;  %v2235_v56 = vrot.slane %v7361_v14, 4 }
 0x2bd   : > { %v2405_v20 = vrot.slane %v2391_v51, 4  ;;  %v2401_v21 = vrot.slane %v7363_v16, 4 }
 0x2bf   : > { %v2419_v23 = vsel %vm666_vm0, %v2405_v20, %v2406_v55  ;;  %v2410_v35 = vsel %vm666_vm0, %v2400_v13, %v2401_v21  ;;  %4108 = vmatpush.bf16.msra.mxu1 %v5100_v18  ;;  %4160 = vmatpush.bf16.msrb.mxu0 %v5104_v42  ;;  %v1947_v13 = vld [vmem:[#allocation2 + $0x10] sm:$0xff] }
 0x2c0   : > { %v2420_v47 = vsel %vm2411_vm2, %v2391_v51, %v2419_v23  ;;  %v2412_v25 = vsel %vm2411_vm2, %v7310_v36, %v2410_v35  ;;  %v5848_v26 = vld [vmem:[#allocation3 + $0x5dc] sm:$0xf0]  ;;  %v5517_v48 = vld [vmem:[#allocation3 + $0x5e0] sm:$0xf0]  ;;  %v1952_v23 = vld [vmem:[#allocation2 + $0x38] sm:$0xff] }
 0x2c1   : > { %2218 = vrot.lane.b32.xlu2 %v7330_v10, %s6266_s13  ;;  %2439 = vst [vmem:[#allocation3 + $0x5a0] sm:$0xff] %v2420_v47  ;;  %v5516_v28 = vor.u32 %v5848_v26, %v5515_v60  ;;  %v5520_v37 = vor.u32 %v5844_v45, %v5517_v48 }
 0x2c2   : > { %2435 = vst [vmem:[#allocation3 + $0x580] sm:$0xff] %v2412_v25  ;;  %2135 = vrot.lane.b32.xlu1 %v7330_v10, %s6267_s6  ;;  %2228 = vrot.lane.b32.xlu0 %v7335_v40, %s6266_s13 }
 0x2c3   : > { %v7381_v36 = vpop.permute.xlu2 %2131  ;;  %4109 = vmatpush.bf16.msra.mxu1 %v5068_v27  ;;  %4116 = vmatpush.bf16.msra.mxu2 %v5516_v28 }
 0x2c4   : > { %4161 = vmatpush.bf16.msrb.mxu0 %v5072_v32  ;;  %v7383_v24 = vpop.permute.xlu1 %2299  ;;  %v2298_v49 = vpop.permute.xlu0 %2297  ;;  %v2151_v27 = vrot.slane %v7381_v36, 4 }
 0x2c5   : > { %v2318_v41 = vrot.slane %v7383_v24, 4  ;;  %v2317_v33 = vrot.slane %v2298_v49, 4 }
 0x2c7   : > { %v2327_v53 = vsel %vm666_vm0, %v2317_v33, %v2318_v41  ;;  %4110 = vmatpush.bf16.msra.mxu1 %v5036_v43 }
 0x2c8   : > { %v2329_v59 = vsel %vm2328_vm3, %v2298_v49, %v2327_v53  ;;  %4162 = vmatpush.bf16.msrb.mxu0 %v5040_v46  ;;  %v5840_v61 = vld [vmem:[#allocation3 + $0x59c] sm:$0xf0]  ;;  %v5485_v62 = vld [vmem:[#allocation3 + $0x5a0] sm:$0xf0] }
 0x2c9   : > { %2145 = vrot.lane.b32.xlu2 %v7335_v40, %s6267_s6  ;;  %2352 = vst [vmem:[#allocation3 + $0x540] sm:$0xff] %v2329_v59  ;;  %v5483_v63 = vld [vmem:[#allocation3 + $0x580] sm:$0xf]  ;;  %v5836_v1 = vld [vmem:[#allocation3 + $0x584] sm:$0xf] }
 0x2ca   : > { %2062 = vrot.lane.b32.xlu1 %v7335_v40, %s6268_s10  ;;  %2052 = vrot.lane.b32.xlu0 %v7330_v10, %s6268_s10  ;;  %v5484_v2 = vor.u32 %v5840_v61, %v5483_v63  ;;  %v5488_v3 = vor.u32 %v5836_v1, %v5485_v62 }
 0x2cb   : > { %4168 = vmatpush.bf16.msrb.mxu1 %v5520_v37  ;;  %v7398_v5 = vpop.permute.xlu2 %2143 }
 0x2cc   : > { %4117 = vmatpush.bf16.msra.mxu2 %v5484_v2  ;;  %v2215_v7 = vpop.permute.xlu1 %2214  ;;  %v7400_v8 = vpop.permute.xlu0 %2309  ;;  %v2157_v28 = vrot.slane %v7398_v5, 4 }
 0x2cd   : > { %v2234_v9 = vrot.slane %v2215_v7, 4  ;;  %v2323_v11 = vrot.slane %v7400_v8, 4 }
 0x2cf   : > { %4169 = vmatpush.bf16.msrb.mxu1 %v5488_v3  ;;  %v2244_v0 = vsel %vm666_vm0, %v2234_v9, %v2235_v56  ;;  %v2336_v12 = vsel %vm666_vm0, %v2322_v4, %v2323_v11  ;;  %v7459_v3 = vld [vmem:[#allocation2 + $0x1c] sm:$0xff] }
 0x2d0   : > { %v2246_v54 = vsel %vm2245_vm4, %v2215_v7, %v2244_v0  ;;  %v2337_v51 = vsel %vm2328_vm3, %v7344_v50, %v2336_v12  ;;  %v5451_v17 = vld [vmem:[#allocation3 + $0x540] sm:$0xf]  ;;  %v5828_v47 = vld [vmem:[#allocation3 + $0x544] sm:$0xf] }
 0x2d1   : > { %2716 = vrot.lane.b32.xlu2 %v7330_v10, %s6269_s15  ;;  %2269 = vst [vmem:[#allocation3 + $0x500] sm:$0xff] %v2246_v54 }
 0x2d2   : > { %2356 = vst [vmem:[#allocation3 + $0x560] sm:$0xff] %v2337_v51  ;;  %1969 = vrot.lane.b32.xlu1 %v1947_v13, %s6270_s18  ;;  %2726 = vrot.lane.b32.xlu0 %v7335_v40, %s6269_s15 }
 0x2d3   : > { %v7417_v18 = vpop.permute.xlu2 %2058 }
 0x2d4   : > { %v7419_v19 = vpop.permute.xlu1 %2226  ;;  %v2225_v20 = vpop.permute.xlu0 %2224  ;;  %v2073_v51 = vrot.slane %v7417_v18, 4 }
 0x2d5   : > { %v2240_v42 = vrot.slane %v7419_v19, 4  ;;  %v2239_v22 = vrot.slane %v2225_v20, 4 }
 0x2d7   : > { %v2253_v50 = vsel %vm666_vm0, %v2239_v22, %v2240_v42 }
 0x2d8   : > { %v2254_v35 = vsel %vm2245_vm4, %v2225_v20, %v2253_v50  ;;  %v5419_v39 = vld [vmem:[#allocation3 + $0x500] sm:$0xf]  ;;  %v5820_v46 = vld [vmem:[#allocation3 + $0x504] sm:$0xf] }
 0x2d9   : > { %1979 = vrot.lane.b32.xlu2 %v1952_v23, %s6270_s18  ;;  %2273 = vst [vmem:[#allocation3 + $0x520] sm:$0xff] %v2254_v35  ;;  %v5832_v25 = vld [vmem:[#allocation3 + $0x55c] sm:$0xf0]  ;;  %v5453_v15 = vld [vmem:[#allocation3 + $0x560] sm:$0xf0] }
 0x2da   : > { %2643 = vrot.lane.b32.xlu1 %v7335_v40, %s6271_s20  ;;  %2633 = vrot.lane.b32.xlu0 %v7330_v10, %s6271_s20  ;;  %v5452_v60 = vor.u32 %v5832_v25, %v5451_v17  ;;  %v5456_v26 = vor.u32 %v5828_v47, %v5453_v15 }
 0x2db   : > { %v7433_v44 = vpop.permute.xlu2 %2714 }
 0x2dc   : > { %4118 = vmatpush.bf16.msra.mxu2 %v5452_v60  ;;  %4170 = vmatpush.bf16.msrb.mxu1 %v5456_v26  ;;  %v2142_v32 = vpop.permute.xlu1 %2141  ;;  %v7435_v57 = vpop.permute.xlu0 %2133  ;;  %v2733_v20 = vrot.slane %v7433_v44, 4 }
 0x2dd   : > { %v2156_v34 = vrot.slane %v2142_v32, 4  ;;  %v2152_v48 = vrot.slane %v7435_v57, 4 }
 0x2df   : > { %v2170_v49 = vsel %vm666_vm0, %v2156_v34, %v2157_v28  ;;  %v2161_v38 = vsel %vm666_vm0, %v2151_v27, %v2152_v48 }
 0x2e0   : > { %v2171_v33 = vsel %vm2162_vm5, %v2142_v32, %v2170_v49  ;;  %v2163_v43 = vsel %vm2162_vm5, %v7381_v36, %v2161_v38  ;;  %v5824_v45 = vld [vmem:[#allocation3 + $0x51c] sm:$0xf0]  ;;  %v5421_v37 = vld [vmem:[#allocation3 + $0x520] sm:$0xf0] }
 0x2e1   : > { %1886 = vrot.lane.b32.xlu2 %v1947_v13, %s6263_s8  ;;  %2190 = vst [vmem:[#allocation3 + $0x4e0] sm:$0xff] %v2171_v33  ;;  %v5420_v53 = vor.u32 %v5824_v45, %v5419_v39  ;;  %v5424_v59 = vor.u32 %v5820_v46, %v5421_v37 }
 0x2e2   : > { %2186 = vst [vmem:[#allocation3 + $0x4c0] sm:$0xff] %v2163_v43  ;;  %2550 = vrot.lane.b32.xlu1 %v7330_v10, %s6272_s0  ;;  %1896 = vrot.lane.b32.xlu0 %v1952_v23, %s6263_s8  ;;  %v7461_v10 = vld [vmem:[#allocation2 + $0x44] sm:$0xff] }
 0x2e3   : > { %v7451_v61 = vpop.permute.xlu2 %1965  ;;  %4119 = vmatpush.bf16.msra.mxu2 %v5420_v53  ;;  %4171 = vmatpush.bf16.msrb.mxu1 %v5424_v59 }
 0x2e4   : > { %v7453_v62 = vpop.permute.xlu1 %2050  ;;  %v2049_v36 = vpop.permute.xlu0 %2048  ;;  %v1985_v37 = vrot.slane %v7451_v61, 4 }
 0x2e5   : > { %v2069_v63 = vrot.slane %v7453_v62, 4  ;;  %v2068_v1 = vrot.slane %v2049_v36, 4 }
 0x2e7   : > { %v2078_v2 = vsel %vm666_vm0, %v2068_v1, %v2069_v63 }
 0x2e8   : > { %v2080_v4 = vsel %vm2079_vm6, %v2049_v36, %v2078_v2  ;;  %v5816_v7 = vld [vmem:[#allocation3 + $0x4dc] sm:$0xf0]  ;;  %v5389_v9 = vld [vmem:[#allocation3 + $0x4e0] sm:$0xf0] }
 0x2e9   : > { %2560 = vrot.lane.b32.xlu2 %v7335_v40, %s6272_s0  ;;  %2103 = vst [vmem:[#allocation3 + $0x480] sm:$0xff] %v2080_v4  ;;  %v5387_v0 = vld [vmem:[#allocation3 + $0x4c0] sm:$0xf]  ;;  %v5812_v12 = vld [vmem:[#allocation3 + $0x4c4] sm:$0xf] }
 0x2ea   : > { %2479 = vrot.lane.b32.xlu1 %v7461_v10, %s6262_s17  ;;  %2469 = vrot.lane.b32.xlu0 %v7459_v3, %s6262_s17  ;;  %v5388_v13 = vor.u32 %v5816_v7, %v5387_v0  ;;  %v5392_v54 = vor.u32 %v5812_v12, %v5389_v9 }
 0x2eb   : > { %v7472_v22 = vpop.permute.xlu2 %1977 }
 0x2ec   : > { %4120 = vmatpush.bf16.msra.mxu2 %v5388_v13  ;;  %4172 = vmatpush.bf16.msrb.mxu1 %v5392_v54  ;;  %v2713_v40 = vpop.permute.xlu1 %2712  ;;  %v7474_v23 = vpop.permute.xlu0 %2060  ;;  %v1991_v53 = vrot.slane %v7472_v22, 4 }
 0x2ed   : > { %v2732_v50 = vrot.slane %v2713_v40, 4  ;;  %v2074_v35 = vrot.slane %v7474_v23, 4 }
 0x2ef   : > { %v2742_v17 = vsel %vm666_vm0, %v2732_v50, %v2733_v20  ;;  %v2087_v47 = vsel %vm666_vm0, %v2073_v51, %v2074_v35 }
 0x2f0   : > { %v2744_v25 = vsel %vm2743_vm7, %v2713_v40, %v2742_v17  ;;  %v2088_v15 = vsel %vm2079_vm6, %v7417_v18, %v2087_v47  ;;  %v5355_v38 = vld [vmem:[#allocation3 + $0x480] sm:$0xf]  ;;  %v5804_v39 = vld [vmem:[#allocation3 + $0x484] sm:$0xf] }
 0x2f1   : > { %2386 = vrot.lane.b32.xlu2 %v7459_v3, %s6264_s27  ;;  %2767 = vst [vmem:[#allocation3 + $0x680] sm:$0xff] %v2744_v25 }
 0x2f2   : > { %2107 = vst [vmem:[#allocation3 + $0x4a0] sm:$0xff] %v2088_v15  ;;  %2303 = vrot.lane.b32.xlu1 %v7459_v3, %s6265_s12  ;;  %2396 = vrot.lane.b32.xlu0 %v7461_v10, %s6264_s27 }
 0x2f3   : > { %v7492_v60 = vpop.permute.xlu2 %2639 }
 0x2f4   : > { %v7494_v26 = vpop.permute.xlu1 %2724  ;;  %v2723_v27 = vpop.permute.xlu0 %2722 }
 0x2f5   : > { %v2738_v32 = vrot.slane %v7494_v26, 4  ;;  %v2737_v34 = vrot.slane %v2723_v27, 4 }
 0x2f7   : > { %v2751_v18 = vsel %vm666_vm0, %v2737_v34, %v2738_v32 }
 0x2f8   : > { %v2752_v49 = vsel %vm2743_vm7, %v2723_v27, %v2751_v18  ;;  %v5611_v13 = vld [vmem:[#allocation3 + $0x680] sm:$0xf] }
 0x2f9   : > { %2313 = vrot.lane.b32.xlu2 %v7461_v10, %s6265_s12  ;;  %2771 = vst [vmem:[#allocation3 + $0x6a0] sm:$0xff] %v2752_v49  ;;  %v5808_v33 = vld [vmem:[#allocation3 + $0x49c] sm:$0xf0]  ;;  %v5357_v43 = vld [vmem:[#allocation3 + $0x4a0] sm:$0xf0] }
 0x2fa   : > { %2230 = vrot.lane.b32.xlu1 %v7461_v10, %s6266_s13  ;;  %2220 = vrot.lane.b32.xlu0 %v7459_v3, %s6266_s13  ;;  %v5356_v45 = vor.u32 %v5808_v33, %v5355_v38  ;;  %v5360_v46 = vor.u32 %v5804_v39, %v5357_v43  ;;  %v2654_v33 = vrot.slane %v7492_v60, 4 }
 0x2fb   : > { %v7509_v59 = vpop.permute.xlu2 %1892 }
 0x2fc   : > { %4121 = vmatpush.bf16.msra.mxu2 %v5356_v45  ;;  %4173 = vmatpush.bf16.msrb.mxu1 %v5360_v46  ;;  %v1976_v36 = vpop.permute.xlu1 %1975  ;;  %v7511_v1 = vpop.permute.xlu0 %1967 }
 0x2fd   : > { %v1990_v2 = vrot.slane %v1976_v36, 4  ;;  %v1986_v4 = vrot.slane %v7511_v1, 4 }
 0x2ff   : > { %v2004_v7 = vsel %vm666_vm0, %v1990_v2, %v1991_v53  ;;  %v1995_v9 = vsel %vm666_vm0, %v1985_v37, %v1986_v4 }
 0x300   : > { %v2005_v0 = vsel %vm1996_vm8, %v1976_v36, %v2004_v7  ;;  %v1997_v12 = vsel %vm1996_vm8, %v7451_v61, %v1995_v9  ;;  %v5872_v54 = vld [vmem:[#allocation3 + $0x69c] sm:$0xf0]  ;;  %v1902_v36 = vrot.slane %v7328_v31, 4 }
 0x301   : > { %2137 = vrot.lane.b32.xlu2 %v7459_v3, %s6267_s6  ;;  %2024 = vst [vmem:[#allocation3 + $0x460] sm:$0xff] %v2005_v0  ;;  %v5612_v51 = vor.u32 %v5872_v54, %v5611_v13  ;;  %v1948_v54 = vld [vmem:[#allocation2 + $0x18] sm:$0xff] }
 0x302   : > { %2020 = vst [vmem:[#allocation3 + $0x440] sm:$0xff] %v1997_v12  ;;  %2718 = vrot.lane.b32.xlu1 %v7459_v3, %s6269_s15  ;;  %2147 = vrot.lane.b32.xlu0 %v7461_v10, %s6267_s6 }
 0x303   : > { %v7529_v40 = vpop.permute.xlu2 %2548  ;;  %4134 = vmatpush.bf16.msra.mxu3 %v5612_v51 }
 0x304   : > { %v7531_v50 = vpop.permute.xlu1 %2631  ;;  %v2630_v61 = vpop.permute.xlu0 %2629 }
 0x305   : > { %v2650_v17 = vrot.slane %v7531_v50, 4  ;;  %v2649_v47 = vrot.slane %v2630_v61, 4 }
 0x307   : > { %v2659_v25 = vsel %vm666_vm0, %v2649_v47, %v2650_v17 }
 0x308   : > { %v2661_v15 = vsel %vm2660_vm9, %v2630_v61, %v2659_v25  ;;  %v5800_v27 = vld [vmem:[#allocation3 + $0x45c] sm:$0xf0]  ;;  %v5325_v34 = vld [vmem:[#allocation3 + $0x460] sm:$0xf0] }
 0x309   : > { %2728 = vrot.lane.b32.xlu2 %v7461_v10, %s6269_s15  ;;  %2684 = vst [vmem:[#allocation3 + $0x640] sm:$0xff] %v2661_v15  ;;  %v5323_v18 = vld [vmem:[#allocation3 + $0x440] sm:$0xf]  ;;  %v5796_v49 = vld [vmem:[#allocation3 + $0x444] sm:$0xf] }
 0x30a   : > { %2064 = vrot.lane.b32.xlu1 %v7461_v10, %s6268_s10  ;;  %2054 = vrot.lane.b32.xlu0 %v7459_v3, %s6268_s10  ;;  %v5324_v38 = vor.u32 %v5800_v27, %v5323_v18  ;;  %v5328_v39 = vor.u32 %v5796_v49, %v5325_v34 }
 0x30b   : > { %v7545_v43 = vpop.permute.xlu2 %2467 }
 0x30c   : > { %v8317_v45 = vrot.slane %v7545_v43, 4  ;;  %4122 = vmatpush.bf16.msra.mxu2 %v5324_v38  ;;  %4174 = vmatpush.bf16.msrb.mxu1 %v5328_v39  ;;  %v7548_v46 = vpop.permute.xlu1 %1884  ;;  %v7550_v37 = vpop.permute.xlu0 %2641  ;;  %v1953_v39 = vld [vmem:[#allocation2 + $0x40] sm:$0xff] }
 0x30d   : > { %v1903_v2 = vrot.slane %v7548_v46, 4  ;;  %v2655_v7 = vrot.slane %v7550_v37, 4 }
 0x30e   : > { %v2496_v9 = vsel %vm666_vm0, %v2484_v29, %v8317_v45 }
 0x30f   : > { %v2497_v0 = vsel %vm2494_vm1, %v7298_v6, %v2496_v9  ;;  %v1912_v12 = vsel %vm666_vm0, %v1902_v36, %v1903_v2  ;;  %v2668_v13 = vsel %vm666_vm0, %v2654_v33, %v2655_v7  ;;  %v7577_v6 = vld [vmem:[%s8309_s2] sm:$0xff] }
 0x310   : > { %2519 = vst [vmem:[#allocation3 + $0x5c8] sm:$0xff] %v2497_v0  ;;  %v1914_v51 = vsel %vm1913_vm10, %v7328_v31, %v1912_v12  ;;  %v2669_v61 = vsel %vm2660_vm9, %v7492_v60, %v2668_v13  ;;  %v2995_v29 = vunpack.c.l.b16 %v7577_v6  ;;  %v1907_v31 = vrot.slane %v7509_v59, 4  ;;  %v5579_v12 = vld [vmem:[#allocation3 + $0x640] sm:$0xf] }
 0x311   : > { %2635 = vrot.lane.b32.xlu2 %v7459_v3, %s6271_s20  ;;  %1937 = vst [vmem:[#allocation3 + $0x400] sm:$0xff] %v1914_v51  ;;  %v2567_v60 = vrot.slane %v7529_v40, 4 }
 0x312   : > { %2688 = vst [vmem:[#allocation3 + $0x660] sm:$0xff] %v2669_v61  ;;  %1971 = vrot.lane.b32.xlu1 %v1948_v54, %s6270_s18  ;;  %2645 = vrot.lane.b32.xlu0 %v7461_v10, %s6271_s20  ;;  %v7590_v34 = vpack.c.b16 %v2995_v29, %v2995_v29 }
 0x313   : > { %v7585_v47 = vpop.permute.xlu2 %2394 }
 0x314   : > { %v8316_v25 = vrot.slane %v7585_v47, 4  ;;  %v2547_v15 = vpop.permute.xlu1 %2546  ;;  %v7588_v27 = vpop.permute.xlu0 %1894  ;;  %4098 = vmatmul.bf16.vlgmr.msra.gmra.mxu0 %v7590_v34 }
 0x315   : > { %v2566_v18 = vrot.slane %v2547_v15, 4  ;;  %v1908_v49 = vrot.slane %v7588_v27, 4 }
 0x316   : > { %v2421_v38 = vsel %vm666_vm0, %v2406_v55, %v8316_v25 }
 0x317   : > { %v2422_v33 = vsel %vm2411_vm2, %v7326_v30, %v2421_v38  ;;  %v2576_v36 = vsel %vm666_vm0, %v2566_v18, %v2567_v60  ;;  %v1921_v9 = vsel %vm666_vm0, %v1907_v31, %v1908_v49  ;;  %v7623_v31 = vld [vmem:[%s8309_s2 + $0x8] sm:$0xff] }
 0x318   : > { %2440 = vst [vmem:[#allocation3 + $0x5a8] sm:$0xff] %v2422_v33  ;;  %v2578_v0 = vsel %vm2577_vm11, %v2547_v15, %v2576_v36  ;;  %v1922_v55 = vsel %vm1913_vm10, %v7509_v59, %v1921_v9  ;;  %v2447_v33 = vld [vmem:[#allocation2 + $0x24] sm:$0xf]  ;;  %v5613_v36 = vld [vmem:[#allocation3 + $0x6a0] sm:$0xf0]  ;;  %v2997_v9 = vunpack.c.l.b16 %v7623_v31  ;;  %v2998_v45 = vunpack.c.h.b16 %v7623_v31 }
 0x319   : > { %1981 = vrot.lane.b32.xlu2 %v1953_v39, %s6270_s18  ;;  %2601 = vst [vmem:[#allocation3 + $0x600] sm:$0xff] %v2578_v0  ;;  %v5864_v13 = vld [vmem:[#allocation3 + $0x65c] sm:$0xf0]  ;;  %v5267_v31 = vld [vmem:[#allocation3 + $0x3c8] sm:$0xf] }
 0x31a   : > { %1941 = vst [vmem:[#allocation3 + $0x420] sm:$0xff] %v1922_v55  ;;  %2562 = vrot.lane.b32.xlu1 %v7461_v10, %s6272_s0  ;;  %2552 = vrot.lane.b32.xlu0 %v7459_v3, %s6272_s0  ;;  %v5580_v30 = vor.u32 %v5864_v13, %v5579_v12  ;;  %v5291_v55 = vld [vmem:[#allocation3 + $0x400] sm:$0xf]  ;;  %v5788_v12 = vld [vmem:[#allocation3 + $0x404] sm:$0xf] }
 0x31b   : > { %v7615_v51 = vpop.permute.xlu2 %2218 }
 0x31c   : > { %v8314_v61 = vrot.slane %v7615_v51, 4  ;;  %4135 = vmatpush.bf16.msra.mxu3 %v5580_v30  ;;  %v7618_v29 = vpop.permute.xlu1 %2558  ;;  %v2557_v59 = vpop.permute.xlu0 %2556 }
 0x31d   : > { %v2572_v15 = vrot.slane %v7618_v29, 4  ;;  %v2571_v10 = vrot.slane %v2557_v59, 4 }
 0x31e   : > { %v2247_v3 = vsel %vm666_vm0, %v2235_v56, %v8314_v61 }
 0x31f   : > { %v2248_v18 = vsel %vm2245_vm4, %v7361_v14, %v2247_v3  ;;  %v2585_v38 = vsel %vm666_vm0, %v2571_v10, %v2572_v15  ;;  %v5868_v10 = vld [vmem:[#allocation3 + $0x684] sm:$0xf] }
 0x320   : > { %2270 = vst [vmem:[#allocation3 + $0x508] sm:$0xff] %v2248_v18  ;;  %v2586_v0 = vsel %vm2577_vm11, %v2557_v59, %v2585_v38  ;;  %v5616_v61 = vor.u32 %v5868_v10, %v5613_v36  ;;  %v7643_v18 = vpack.c.b16 %v2997_v9, %v2997_v9  ;;  %v2452_v9 = vld [vmem:[#allocation2 + $0x4c] sm:$0xf]  ;;  %v5547_v10 = vld [vmem:[#allocation3 + $0x600] sm:$0xf] }
 0x321   : > { %1888 = vrot.lane.b32.xlu2 %v1948_v54, %s6263_s8  ;;  %2605 = vst [vmem:[#allocation3 + $0x620] sm:$0xff] %v2586_v0  ;;  %v5792_v56 = vld [vmem:[#allocation3 + $0x41c] sm:$0xf0]  ;;  %v5293_v13 = vld [vmem:[#allocation3 + $0x420] sm:$0xf0] }
 0x322   : > { %2471 = vrot.lane.b32.xlu1 %v2447_v33, %s6262_s17  ;;  %1898 = vrot.lane.b32.xlu0 %v1953_v39, %s6263_s8  ;;  %v5292_v14 = vor.u32 %v5792_v56, %v5291_v55  ;;  %v5296_v30 = vor.u32 %v5788_v12, %v5293_v13  ;;  %v5581_v0 = vld [vmem:[#allocation3 + $0x660] sm:$0xf0]  ;;  %v2369_v56 = vld [vmem:[#allocation2 + $0x4c] sm:$0xf] }
 0x323   : > { %v7641_v3 = vpop.permute.xlu2 %2145  ;;  %v5005_v55 = vld [vmem:[#allocation3 + $0x1e0] sm:$0xf0] }
 0x324   : > { %v8315_v59 = vrot.slane %v7641_v3, 4  ;;  %4123 = vmatpush.bf16.msra.mxu2 %v5292_v14  ;;  %4175 = vmatpush.bf16.msrb.mxu1 %v5296_v30  ;;  %v7646_v54 = vpop.permute.xlu1 %2384  ;;  %v7648_v38 = vpop.permute.xlu0 %2477  ;;  %v5860_v12 = vld [vmem:[#allocation3 + $0x644] sm:$0xf] }
 0x325   : > { %v2402_v33 = vrot.slane %v7646_v54, 4  ;;  %v8318_v39 = vrot.slane %v7648_v38, 4  ;;  %v5584_v30 = vor.u32 %v5860_v12, %v5581_v0  ;;  %v5716_v0 = vld [vmem:[#allocation3 + $0x1c4] sm:$0xf] }
 0x326   : > { %v2172_v36 = vsel %vm666_vm0, %v2157_v28, %v8315_v59  ;;  %v2364_v28 = vld [vmem:[#allocation2 + $0x24] sm:$0xf]  ;;  %v5852_v59 = vld [vmem:[#allocation3 + $0x604] sm:$0xf] }
 0x327   : > { %v2173_v13 = vsel %vm2162_vm5, %v7398_v5, %v2172_v36  ;;  %v2504_v14 = vsel %vm666_vm0, %v2489_v52, %v8318_v39  ;;  %4124 = vmatmul.bf16.vlgmr.msra.gmra.mxu2 %v7643_v18  ;;  %v5785_v39 = vld [vmem:[#allocation3 + $0x3e4] sm:$0xf0] }
 0x328   : > { %4186 = vmatpush.bf16.msrb.mxu2 %v5616_v61  ;;  %v2413_v61 = vsel %vm666_vm0, %v2401_v21, %v2402_v33  ;;  %2191 = vst [vmem:[#allocation3 + $0x4e8] sm:$0xff] %v2173_v13  ;;  %v2505_v36 = vsel %vm2494_vm1, %v7346_v58, %v2504_v14  ;;  %v5856_v21 = vld [vmem:[#allocation3 + $0x61c] sm:$0xf0]  ;;  %v5549_v25 = vld [vmem:[#allocation3 + $0x620] sm:$0xf0]  ;;  %v7678_v13 = vpack.c.b16 %v2998_v45, %v2998_v45 }
 0x329   : > { %v2414_v5 = vsel %vm2411_vm2, %v7363_v16, %v2413_v61  ;;  %2481 = vrot.lane.b32.xlu2 %v2452_v9, %s6262_s17  ;;  %v5548_v52 = vor.u32 %v5856_v21, %v5547_v10  ;;  %v5552_v12 = vor.u32 %v5852_v59, %v5549_v25  ;;  %2523 = vst [vmem:[#allocation3 + $0x5e8] sm:$0xff] %v2505_v36  ;;  %v4973_v61 = vld [vmem:[#allocation3 + $0x1a0] sm:$0xf0]  ;;  %v2281_v10 = vld [vmem:[#allocation2 + $0x24] sm:$0xf] }
 0x32a   : > { %2436 = vst [vmem:[#allocation3 + $0x588] sm:$0xff] %v2414_v5  ;;  %2398 = vrot.lane.b32.xlu1 %v2369_v56, %s6264_s27  ;;  %2388 = vrot.lane.b32.xlu0 %v2364_v28, %s6264_s27  ;;  %v5008_v16 = vor.u32 %v5716_v0, %v5005_v55  ;;  %v5268_v59 = vor.u32 %v5785_v39, %v5267_v31  ;;  %v5708_v55 = vld [vmem:[#allocation3 + $0x184] sm:$0xf]  ;;  %v5235_v21 = vld [vmem:[#allocation3 + $0x388] sm:$0xf] }
 0x32b   : > { %v7680_v58 = vpop.permute.xlu2 %2716  ;;  %4136 = vmatpush.bf16.msra.mxu3 %v5548_v52  ;;  %v4976_v5 = vor.u32 %v5708_v55, %v4973_v61  ;;  %v2198_v52 = vld [vmem:[#allocation2 + $0x24] sm:$0xf]  ;;  %v5700_v0 = vld [vmem:[#allocation3 + $0x144] sm:$0xf]  ;;  %v5769_v61 = vld [vmem:[#allocation3 + $0x364] sm:$0xf0] }
 0x32c   : > { %4187 = vmatpush.bf16.msrb.mxu2 %v5584_v30  ;;  %v2734_v9 = vrot.slane %v7680_v58, 4  ;;  %v7683_v14 = vpop.permute.xlu1 %2311  ;;  %v7685_v25 = vpop.permute.xlu0 %2301  ;;  %v5777_v30 = vld [vmem:[#allocation3 + $0x3a4] sm:$0xf0] }
 0x32d   : > { %v2324_v56 = vrot.slane %v7683_v14, 4  ;;  %v2319_v45 = vrot.slane %v7685_v25, 4  ;;  %v5236_v31 = vor.u32 %v5777_v30, %v5235_v21 }
 0x32e   : > { %v2745_v28 = vsel %vm666_vm0, %v2733_v20, %v2734_v9  ;;  %5641 = vmatmul.msk.bf16.vlgmr.msra.gmra.mxu3 %vm4086_vm12, %v7678_v13 }
 0x32f   : > { %4142 = vmatpush.bf16.msrb.mxu3 %v5008_v16  ;;  %v2746_v39 = vsel %vm2743_vm7, %v7433_v44, %v2745_v28  ;;  %v2338_v36 = vsel %vm666_vm0, %v2323_v11, %v2324_v56  ;;  %v2330_v20 = vsel %vm666_vm0, %v2318_v41, %v2319_v45  ;;  %v2286_v11 = vld [vmem:[#allocation2 + $0x4c] sm:$0xf] }
 0x330   : > { %4188 = vmatpush.bf16.msrb.mxu2 %v5552_v12  ;;  %v4941_v12 = vld [vmem:[#allocation3 + $0x160] sm:$0xf0]  ;;  %2768 = vst [vmem:[#allocation3 + $0x688] sm:$0xff] %v2746_v39  ;;  %v2339_v44 = vsel %vm2328_vm3, %v7400_v8, %v2338_v36  ;;  %v2331_v16 = vsel %vm2328_vm3, %v7383_v24, %v2330_v20  ;;  %v5849_v41 = vld [vmem:[#allocation3 + $0x5e4] sm:$0xf0]  ;;  %v2996_v8 = vunpack.c.h.b16 %v7577_v6 }
 0x331   : > { %2305 = vrot.lane.b32.xlu2 %v2281_v10, %s6265_s12  ;;  %2357 = vst [vmem:[#allocation3 + $0x568] sm:$0xff] %v2339_v44  ;;  %v4944_v28 = vor.u32 %v5700_v0, %v4941_v12  ;;  %v5203_v24 = vld [vmem:[#allocation3 + $0x348] sm:$0xf] }
 0x332   : > { %2353 = vst [vmem:[#allocation3 + $0x548] sm:$0xff] %v2331_v16  ;;  %2222 = vrot.lane.b32.xlu1 %v2198_v52, %s6266_s13  ;;  %2315 = vrot.lane.b32.xlu0 %v2286_v11, %s6265_s12  ;;  %v5491_v30 = vld [vmem:[#allocation3 + $0x588] sm:$0xf]  ;;  %v5204_v21 = vor.u32 %v5769_v61, %v5203_v24  ;;  %v5692_v52 = vld [vmem:[#allocation3 + $0x104] sm:$0xf]  ;;  %v7723_v0 = vpack.c.b16 %v2996_v8, %v2996_v8 }
 0x333   : > { %4143 = vmatpush.bf16.msrb.mxu3 %v4976_v5  ;;  %v7715_v39 = vpop.permute.xlu2 %1979  ;;  %v4909_v5 = vld [vmem:[#allocation3 + $0x120] sm:$0xf0]  ;;  %v5841_v44 = vld [vmem:[#allocation3 + $0x5a4] sm:$0xf0]  ;;  %v2203_v11 = vld [vmem:[#allocation2 + $0x4c] sm:$0xf] }
 0x334   : > { %4207 = vmatpush.bf16.msra.mxu2 %v5268_v59  ;;  %v5523_v59 = vld [vmem:[#allocation3 + $0x5c8] sm:$0xf]  ;;  %v1992_v10 = vrot.slane %v7715_v39, 4  ;;  %v7719_v36 = vpop.permute.xlu1 %2135  ;;  %v7721_v20 = vpop.permute.xlu0 %2228  ;;  %4111 = vmatmul.bf16.vlgmr.msra.gmra.mxu1 %v7723_v0  ;;  %v2120_v8 = vld [vmem:[#allocation2 + $0x4c] sm:$0xf] }
 0x335   : > { %v5524_v55 = vor.u32 %v5849_v41, %v5523_v59  ;;  %v2153_v6 = vrot.slane %v7719_v36, 4  ;;  %v2241_v12 = vrot.slane %v7721_v20, 4  ;;  %v5761_v16 = vld [vmem:[#allocation3 + $0x324] sm:$0xf0]  ;;  %v5492_v59 = vor.u32 %v5841_v44, %v5491_v30  ;;  %v5684_v24 = vld [vmem:[#allocation3 + $0xc4] sm:$0xf]  ;;  %4163 = vmatmul.bf16.vlgmr.msrb.gmra.mxu0 %v7723_v0 }
 0x336   : > { %v4912_v41 = vor.u32 %v5692_v52, %v4909_v5  ;;  %v4877_v30 = vld [vmem:[#allocation3 + $0xe0] sm:$0xf0]  ;;  %v5753_v44 = vld [vmem:[#allocation3 + $0x2e4] sm:$0xf0] }
 0x337   : > { %4220 = vmatpush.bf16.msra.mxu0 %v5524_v55  ;;  %4144 = vmatpush.bf16.msrb.mxu3 %v4944_v28  ;;  %v2164_v55 = vsel %vm666_vm0, %v2152_v48, %v2153_v6  ;;  %v5171_v28 = vld [vmem:[#allocation3 + $0x308] sm:$0xf] }
 0x338   : > { %4208 = vmatpush.bf16.msra.mxu2 %v5236_v31  ;;  %v2006_v31 = vsel %vm666_vm0, %v1991_v53, %v1992_v10  ;;  %v2255_v53 = vsel %vm666_vm0, %v2240_v42, %v2241_v12  ;;  %v5172_v5 = vor.u32 %v5761_v16, %v5171_v28  ;;  %v2115_v42 = vld [vmem:[#allocation2 + $0x24] sm:$0xf] }
 0x339   : > { %v2007_v61 = vsel %vm1996_vm8, %v7472_v22, %v2006_v31  ;;  %5642 = vmatmul.msk.bf16.vlgmr.msrb.gmra.mxu2 %vm4086_vm12, %v7678_v13  ;;  %v2165_v22 = vsel %vm2162_vm5, %v7435_v57, %v2164_v55  ;;  %v2256_v48 = vsel %vm2245_vm4, %v7419_v19, %v2255_v53  ;;  %2232 = vrot.lane.b32.xlu2 %v2203_v11, %s6266_s13  ;;  %v5459_v52 = vld [vmem:[#allocation3 + $0x548] sm:$0xf]  ;;  %v5676_v53 = vld [vmem:[#allocation3 + $0x84] sm:$0xf] }
 0x33a   : > { %2025 = vst [vmem:[#allocation3 + $0x468] sm:$0xff] %v2007_v61  ;;  %2149 = vrot.lane.b32.xlu1 %v2120_v8, %s6267_s6  ;;  %v4880_v61 = vor.u32 %v5684_v24, %v4877_v30  ;;  %2139 = vrot.lane.b32.xlu0 %v2115_v42, %s6267_s6  ;;  %v5139_v19 = vld [vmem:[#allocation3 + $0x2c8] sm:$0xf]  ;;  %v4813_v30 = vld [vmem:[#allocation3 + $0x60] sm:$0xf0] }
 0x33b   : > { %4221 = vmatpush.bf16.msra.mxu0 %v5492_v59  ;;  %4145 = vmatpush.bf16.msrb.mxu3 %v4912_v41  ;;  %2187 = vst [vmem:[#allocation3 + $0x4c8] sm:$0xff] %v2165_v22  ;;  %v7754_v57 = vpop.permute.xlu2 %1886  ;;  %v4845_v59 = vld [vmem:[#allocation3 + $0xa0] sm:$0xf0]  ;;  %v5140_v55 = vor.u32 %v5753_v44, %v5139_v19  ;;  %v5745_v24 = vld [vmem:[#allocation3 + $0x2a4] sm:$0xf0]  ;;  %v601_v22 = vld [vmem:[#allocation2 + $0x8] sm:$0xff] }
 0x33c   : > { %4209 = vmatpush.bf16.msra.mxu2 %v5204_v21  ;;  %v5833_v21 = vld [vmem:[#allocation3 + $0x564] sm:$0xf0]  ;;  %2274 = vst [vmem:[#allocation3 + $0x528] sm:$0xff] %v2256_v48  ;;  %v1904_v16 = vrot.slane %v7754_v57, 4  ;;  %v7758_v41 = vpop.permute.xlu1 %2062  ;;  %v7760_v11 = vpop.permute.xlu0 %2052  ;;  %v605_v48 = vld [vmem:[#allocation2 + $0x30] sm:$0xff] }
 0x33d   : > { %v5460_v31 = vor.u32 %v5833_v21, %v5459_v52  ;;  %v8320_v28 = vrot.slane %v7758_v41, 4  ;;  %v8319_v8 = vrot.slane %v7760_v11, 4  ;;  %v2032_v42 = vld [vmem:[#allocation2 + $0x24] sm:$0xf]  ;;  %v4848_v21 = vor.u32 %v5676_v53, %v4845_v59  ;;  %v5107_v52 = vld [vmem:[#allocation3 + $0x288] sm:$0xf] }
 0x33e   : > { %609 = vst [vmem:[#allocation3 + $0x8] sm:$0xff] %v601_v22  ;;  %v2037_v19 = vld [vmem:[#allocation2 + $0x4c] sm:$0xf]  ;;  %v5668_v59 = vld [vmem:[#allocation3 + $0x44] sm:$0xf] }
 0x33f   : > { %4222 = vmatpush.bf16.msra.mxu0 %v5460_v31  ;;  %4146 = vmatpush.bf16.msrb.mxu3 %v4880_v61  ;;  %v2089_v31 = vsel %vm666_vm0, %v2074_v35, %v8320_v28  ;;  %v2696_v61 = vld [vmem:[#allocation2 + $0x24] sm:$0xf]  ;;  %613 = vst [vmem:[#allocation3 + $0x28] sm:$0xff] %v605_v48  ;;  %v5108_v35 = vor.u32 %v5745_v24, %v5107_v52  ;;  %v5427_v22 = vld [vmem:[#allocation3 + $0x508] sm:$0xf] }
 0x340   : > { %4210 = vmatpush.bf16.msra.mxu2 %v5172_v5  ;;  %v1915_v5 = vsel %vm666_vm0, %v1903_v2, %v1904_v16  ;;  %v2081_v2 = vsel %vm666_vm0, %v2069_v63, %v8319_v8  ;;  %v4781_v8 = vld [vmem:[#allocation3 + $0x20] sm:$0xf0] }
 0x341   : > { %v1916_v44 = vsel %vm1913_vm10, %v7548_v46, %v1915_v5  ;;  %v2090_v46 = vsel %vm2079_vm6, %v7474_v23, %v2089_v31  ;;  %v2082_v53 = vsel %vm2079_vm6, %v7453_v62, %v2081_v2  ;;  %v5660_v5 = vld [vmem:[#allocation3 + $0x4] sm:$0xf]  ;;  %2056 = vrot.lane.b32.xlu2 %v2032_v42, %s6268_s10  ;;  %v5075_v62 = vld [vmem:[#allocation3 + $0x248] sm:$0xf] }
 0x342   : > { %1938 = vst [vmem:[#allocation3 + $0x408] sm:$0xff] %v1916_v44  ;;  %2720 = vrot.lane.b32.xlu1 %v2696_v61, %s6269_s15  ;;  %v4816_v44 = vor.u32 %v5668_v59, %v4813_v30  ;;  %2066 = vrot.lane.b32.xlu0 %v2037_v19, %s6268_s10  ;;  %v5395_v23 = vld [vmem:[#allocation3 + $0x4c8] sm:$0xf]  ;;  %v4784_v31 = vor.u32 %v5660_v5, %v4781_v8 }
 0x343   : > { %4147 = vmatpush.bf16.msrb.mxu3 %v4848_v21  ;;  %2108 = vst [vmem:[#allocation3 + $0x4a8] sm:$0xff] %v2090_v46  ;;  %v5825_v63 = vld [vmem:[#allocation3 + $0x524] sm:$0xf0]  ;;  %v7787_v28 = vpop.permute.xlu2 %2560 }
 0x344   : > { %4211 = vmatpush.bf16.msra.mxu2 %v5140_v55  ;;  %v5737_v55 = vld [vmem:[#allocation3 + $0x264] sm:$0xf0]  ;;  %2104 = vst [vmem:[#allocation3 + $0x488] sm:$0xff] %v2082_v53  ;;  %v5428_v48 = vor.u32 %v5825_v63, %v5427_v22  ;;  %v2573_v24 = vrot.slane %v7787_v28, 4  ;;  %v7791_v21 = vpop.permute.xlu1 %1969  ;;  %v7793_v42 = vpop.permute.xlu0 %2726  ;;  %v2701_v53 = vld [vmem:[#allocation2 + $0x4c] sm:$0xf]  ;;  %4176 = vmatmul.bf16.vlgmr.msrb.gmra.mxu1 %v7643_v18 }
 0x345   : > { %v5076_v52 = vor.u32 %v5737_v55, %v5075_v62  ;;  %v5721_v2 = vld [vmem:[#allocation3 + $0x1e4] sm:$0xf0]  ;;  %v1987_v61 = vrot.slane %v7791_v21, 4  ;;  %v2739_v30 = vrot.slane %v7793_v42, 4  ;;  %v5525_v63 = vld [vmem:[#allocation3 + $0x5e8] sm:$0xf0] }
 0x346   : > { %4223 = vmatpush.bf16.msra.mxu0 %v5428_v48  ;;  %v5817_v59 = vld [vmem:[#allocation3 + $0x4e4] sm:$0xf0]  ;;  %v2587_v19 = vsel %vm666_vm0, %v2572_v15, %v2573_v24  ;;  %v1954_v62 = vld [vmem:[#allocation2 + $0x48] sm:$0xf] }
 0x347   : > { %4148 = vmatpush.bf16.msrb.mxu3 %v4816_v44  ;;  %v5729_v46 = vld [vmem:[#allocation3 + $0x224] sm:$0xf0]  ;;  %v2588_v8 = vsel %vm2577_vm11, %v7618_v29, %v2587_v19  ;;  %v1998_v5 = vsel %vm666_vm0, %v1986_v4, %v1987_v61  ;;  %v2753_v15 = vsel %vm666_vm0, %v2738_v32, %v2739_v30 }
 0x348   : > { %4212 = vmatpush.bf16.msra.mxu2 %v5108_v35  ;;  %v5396_v35 = vor.u32 %v5817_v59, %v5395_v23  ;;  %v5011_v22 = vld [vmem:[#allocation3 + $0x1c8] sm:$0xf]  ;;  %v5845_v23 = vld [vmem:[#allocation3 + $0x5cc] sm:$0xf]  ;;  %2606 = vst [vmem:[#allocation3 + $0x628] sm:$0xff] %v2588_v8  ;;  %v1999_v29 = vsel %vm1996_vm8, %v7511_v1, %v1998_v5 }
 0x349   : > { %v5713_v55 = vld [vmem:[#allocation3 + $0x1a4] sm:$0xf0]  ;;  %v5012_v48 = vor.u32 %v5721_v2, %v5011_v22  ;;  %v1949_v59 = vld [vmem:[#allocation2 + $0x20] sm:$0xf]  ;;  %2730 = vrot.lane.b32.xlu2 %v2701_v53, %s6269_s15  ;;  %2021 = vst [vmem:[#allocation3 + $0x448] sm:$0xff] %v1999_v29  ;;  %v5528_v32 = vor.u32 %v5845_v23, %v5525_v63  ;;  %v6273_v23 = vmov 0  }
 0x34a   : > { %v5043_v44 = vld [vmem:[#allocation3 + $0x208] sm:$0xf]  ;;  %4224 = vmatpush.bf16.msra.mxu0 %v5396_v35  ;;  %1983 = vrot.lane.b32.xlu1 %v1954_v62, %s6270_s18  ;;  %v5837_v8 = vld [vmem:[#allocation3 + $0x58c] sm:$0xf]  ;;  %v2613_v29 = vld [vmem:[#allocation2 + $0x24] sm:$0xf] }
 0x34b   : > { %4149 = vmatpush.bf16.msrb.mxu3 %v4784_v31  ;;  %v5044_v4 = vor.u32 %v5729_v46, %v5043_v44  ;;  %v5809_v19 = vld [vmem:[#allocation3 + $0x4a4] sm:$0xf0]  ;;  %v7821_v5 = vpop.permute.xlu2 %2386  ;;  %1973 = vrot.lane.b32.xlu0 %v1949_v59, %s6270_s18  ;;  %v5493_v35 = vld [vmem:[#allocation3 + $0x5a8] sm:$0xf0] }
 0x34c   : > { %4213 = vmatpush.bf16.msra.mxu2 %v5076_v52  ;;  %v2754_v52 = vsel %vm2743_vm7, %v7494_v26, %v2753_v15  ;;  %v5363_v2 = vld [vmem:[#allocation3 + $0x488] sm:$0xf]  ;;  %v8323_v31 = vrot.slane %v7821_v5, 4  ;;  %v7825_v46 = vpop.permute.xlu1 %2643  ;;  %v7827_v53 = vpop.permute.xlu0 %2633  ;;  %v5496_v44 = vor.u32 %v5837_v8, %v5493_v35  ;;  %6076 = vset.pattern.permute.xlu0 %v6273_v23 }
 0x34d   : > { %2772 = vst [vmem:[#allocation3 + $0x6a8] sm:$0xff] %v2754_v52  ;;  %v5364_v22 = vor.u32 %v5809_v19, %v5363_v2  ;;  %v4979_v1 = vld [vmem:[#allocation3 + $0x188] sm:$0xf]  ;;  %v2656_v15 = vrot.slane %v7825_v46, 4  ;;  %v5829_v52 = vld [vmem:[#allocation3 + $0x54c] sm:$0xf]  ;;  %6075 = vset.pattern.permute.xlu2 %v6273_v23 }
 0x34e   : > { %v4980_v26 = vor.u32 %v5713_v55, %v4979_v1  ;;  %v5705_v63 = vld [vmem:[#allocation3 + $0x164] sm:$0xf0]  ;;  %4150 = vmatmul.bf16.vlgmr.msrb.gmra.mxu3 %v7590_v34  ;;  %v2415_v55 = vsel %vm666_vm0, %v2402_v33, %v8323_v31  ;;  %v1866_v2 = vld [vmem:[#allocation2 + $0x20] sm:$0xf]  ;;  %v5717_v31 = vld [vmem:[#allocation3 + $0x1cc] sm:$0xf] }
 0x34f   : > { %4194 = vmatpush.bf16.msra.mxu3 %v5012_v48  ;;  %4225 = vmatpush.bf16.msra.mxu0 %v5364_v22  ;;  %v2651_v48 = vrot.slane %v7827_v53, 4  ;;  %v4947_v62 = vld [vmem:[#allocation3 + $0x148] sm:$0xf]  ;;  %v2416_v59 = vsel %vm2411_vm2, %v7646_v54, %v2415_v55  ;;  %v2670_v19 = vsel %vm666_vm0, %v2655_v7, %v2656_v15  ;;  %v2618_v22 = vld [vmem:[#allocation2 + $0x4c] sm:$0xf] }
 0x350   : > { %4214 = vmatpush.bf16.msra.mxu2 %v5044_v4  ;;  %v5461_v4 = vld [vmem:[#allocation3 + $0x568] sm:$0xf0]  ;;  %v5697_v1 = vld [vmem:[#allocation3 + $0x124] sm:$0xf0]  ;;  %2437 = vst [vmem:[#allocation3 + $0x590] sm:$0xff] %v2416_v59  ;;  %v2671_v54 = vsel %vm2660_vm9, %v7550_v37, %v2670_v19 }
 0x351   : > { %v2662_v33 = vsel %vm666_vm0, %v2650_v17, %v2651_v48  ;;  %v5801_v7 = vld [vmem:[#allocation3 + $0x464] sm:$0xf0]  ;;  %2637 = vrot.lane.b32.xlu2 %v2613_v29, %s6271_s20  ;;  %2689 = vst [vmem:[#allocation3 + $0x668] sm:$0xff] %v2671_v54  ;;  %v5464_v35 = vor.u32 %v5829_v52, %v5461_v4  ;;  %v5429_v55 = vld [vmem:[#allocation3 + $0x528] sm:$0xf0] }
 0x352   : > { %v2663_v8 = vsel %vm2660_vm9, %v7531_v50, %v2662_v33  ;;  %1890 = vrot.lane.b32.xlu1 %v1866_v2, %s6263_s8  ;;  %v4915_v23 = vld [vmem:[#allocation3 + $0x108] sm:$0xf]  ;;  %v5821_v59 = vld [vmem:[#allocation3 + $0x50c] sm:$0xf] }
 0x353   : > { %4195 = vmatpush.bf16.msra.mxu3 %v4980_v26  ;;  %4215 = vmatmul.bf16.vlgmr.msra.gmra.mxu2 %v7723_v0  ;;  %v5331_v26 = vld [vmem:[#allocation3 + $0x448] sm:$0xf]  ;;  %2685 = vst [vmem:[#allocation3 + $0x648] sm:$0xff] %v2663_v8  ;;  %v7856_v37 = vpop.permute.xlu2 %2313  ;;  %v4916_v50 = vor.u32 %v5697_v1, %v4915_v23  ;;  %v5432_v2 = vor.u32 %v5821_v59, %v5429_v55  ;;  %v1871_v1 = vld [vmem:[#allocation2 + $0x48] sm:$0xf] }
 0x354   : > { %4272 = vmatpush.bf16.msrb.mxu2 %v5528_v32  ;;  %v4948_v32 = vor.u32 %v5705_v63, %v4947_v62  ;;  %v5332_v17 = vor.u32 %v5801_v7, %v5331_v26  ;;  %v5873_v63 = vld [vmem:[#allocation3 + $0x6a4] sm:$0xf0]  ;;  %2647 = vrot.lane.b32.xlu0 %v2618_v22, %s6271_s20  ;;  %v8322_v29 = vrot.slane %v7856_v37, 4  ;;  %v7860_v52 = vpop.permute.xlu1 %2550  ;;  %v7862_v4 = vpop.permute.xlu0 %1896  ;;  %v5813_v8 = vld [vmem:[#allocation3 + $0x4cc] sm:$0xf] }
 0x355   : > { %v5689_v19 = vld [vmem:[#allocation3 + $0xe4] sm:$0xf0]  ;;  %v2568_v33 = vrot.slane %v7860_v52, 4  ;;  %v2530_v23 = vld [vmem:[#allocation2 + $0x24] sm:$0xf] }
 0x356   : > { %4226 = vmatpush.bf16.msra.mxu0 %v5332_v17  ;;  %v2340_v22 = vsel %vm666_vm0, %v2324_v56, %v8322_v29  ;;  %v4883_v54 = vld [vmem:[#allocation3 + $0xc8] sm:$0xf]  ;;  %v2535_v17 = vld [vmem:[#allocation2 + $0x4c] sm:$0xf] }
 0x357   : > { %4196 = vmatpush.bf16.msra.mxu3 %v4948_v32  ;;  %v8324_v32 = vrot.slane %v7862_v4, 4  ;;  %v2341_v26 = vsel %vm2328_vm3, %v7683_v14, %v2340_v22  ;;  %v2579_v7 = vsel %vm666_vm0, %v2567_v60, %v2568_v33  ;;  %v4884_v56 = vor.u32 %v5689_v19, %v4883_v54  ;;  %v5805_v19 = vld [vmem:[#allocation3 + $0x48c] sm:$0xf] }
 0x358   : > { %4273 = vmatpush.bf16.msrb.mxu2 %v5496_v44  ;;  %v5619_v44 = vld [vmem:[#allocation3 + $0x688] sm:$0xf]  ;;  %2358 = vst [vmem:[#allocation3 + $0x570] sm:$0xff] %v2341_v26  ;;  %v2580_v14 = vsel %vm2577_vm11, %v7529_v40, %v2579_v7 }
 0x359   : > { %v5620_v62 = vor.u32 %v5873_v63, %v5619_v44  ;;  %v5397_v44 = vld [vmem:[#allocation3 + $0x4e8] sm:$0xf0]  ;;  %v5681_v63 = vld [vmem:[#allocation3 + $0xa4] sm:$0xf0]  ;;  %1900 = vrot.lane.b32.xlu2 %v1871_v1, %s6263_s8  ;;  %2602 = vst [vmem:[#allocation3 + $0x608] sm:$0xff] %v2580_v14  ;;  %s8260_s8 = scalar_lea.vmem %s8312_s5, %s4776_s22 }
 0x35a   : > { %v5865_v60 = vld [vmem:[#allocation3 + $0x664] sm:$0xf0]  ;;  %v5400_v55 = vor.u32 %v5813_v8, %v5397_v44  ;;  %2564 = vrot.lane.b32.xlu1 %v2535_v17, %s6272_s0  ;;  %v5797_v44 = vld [vmem:[#allocation3 + $0x44c] sm:$0xf] }
 0x35b   : > { %4238 = vmatpush.bf16.msra.mxu1 %v5620_v62  ;;  %4197 = vmatpush.bf16.msra.mxu3 %v4916_v50  ;;  %v4851_v50 = vld [vmem:[#allocation3 + $0x88] sm:$0xf]  ;;  %v7889_v22 = vpop.permute.xlu2 %2137 }
 0x35c   : > { %4274 = vmatpush.bf16.msrb.mxu2 %v5464_v35  ;;  %v1923_v35 = vsel %vm666_vm0, %v1908_v49, %v8324_v32  ;;  %v5587_v49 = vld [vmem:[#allocation3 + $0x648] sm:$0xf]  ;;  %2554 = vrot.lane.b32.xlu0 %v2530_v23, %s6272_s0  ;;  %v4852_v40 = vor.u32 %v5681_v63, %v4851_v50  ;;  %v7893_v1 = vpop.permute.xlu1 %2479  ;;  %v7895_v54 = vpop.permute.xlu0 %2469  ;;  %v8343_v23 = vrot.slane %v7648_v38, 4  ;;  %v5333_v50 = vld [vmem:[#allocation3 + $0x468] sm:$0xf0] }
 0x35d   : > { %v1924_v62 = vsel %vm1913_vm10, %v7588_v27, %v1923_v35  ;;  %v5588_v59 = vor.u32 %v5865_v60, %v5587_v49  ;;  %v8321_v27 = vrot.slane %v7889_v22, 4  ;;  %v5673_v8 = vld [vmem:[#allocation3 + $0x64] sm:$0xf0]  ;;  %v2491_v26 = vrot.slane %v7893_v1, 4  ;;  %v5237_v32 = vld [vmem:[#allocation3 + $0x3a8] sm:$0xf0] }
 0x35e   : > { %1942 = vst [vmem:[#allocation3 + $0x428] sm:$0xff] %v1924_v62  ;;  %v8325_v7 = vrot.slane %v7895_v54, 4  ;;  %v4787_v63 = vld [vmem:[#allocation3 + $0x8] sm:$0xf]  ;;  %v5336_v29 = vor.u32 %v5797_v44, %v5333_v50  ;;  %v5589_v50 = vld [vmem:[#allocation3 + $0x668] sm:$0xf0] }
 0x35f   : > { %4198 = vmatpush.bf16.msra.mxu3 %v4884_v56  ;;  %4239 = vmatpush.bf16.msra.mxu1 %v5588_v59  ;;  %v4819_v56 = vld [vmem:[#allocation3 + $0x48] sm:$0xf]  ;;  %v2166_v17 = vsel %vm666_vm0, %v2153_v6, %v8321_v27  ;;  %v2506_v60 = vsel %vm666_vm0, %v8343_v23, %v2491_v26  ;;  %v5621_v27 = vld [vmem:[#allocation3 + $0x6a8] sm:$0xf0] }
 0x360   : > { %4275 = vmatpush.bf16.msrb.mxu2 %v5432_v2  ;;  %v5365_v2 = vld [vmem:[#allocation3 + $0x4a8] sm:$0xf0]  ;;  %v5665_v14 = vld [vmem:[#allocation3 + $0x24] sm:$0xf0]  ;;  %v2167_v62 = vsel %vm2162_vm5, %v7719_v36, %v2166_v17  ;;  %v4820_v6 = vor.u32 %v5673_v8, %v4819_v56  ;;  %v2507_v36 = vsel %vm2494_vm1, %v7648_v38, %v2506_v60 }
 0x361   : > { %v5368_v35 = vor.u32 %v5805_v19, %v5365_v2  ;;  %v5857_v59 = vld [vmem:[#allocation3 + $0x624] sm:$0xf0]  ;;  %v5781_v19 = vld [vmem:[#allocation3 + $0x3cc] sm:$0xf]  ;;  %2188 = vst [vmem:[#allocation3 + $0x4d0] sm:$0xff] %v2167_v62  ;;  %v4788_v56 = vor.u32 %v5665_v14, %v4787_v63  ;;  %v4506_v62 = vld [vmem:[%s8310_s3] sm:$0xff] }
 0x362   : > { %v5269_v2 = vld [vmem:[#allocation3 + $0x3e8] sm:$0xf0]  ;;  %v5555_v23 = vld [vmem:[#allocation3 + $0x608] sm:$0xf]  ;;  %2524 = vst [vmem:[#allocation3 + $0x5f0] sm:$0xff] %v2507_v36  ;;  %4509 = vperm.xlu2 %6075, %v4506_v62   ;;  %v4520_v63 = vld [vmem:[%s8311_s4] sm:$0xff] }
 0x363   : > { %4199 = vmatpush.bf16.msra.mxu3 %v4852_v40  ;;  %v5013_v40 = vld [vmem:[#allocation3 + $0x1e8] sm:$0xf0]  ;;  %v5556_v8 = vor.u32 %v5857_v59, %v5555_v23  ;;  %v5272_v60 = vor.u32 %v5781_v19, %v5269_v2 }
 0x364   : > { %4276 = vmatpush.bf16.msrb.mxu2 %v5400_v55  ;;  %v8344_v55 = vrot.slane %v7545_v43, 4  ;;  %v7929_v59 = vpop.permute.xlu1 %2303  ;;  %v7931_v19 = vpop.permute.xlu0 %2396  ;;  %v5016_v2 = vor.u32 %v5717_v31, %v5013_v40  ;;  %v5789_v36 = vld [vmem:[#allocation3 + $0x40c] sm:$0xf]  ;;  %4523 = vperm.xlu0 %6076, %v4520_v63  }
 0x365   : > { %4240 = vmatpush.bf16.msra.mxu1 %v5556_v8  ;;  %v4981_v23 = vld [vmem:[#allocation3 + $0x1a8] sm:$0xf0] }
 0x366   : > { %v2498_v49 = vsel %vm666_vm0, %v8344_v55, %v8325_v7  ;;  %v5299_v55 = vld [vmem:[#allocation3 + $0x408] sm:$0xf]  ;;  %v5869_v7 = vld [vmem:[#allocation3 + $0x68c] sm:$0xf] }
 0x367   : > { %v2499_v17 = vsel %vm2494_vm1, %v7545_v43, %v2498_v49  ;;  %4200 = vmatpush.bf16.msra.mxu3 %v4820_v6  ;;  %v5301_v43 = vld [vmem:[#allocation3 + $0x428] sm:$0xf0]  ;;  %v7923_v49 = vpop.permute.xlu2 %2728  ;;  %v5624_v44 = vor.u32 %v5869_v7, %v5621_v27  ;;  %v2408_v27 = vrot.slane %v7931_v19, 4 }
 0x368   : > { %4277 = vmatpush.bf16.msrb.mxu2 %v5368_v35  ;;  %v5793_v35 = vld [vmem:[#allocation3 + $0x424] sm:$0xf0]  ;;  %2520 = vst [vmem:[#allocation3 + $0x5d0] sm:$0xff] %v2499_v17  ;;  %v5861_v6 = vld [vmem:[#allocation3 + $0x64c] sm:$0xf]  ;;  %v2740_v14 = vrot.slane %v7923_v49, 4  ;;  %v5304_v7 = vor.u32 %v5789_v36, %v5301_v43  ;;  %5643 = vmatmul.msk.bf16.vlgmr.msra.gmra.mxu1 %vm4086_vm12, %v7678_v13 }
 0x369   : > { %v5300_v38 = vor.u32 %v5793_v35, %v5299_v55  ;;  %4259 = vmatpush.bf16.msrb.mxu1 %v5272_v60  ;;  %v5773_v17 = vld [vmem:[#allocation3 + $0x38c] sm:$0xf]  ;;  %v5592_v8 = vor.u32 %v5861_v6, %v5589_v50  ;;  %v5786_v6 = vld [vmem:[#allocation3 + $0x3ec] sm:$0xf0] }
 0x36a   : > { %v2755_v55 = vsel %vm666_vm0, %v2739_v30, %v2740_v14  ;;  %v5240_v35 = vor.u32 %v5773_v17, %v5237_v32  ;;  %v5709_v30 = vld [vmem:[#allocation3 + $0x18c] sm:$0xf] }
 0x36b   : > { %4227 = vmatpush.bf16.msra.mxu0 %v5300_v38  ;;  %4201 = vmatpush.bf16.msra.mxu3 %v4788_v56  ;;  %v2756_v31 = vsel %vm2743_vm7, %v7793_v42, %v2755_v55  ;;  %v8345_v56 = vrot.slane %v7585_v47, 4  ;;  %v5205_v32 = vld [vmem:[#allocation3 + $0x368] sm:$0xf0] }
 0x36c   : > { %4278 = vmatpush.bf16.msrb.mxu2 %v5336_v29  ;;  %v2320_v29 = vrot.slane %v7929_v59, 4  ;;  %2773 = vst [vmem:[#allocation3 + $0x6b0] sm:$0xff] %v2756_v31  ;;  %v5853_v60 = vld [vmem:[#allocation3 + $0x60c] sm:$0xf]  ;;  %v7966_v55 = vpop.permute.xlu0 %2220 }
 0x36d   : > { %v2423_v62 = vsel %vm666_vm0, %v8345_v56, %v2408_v27  ;;  %4260 = vmatpush.bf16.msrb.mxu1 %v5240_v35  ;;  %v4949_v43 = vld [vmem:[#allocation3 + $0x168] sm:$0xf0]  ;;  %v2237_v56 = vrot.slane %v7966_v55, 4 }
 0x36e   : > { %v2332_v40 = vsel %vm666_vm0, %v2319_v45, %v2320_v29  ;;  %4228 = vmatmul.bf16.vlgmr.msra.gmra.mxu0 %v7643_v18  ;;  %v2424_v38 = vsel %vm2411_vm2, %v7585_v47, %v2423_v62  ;;  %v4984_v45 = vor.u32 %v5709_v30, %v4981_v23  ;;  %4202 = vmatmul.bf16.vlgmr.msra.gmra.mxu3 %v7590_v34  ;;  %v5701_v36 = vld [vmem:[#allocation3 + $0x14c] sm:$0xf]  ;;  %v7964_v23 = vpop.permute.xlu1 %2230  ;;  %v5778_v30 = vld [vmem:[#allocation3 + $0x3ac] sm:$0xf0] }
 0x36f   : > { %4290 = vmatpush.bf16.msrb.mxu0 %v5624_v44  ;;  %4246 = vmatpush.bf16.msrb.mxu3 %v5016_v2  ;;  %v2333_v42 = vsel %vm2328_vm3, %v7685_v25, %v2332_v40  ;;  %v5765_v44 = vld [vmem:[#allocation3 + $0x34c] sm:$0xf]  ;;  %2441 = vst [vmem:[#allocation3 + $0x5b0] sm:$0xff] %v2424_v38  ;;  %v7961_v47 = vpop.permute.xlu2 %2635  ;;  %v5275_v2 = vld [vmem:[#allocation3 + $0x3d0] sm:$0xf]  ;;  %v2242_v40 = vrot.slane %v7964_v23, 4 }
 0x370   : > { %4279 = vmatpush.bf16.msrb.mxu2 %v5304_v7  ;;  %2354 = vst [vmem:[#allocation3 + $0x550] sm:$0xff] %v2333_v42  ;;  %v5208_v50 = vor.u32 %v5765_v44, %v5205_v32  ;;  %v5557_v25 = vld [vmem:[#allocation3 + $0x628] sm:$0xf0]  ;;  %v2652_v17 = vrot.slane %v7961_v47, 4  ;;  %v5276_v35 = vor.u32 %v5786_v6, %v5275_v2 }
 0x371   : > { %v5560_v63 = vor.u32 %v5853_v60, %v5557_v25  ;;  %v5173_v7 = vld [vmem:[#allocation3 + $0x328] sm:$0xf0]  ;;  %v2257_v60 = vsel %vm666_vm0, %v2241_v12, %v2242_v40 }
 0x372   : > { %4261 = vmatpush.bf16.msrb.mxu1 %v5208_v50  ;;  %v4917_v31 = vld [vmem:[#allocation3 + $0x128] sm:$0xf0]  ;;  %v2664_v32 = vsel %vm666_vm0, %v2651_v48, %v2652_v17  ;;  %v5243_v48 = vld [vmem:[#allocation3 + $0x390] sm:$0xf]  ;;  %v2258_v25 = vsel %vm2245_vm4, %v7721_v20, %v2257_v60 }
 0x373   : > { %4291 = vmatpush.bf16.msrb.mxu0 %v5592_v8  ;;  %4247 = vmatpush.bf16.msrb.mxu3 %v4984_v45  ;;  %v4952_v8 = vor.u32 %v5701_v36, %v4949_v43  ;;  %v5757_v62 = vld [vmem:[#allocation3 + $0x30c] sm:$0xf]  ;;  %v2665_v45 = vsel %vm2660_vm9, %v7827_v53, %v2664_v32  ;;  %v8346_v43 = vrot.slane %v7615_v51, 4  ;;  %2275 = vst [vmem:[#allocation3 + $0x530] sm:$0xff] %v2258_v25  ;;  %v5770_v36 = vld [vmem:[#allocation3 + $0x36c] sm:$0xf0] }
 0x374   : > { %4280 = vmatmul.bf16.vlgmr.msrb.gmra.mxu2 %v7643_v18  ;;  %v5176_v42 = vor.u32 %v5757_v62, %v5173_v7  ;;  %v5693_v38 = vld [vmem:[#allocation3 + $0x10c] sm:$0xf]  ;;  %2686 = vst [vmem:[#allocation3 + $0x650] sm:$0xff] %v2665_v45 }
 0x375   : > { %v2249_v44 = vsel %vm666_vm0, %v8346_v43, %v2237_v56  ;;  %v4920_v6 = vor.u32 %v5693_v38, %v4917_v31  ;;  %v5141_v50 = vld [vmem:[#allocation3 + $0x2e8] sm:$0xf0] }
 0x376   : > { %v2250_v53 = vsel %vm2245_vm4, %v7615_v51, %v2249_v44  ;;  %4262 = vmatpush.bf16.msrb.mxu1 %v5176_v42  ;;  %v4885_v2 = vld [vmem:[#allocation3 + $0xe8] sm:$0xf0]  ;;  %v7994_v32 = vpop.permute.xlu1 %2718  ;;  %v7996_v51 = vpop.permute.xlu0 %2147  ;;  %v5762_v44 = vld [vmem:[#allocation3 + $0x32c] sm:$0xf0] }
 0x377   : > { %4292 = vmatpush.bf16.msrb.mxu0 %v5560_v63  ;;  %4248 = vmatpush.bf16.msrb.mxu3 %v4952_v8  ;;  %v5244_v63 = vor.u32 %v5778_v30, %v5243_v48  ;;  %v5749_v12 = vld [vmem:[#allocation3 + $0x2cc] sm:$0xf]  ;;  %2271 = vst [vmem:[#allocation3 + $0x510] sm:$0xff] %v2250_v53  ;;  %v5211_v8 = vld [vmem:[#allocation3 + $0x350] sm:$0xf]  ;;  %v2735_v45 = vrot.slane %v7994_v32, 4 }
 0x378   : > { %v5144_v7 = vor.u32 %v5749_v12, %v5141_v50  ;;  %v5685_v31 = vld [vmem:[#allocation3 + $0xcc] sm:$0xf]  ;;  %v5212_v30 = vor.u32 %v5770_v36, %v5211_v8  ;;  %v2159_v60 = vrot.slane %v7996_v51, 4 }
 0x379   : > { %v5109_v62 = vld [vmem:[#allocation3 + $0x2a8] sm:$0xf0]  ;;  %v4888_v42 = vor.u32 %v5685_v31, %v4885_v2  ;;  %v2747_v53 = vsel %vm666_vm0, %v2734_v9, %v2735_v45  ;;  %v602_v31 = vld [vmem:[#allocation2 + $0x10] sm:$0xff] }
 0x37a   : > { %4263 = vmatpush.bf16.msrb.mxu1 %v5144_v7  ;;  %v4853_v38 = vld [vmem:[#allocation3 + $0xa8] sm:$0xf0]  ;;  %610 = vst [vmem:[#allocation3 + $0x10] sm:$0xff] %v602_v31 }
 0x37b   : > { %4311 = vmatpush.bf16.msra.mxu0 %v5276_v35  ;;  %4249 = vmatpush.bf16.msrb.mxu3 %v4920_v6  ;;  %v7991_v35 = vpop.permute.xlu2 %1981  ;;  %v5741_v43 = vld [vmem:[#allocation3 + $0x28c] sm:$0xf] }
 0x37c   : > { %v8327_v20 = vrot.slane %v7991_v35, 4  ;;  %v5112_v6 = vor.u32 %v5741_v43, %v5109_v62  ;;  %v5677_v50 = vld [vmem:[#allocation3 + $0x8c] sm:$0xf] }
 0x37d   : > { %v4856_v12 = vor.u32 %v5677_v50, %v4853_v38  ;;  %v5077_v36 = vld [vmem:[#allocation3 + $0x268] sm:$0xf0] }
 0x37e   : > { %v2008_v48 = vsel %vm666_vm0, %v1992_v10, %v8327_v20  ;;  %v5179_v10 = vld [vmem:[#allocation3 + $0x310] sm:$0xf]  ;;  %5644 = vmatmul.msk.bf16.vlgmr.msrb.gmra.mxu0 %vm4086_vm12, %v7678_v13  ;;  %4264 = vmatpush.bf16.msrb.mxu1 %v5112_v6  ;;  %v4821_v8 = vld [vmem:[#allocation3 + $0x68] sm:$0xf0]  ;;  %v8028_v6 = vpop.permute.xlu0 %2054 }
 0x37f   : > { %4312 = vmatpush.bf16.msra.mxu0 %v5244_v63  ;;  %4250 = vmatpush.bf16.msrb.mxu3 %v4888_v42  ;;  %v2009_v25 = vsel %vm1996_vm8, %v7715_v39, %v2008_v48  ;;  %v8347_v63 = vrot.slane %v7641_v3, 4  ;;  %v2748_v39 = vsel %vm2743_vm7, %v7680_v58, %v2747_v53  ;;  %v5180_v9 = vor.u32 %v5762_v44, %v5179_v10  ;;  %v5733_v62 = vld [vmem:[#allocation3 + $0x24c] sm:$0xf]  ;;  %v5147_v48 = vld [vmem:[#allocation3 + $0x2d0] sm:$0xf]  ;;  %v8026_v44 = vpop.permute.xlu1 %2064 }
 0x380   : > { %2026 = vst [vmem:[#allocation3 + $0x470] sm:$0xff] %v2009_v25  ;;  %v5669_v42 = vld [vmem:[#allocation3 + $0x4c] sm:$0xf]  ;;  %v5080_v43 = vor.u32 %v5733_v62, %v5077_v36  ;;  %v5531_v10 = vld [vmem:[#allocation3 + $0x5d0] sm:$0xf]  ;;  %v2071_v36 = vrot.slane %v8028_v6, 4 }
 0x381   : > { %v2174_v2 = vsel %vm666_vm0, %v8347_v63, %v2159_v60  ;;  %2769 = vst [vmem:[#allocation3 + $0x690] sm:$0xff] %v2748_v39  ;;  %v606_v38 = vld [vmem:[#allocation2 + $0x38] sm:$0xff]  ;;  %v5850_v39 = vld [vmem:[#allocation3 + $0x5ec] sm:$0xf0] }
 0x382   : > { %v2175_v7 = vsel %vm2162_vm5, %v7641_v3, %v2174_v2  ;;  %v5045_v50 = vld [vmem:[#allocation3 + $0x228] sm:$0xf0]  ;;  %4265 = vmatpush.bf16.msrb.mxu1 %v5080_v43  ;;  %v4824_v2 = vor.u32 %v5669_v42, %v4821_v8  ;;  %614 = vst [vmem:[#allocation3 + $0x30] sm:$0xff] %v606_v38  ;;  %v5722_v8 = vld [vmem:[#allocation3 + $0x1ec] sm:$0xf0]  ;;  %v8348_v38 = vrot.slane %v7758_v41, 4 }
 0x383   : > { %4313 = vmatpush.bf16.msra.mxu0 %v5212_v30  ;;  %v5754_v30 = vld [vmem:[#allocation3 + $0x2ec] sm:$0xf0]  ;;  %2192 = vst [vmem:[#allocation3 + $0x4f0] sm:$0xff] %v2175_v7  ;;  %4251 = vmatpush.bf16.msrb.mxu3 %v4856_v12  ;;  %v8023_v25 = vpop.permute.xlu2 %1888  ;;  %v5661_v58 = vld [vmem:[#allocation3 + $0xc] sm:$0xf]  ;;  %v2076_v12 = vrot.slane %v8026_v44, 4 }
 0x384   : > { %v4789_v53 = vld [vmem:[#allocation3 + $0x28] sm:$0xf0]  ;;  %v8326_v3 = vrot.slane %v8023_v25, 4  ;;  %v5148_v63 = vor.u32 %v5754_v30, %v5147_v48  ;;  %v8349_v48 = vrot.slane %v7760_v11, 4 }
 0x385   : > { %v5725_v7 = vld [vmem:[#allocation3 + $0x20c] sm:$0xf]  ;;  %v4792_v30 = vor.u32 %v5661_v58, %v4789_v53  ;;  %v2091_v43 = vsel %vm666_vm0, %v8348_v38, %v2076_v12  ;;  %v5874_v58 = vld [vmem:[#allocation3 + $0x6ac] sm:$0xf0] }
 0x386   : > { %v1917_v31 = vsel %vm666_vm0, %v1904_v16, %v8326_v3  ;;  %v5048_v62 = vor.u32 %v5725_v7, %v5045_v50  ;;  %v2083_v16 = vsel %vm666_vm0, %v8349_v48, %v2071_v36  ;;  %v5019_v50 = vld [vmem:[#allocation3 + $0x1d0] sm:$0xf] }
 0x387   : > { %4314 = vmatpush.bf16.msra.mxu0 %v5180_v9  ;;  %v5746_v9 = vld [vmem:[#allocation3 + $0x2ac] sm:$0xf0]  ;;  %4252 = vmatpush.bf16.msrb.mxu3 %v4824_v2  ;;  %v1918_v42 = vsel %vm1913_vm10, %v7754_v57, %v1917_v31  ;;  %v5532_v2 = vor.u32 %v5850_v39, %v5531_v10  ;;  %v2092_v57 = vsel %vm2079_vm6, %v7758_v41, %v2091_v43 }
 0x388   : > { %1939 = vst [vmem:[#allocation3 + $0x410] sm:$0xff] %v1918_v42  ;;  %v2084_v53 = vsel %vm2079_vm6, %v7760_v11, %v2083_v16  ;;  %4266 = vmatpush.bf16.msrb.mxu1 %v5048_v62  ;;  %v5627_v31 = vld [vmem:[#allocation3 + $0x690] sm:$0xf]  ;;  %v5020_v3 = vor.u32 %v5722_v8, %v5019_v50  ;;  %v8053_v62 = vpop.permute.xlu1 %1971 }
 0x389   : > { %v5842_v38 = vld [vmem:[#allocation3 + $0x5ac] sm:$0xf0]  ;;  %2109 = vst [vmem:[#allocation3 + $0x4b0] sm:$0xff] %v2092_v57  ;;  %v5628_v20 = vor.u32 %v5874_v58, %v5627_v31 }
 0x38a   : > { %v5738_v48 = vld [vmem:[#allocation3 + $0x26c] sm:$0xf0]  ;;  %2105 = vst [vmem:[#allocation3 + $0x490] sm:$0xff] %v2084_v53  ;;  %v5846_v53 = vld [vmem:[#allocation3 + $0x5d4] sm:$0xf] }
 0x38b   : > { %4315 = vmatpush.bf16.msra.mxu0 %v5148_v63  ;;  %v5115_v63 = vld [vmem:[#allocation3 + $0x290] sm:$0xf]  ;;  %4253 = vmatpush.bf16.msrb.mxu3 %v4792_v30  ;;  %v2482_v42 = vpop.permute.xlu2 %2481 }
 0x38c   : > { %v5116_v7 = vor.u32 %v5746_v9, %v5115_v63  ;;  %4324 = vmatpush.bf16.msra.mxu1 %v5532_v2  ;;  %v5499_v10 = vld [vmem:[#allocation3 + $0x590] sm:$0xf]  ;;  %4342 = vmatpush.bf16.msra.mxu2 %v5628_v20  ;;  %v2492_v11 = vrot.slane %v2482_v42, 4  ;;  %v8055_v9 = vpop.permute.xlu0 %2645  ;;  %v1988_v2 = vrot.slane %v8053_v62, 4 }
 0x38d   : > { %v5714_v39 = vld [vmem:[#allocation3 + $0x1ac] sm:$0xf0]  ;;  %v5500_v43 = vor.u32 %v5842_v38, %v5499_v10  ;;  %4267 = vmatmul.bf16.vlgmr.msrb.gmra.mxu1 %v7723_v0  ;;  %v2657_v30 = vrot.slane %v8055_v9, 4 }
 0x38e   : > { %v5083_v41 = vld [vmem:[#allocation3 + $0x250] sm:$0xf]  ;;  %4254 = vmatmul.bf16.vlgmr.msrb.gmra.mxu3 %v7590_v34  ;;  %v2508_v58 = vsel %vm666_vm0, %v2491_v26, %v2492_v11  ;;  %v2000_v38 = vsel %vm666_vm0, %v1987_v61, %v1988_v2 }
 0x38f   : > { %4316 = vmatpush.bf16.msra.mxu0 %v5116_v7  ;;  %4298 = vmatpush.bf16.msra.mxu3 %v5020_v3  ;;  %v5084_v16 = vor.u32 %v5738_v48, %v5083_v41  ;;  %v4987_v63 = vld [vmem:[#allocation3 + $0x190] sm:$0xf]  ;;  %v5533_v7 = vld [vmem:[#allocation3 + $0x5f0] sm:$0xf0]  ;;  %v2509_v31 = vsel %vm2494_vm1, %v7893_v1, %v2508_v58  ;;  %v2672_v48 = vsel %vm666_vm0, %v2656_v15, %v2657_v30 }
 0x390   : > { %v5467_v8 = vld [vmem:[#allocation3 + $0x550] sm:$0xf]  ;;  %4325 = vmatpush.bf16.msra.mxu1 %v5500_v43  ;;  %v4988_v50 = vor.u32 %v5714_v39, %v4987_v63  ;;  %2525 = vst [vmem:[#allocation3 + $0x5f8] sm:$0xff] %v2509_v31  ;;  %v2001_v1 = vsel %vm1996_vm8, %v7791_v21, %v2000_v38  ;;  %v2673_v42 = vsel %vm2660_vm9, %v7825_v46, %v2672_v48  ;;  %v5501_v15 = vld [vmem:[#allocation3 + $0x5b0] sm:$0xf0] }
 0x391   : > { %v5730_v3 = vld [vmem:[#allocation3 + $0x22c] sm:$0xf0]  ;;  %2022 = vst [vmem:[#allocation3 + $0x450] sm:$0xff] %v2001_v1  ;;  %v5536_v11 = vor.u32 %v5846_v53, %v5533_v7 }
 0x392   : > { %v5706_v20 = vld [vmem:[#allocation3 + $0x16c] sm:$0xf0]  ;;  %2690 = vst [vmem:[#allocation3 + $0x670] sm:$0xff] %v2673_v42 }
 0x393   : > { %4317 = vmatpush.bf16.msra.mxu0 %v5084_v16  ;;  %v5834_v57 = vld [vmem:[#allocation3 + $0x56c] sm:$0xf0]  ;;  %4299 = vmatpush.bf16.msra.mxu3 %v4988_v50 }
 0x394   : > { %v5051_v26 = vld [vmem:[#allocation3 + $0x210] sm:$0xf]  ;;  %v5468_v10 = vor.u32 %v5834_v57, %v5467_v8  ;;  %v2306_v8 = vpop.permute.xlu2 %2305  ;;  %v8080_v57 = vpop.permute.xlu1 %2562 }
 0x395   : > { %v4955_v39 = vld [vmem:[#allocation3 + $0x150] sm:$0xf]  ;;  %v5052_v41 = vor.u32 %v5730_v3, %v5051_v26  ;;  %v2321_v21 = vrot.slane %v2306_v8, 4  ;;  %v8082_v46 = vpop.permute.xlu0 %2552  ;;  %v5838_v3 = vld [vmem:[#allocation3 + $0x594] sm:$0xf]  ;;  %v2574_v38 = vrot.slane %v8080_v57, 4 }
 0x396   : > { %v5435_v43 = vld [vmem:[#allocation3 + $0x510] sm:$0xf]  ;;  %4326 = vmatpush.bf16.msra.mxu1 %v5468_v10  ;;  %v4956_v16 = vor.u32 %v5706_v20, %v4955_v39  ;;  %v2569_v20 = vrot.slane %v8082_v46, 4  ;;  %v5504_v53 = vor.u32 %v5838_v3, %v5501_v15  ;;  %v5830_v39 = vld [vmem:[#allocation3 + $0x554] sm:$0xf] }
 0x397   : > { %v5826_v61 = vld [vmem:[#allocation3 + $0x52c] sm:$0xf0]  ;;  %4318 = vmatpush.bf16.msra.mxu0 %v5052_v41  ;;  %v2334_v26 = vsel %vm666_vm0, %v2320_v29, %v2321_v21  ;;  %v2589_v41 = vsel %vm666_vm0, %v2573_v24, %v2574_v38  ;;  %v5469_v29 = vld [vmem:[#allocation3 + $0x570] sm:$0xf0] }
 0x398   : > { %v5698_v63 = vld [vmem:[#allocation3 + $0x12c] sm:$0xf0]  ;;  %4300 = vmatpush.bf16.msra.mxu3 %v4956_v16  ;;  %v5436_v50 = vor.u32 %v5826_v61, %v5435_v43  ;;  %v2335_v42 = vsel %vm2328_vm3, %v7929_v59, %v2334_v26  ;;  %v2581_v43 = vsel %vm666_vm0, %v2568_v33, %v2569_v20  ;;  %v2590_v59 = vsel %vm2577_vm11, %v7787_v28, %v2589_v41  ;;  %v5822_v21 = vld [vmem:[#allocation3 + $0x514] sm:$0xf] }
 0x399   : > { %v5818_v58 = vld [vmem:[#allocation3 + $0x4ec] sm:$0xf0]  ;;  %2355 = vst [vmem:[#allocation3 + $0x558] sm:$0xff] %v2335_v42  ;;  %v5437_v3 = vld [vmem:[#allocation3 + $0x530] sm:$0xf0] }
 0x39a   : > { %v4923_v31 = vld [vmem:[#allocation3 + $0x110] sm:$0xf]  ;;  %4327 = vmatpush.bf16.msra.mxu1 %v5436_v50  ;;  %4319 = vmatmul.bf16.vlgmr.msra.gmra.mxu0 %v7723_v0  ;;  %2607 = vst [vmem:[#allocation3 + $0x630] sm:$0xff] %v2590_v59 }
 0x39b   : > { %4376 = vmatpush.bf16.msrb.mxu0 %v5536_v11  ;;  %v4924_v7 = vor.u32 %v5698_v63, %v4923_v31  ;;  %v5403_v48 = vld [vmem:[#allocation3 + $0x4d0] sm:$0xf]  ;;  %v2582_v11 = vsel %vm2577_vm11, %v7860_v52, %v2581_v43  ;;  %v5472_v63 = vor.u32 %v5830_v39, %v5469_v29 }
 0x39c   : > { %v5404_v10 = vor.u32 %v5818_v58, %v5403_v48  ;;  %v5690_v1 = vld [vmem:[#allocation3 + $0xec] sm:$0xf0]  ;;  %2603 = vst [vmem:[#allocation3 + $0x610] sm:$0xff] %v2582_v11  ;;  %v2233_v31 = vpop.permute.xlu2 %2232  ;;  %v2472_v52 = vpop.permute.xlu1 %2471 }
 0x39d   : > { %4301 = vmatpush.bf16.msra.mxu3 %v4924_v7  ;;  %v4891_v61 = vld [vmem:[#allocation3 + $0xd0] sm:$0xf]  ;;  %v2243_v7 = vrot.slane %v2233_v31, 4  ;;  %v8106_v48 = vpop.permute.xlu0 %1898 }
 0x39e   : > { %v5371_v16 = vld [vmem:[#allocation3 + $0x490] sm:$0xf]  ;;  %4328 = vmatpush.bf16.msra.mxu1 %v5404_v10  ;;  %v4892_v8 = vor.u32 %v5690_v1, %v4891_v61  ;;  %v2487_v10 = vrot.slane %v2472_v52, 4  ;;  %v1910_v39 = vrot.slane %v8106_v48, 4  ;;  %v5440_v1 = vor.u32 %v5822_v21, %v5437_v3  ;;  %v5405_v61 = vld [vmem:[#allocation3 + $0x4f0] sm:$0xf0] }
 0x39f   : > { %4377 = vmatpush.bf16.msrb.mxu0 %v5504_v53  ;;  %v5810_v15 = vld [vmem:[#allocation3 + $0x4ac] sm:$0xf0]  ;;  %v2259_v43 = vsel %vm666_vm0, %v2242_v40, %v2243_v7  ;;  %v5814_v40 = vld [vmem:[#allocation3 + $0x4d4] sm:$0xf] }
 0x3a0   : > { %v5682_v24 = vld [vmem:[#allocation3 + $0xac] sm:$0xf0]  ;;  %v5372_v28 = vor.u32 %v5810_v15, %v5371_v16  ;;  %v2260_v16 = vsel %vm2245_vm4, %v7964_v23, %v2259_v43  ;;  %v8350_v15 = vrot.slane %v7895_v54, 4  ;;  %v5408_v31 = vor.u32 %v5814_v40, %v5405_v61  ;;  %v5718_v7 = vld [vmem:[#allocation3 + $0x1d4] sm:$0xf] }
 0x3a1   : > { %v5595_v50 = vld [vmem:[#allocation3 + $0x650] sm:$0xf]  ;;  %4302 = vmatpush.bf16.msra.mxu3 %v4892_v8  ;;  %2276 = vst [vmem:[#allocation3 + $0x538] sm:$0xff] %v2260_v16  ;;  %v5277_v43 = vld [vmem:[#allocation3 + $0x3f0] sm:$0xf0] }
 0x3a2   : > { %v5866_v33 = vld [vmem:[#allocation3 + $0x66c] sm:$0xf0]  ;;  %4329 = vmatpush.bf16.msra.mxu1 %v5372_v28 }
 0x3a3   : > { %v5596_v58 = vor.u32 %v5866_v33, %v5595_v50  ;;  %4378 = vmatpush.bf16.msrb.mxu0 %v5472_v63  ;;  %v5339_v53 = vld [vmem:[#allocation3 + $0x450] sm:$0xf]  ;;  %v2500_v63 = vsel %vm666_vm0, %v8350_v15, %v2487_v10  ;;  %v5021_v50 = vld [vmem:[#allocation3 + $0x1f0] sm:$0xf0] }
 0x3a4   : > { %v4859_v26 = vld [vmem:[#allocation3 + $0x90] sm:$0xf]  ;;  %v5373_v10 = vld [vmem:[#allocation3 + $0x4b0] sm:$0xf0]  ;;  %v2399_v16 = vpop.permute.xlu1 %2398 }
 0x3a5   : > { %4343 = vmatpush.bf16.msra.mxu2 %v5596_v58  ;;  %v4860_v42 = vor.u32 %v5682_v24, %v4859_v26  ;;  %v5802_v41 = vld [vmem:[#allocation3 + $0x46c] sm:$0xf0]  ;;  %v8351_v24 = vrot.slane %v7862_v4, 4  ;;  %v2501_v58 = vsel %vm2494_vm1, %v7895_v54, %v2500_v63  ;;  %v5806_v26 = vld [vmem:[#allocation3 + $0x494] sm:$0xf]  ;;  %v2389_v15 = vpop.permute.xlu0 %2388 }
 0x3a6   : > { %v5340_v29 = vor.u32 %v5802_v41, %v5339_v53  ;;  %v4827_v59 = vld [vmem:[#allocation3 + $0x50] sm:$0xf]  ;;  %2521 = vst [vmem:[#allocation3 + $0x5d8] sm:$0xff] %v2501_v58  ;;  %v4989_v41 = vld [vmem:[#allocation3 + $0x1b0] sm:$0xf0]  ;;  %v2404_v61 = vrot.slane %v2389_v15, 4 }
 0x3a7   : > { %v5674_v11 = vld [vmem:[#allocation3 + $0x6c] sm:$0xf0]  ;;  %v1925_v8 = vsel %vm666_vm0, %v8351_v24, %v1910_v39  ;;  %4379 = vmatpush.bf16.msrb.mxu0 %v5440_v1  ;;  %4303 = vmatpush.bf16.msra.mxu3 %v4860_v42  ;;  %v2057_v1 = vpop.permute.xlu2 %2056  ;;  %v5024_v42 = vor.u32 %v5718_v7, %v5021_v50  ;;  %v5782_v63 = vld [vmem:[#allocation3 + $0x3d4] sm:$0xf] }
 0x3a8   : > { %v4795_v33 = vld [vmem:[#allocation3 + $0x10] sm:$0xf]  ;;  %v1926_v23 = vsel %vm1913_vm10, %v7862_v4, %v1925_v8  ;;  %4330 = vmatpush.bf16.msra.mxu1 %v5340_v29  ;;  %v4828_v28 = vor.u32 %v5674_v11, %v4827_v59  ;;  %v2072_v4 = vrot.slane %v2057_v1, 4  ;;  %v2409_v29 = vrot.slane %v2399_v16, 4  ;;  %v5710_v11 = vld [vmem:[#allocation3 + $0x194] sm:$0xf] }
 0x3a9   : > { %v5858_v21 = vld [vmem:[#allocation3 + $0x62c] sm:$0xf0]  ;;  %1943 = vst [vmem:[#allocation3 + $0x430] sm:$0xff] %v1926_v23  ;;  %v5376_v59 = vor.u32 %v5806_v26, %v5373_v10  ;;  %v4992_v8 = vor.u32 %v5710_v11, %v4989_v41  ;;  %v5280_v40 = vor.u32 %v5782_v63, %v5277_v43  ;;  %v5798_v50 = vld [vmem:[#allocation3 + $0x454] sm:$0xf]  ;;  %v8352_v23 = vrot.slane %v7821_v5, 4 }
 0x3aa   : > { %v5666_v3 = vld [vmem:[#allocation3 + $0x2c] sm:$0xf0]  ;;  %v2085_v24 = vsel %vm666_vm0, %v2071_v36, %v2072_v4  ;;  %v2425_v58 = vsel %vm666_vm0, %v2408_v27, %v2409_v29  ;;  %v5702_v7 = vld [vmem:[#allocation3 + $0x154] sm:$0xf]  ;;  %v603_v1 = vld [vmem:[#allocation2 + $0x18] sm:$0xff] }
 0x3ab   : > { %v5563_v53 = vld [vmem:[#allocation3 + $0x610] sm:$0xf]  ;;  %4380 = vmatpush.bf16.msrb.mxu0 %v5408_v31  ;;  %4304 = vmatpush.bf16.msra.mxu3 %v4828_v28  ;;  %v4796_v54 = vor.u32 %v5666_v3, %v4795_v33  ;;  %v2086_v33 = vsel %vm2079_vm6, %v8028_v6, %v2085_v24  ;;  %v4957_v3 = vld [vmem:[#allocation3 + $0x170] sm:$0xf0]  ;;  %v2426_v36 = vsel %vm2411_vm2, %v7931_v19, %v2425_v58 }
 0x3ac   : > { %v5564_v52 = vor.u32 %v5858_v21, %v5563_v53  ;;  %v2417_v21 = vsel %vm666_vm0, %v8352_v23, %v2404_v61  ;;  %v5774_v31 = vld [vmem:[#allocation3 + $0x394] sm:$0xf]  ;;  %2106 = vst [vmem:[#allocation3 + $0x498] sm:$0xff] %v2086_v33  ;;  %v5307_v26 = vld [vmem:[#allocation3 + $0x410] sm:$0xf]  ;;  %v4960_v4 = vor.u32 %v5702_v7, %v4957_v3 }
 0x3ad   : > { %v5245_v28 = vld [vmem:[#allocation3 + $0x3b0] sm:$0xf0]  ;;  %v2418_v6 = vsel %vm2411_vm2, %v7821_v5, %v2417_v21  ;;  %2442 = vst [vmem:[#allocation3 + $0x5b8] sm:$0xff] %v2426_v36 }
 0x3ae   : > { %4344 = vmatpush.bf16.msra.mxu2 %v5564_v52  ;;  %v5341_v53 = vld [vmem:[#allocation3 + $0x470] sm:$0xf0]  ;;  %2438 = vst [vmem:[#allocation3 + $0x598] sm:$0xff] %v2418_v6  ;;  %v5248_v19 = vor.u32 %v5774_v31, %v5245_v28 }
 0x3af   : > { %4381 = vmatpush.bf16.msrb.mxu0 %v5376_v59  ;;  %4305 = vmatpush.bf16.msra.mxu3 %v4796_v54  ;;  %v5870_v27 = vld [vmem:[#allocation3 + $0x694] sm:$0xf]  ;;  %v5344_v52 = vor.u32 %v5798_v50, %v5341_v53  ;;  %v2731_v43 = vpop.permute.xlu2 %2730  ;;  %611 = vst [vmem:[#allocation3 + $0x18] sm:$0xff] %v603_v1  ;;  %v2223_v59 = vpop.permute.xlu1 %2222  ;;  %v5723_v1 = vld [vmem:[#allocation3 + $0x1f4] sm:$0xf0] }
 0x3b0   : > { %v5794_v10 = vld [vmem:[#allocation3 + $0x42c] sm:$0xf0]  ;;  %v5629_v54 = vld [vmem:[#allocation3 + $0x6b0] sm:$0xf0]  ;;  %v2741_v61 = vrot.slane %v2731_v43, 4  ;;  %v2238_v24 = vrot.slane %v2223_v59, 4 }
 0x3b1   : > { %5645 = vmatmul.msk.bf16.vlgmr.msra.gmra.mxu2 %vm4086_vm12, %v7678_v13  ;;  %v5309_v41 = vld [vmem:[#allocation3 + $0x430] sm:$0xf0]  ;;  %v5632_v16 = vor.u32 %v5870_v27, %v5629_v54  ;;  %v8353_v27 = vrot.slane %v7856_v37, 4 }
 0x3b2   : > { %4350 = vmatpush.bf16.msrb.mxu2 %v5024_v42  ;;  %v5308_v42 = vor.u32 %v5794_v10, %v5307_v26  ;;  %4306 = vmatmul.bf16.vlgmr.msra.gmra.mxu3 %v7590_v34  ;;  %v607_v5 = vld [vmem:[#allocation2 + $0x40] sm:$0xff]  ;;  %v2757_v58 = vsel %vm666_vm0, %v2740_v14, %v2741_v61  ;;  %v2251_v36 = vsel %vm666_vm0, %v2237_v56, %v2238_v24 }
 0x3b3   : > { %4363 = vmatpush.bf16.msrb.mxu3 %v5280_v40  ;;  %4382 = vmatpush.bf16.msrb.mxu0 %v5344_v52  ;;  %v4925_v15 = vld [vmem:[#allocation3 + $0x130] sm:$0xf0]  ;;  %615 = vst [vmem:[#allocation3 + $0x38] sm:$0xff] %v607_v5  ;;  %v2758_v28 = vsel %vm2743_vm7, %v7923_v49, %v2757_v58  ;;  %v2252_v14 = vsel %vm2245_vm4, %v7966_v55, %v2251_v36  ;;  %v5027_v5 = vld [vmem:[#allocation3 + $0x1d8] sm:$0xf] }
 0x3b4   : > { %v5213_v29 = vld [vmem:[#allocation3 + $0x370] sm:$0xf0]  ;;  %4331 = vmatpush.bf16.msra.mxu1 %v5308_v42  ;;  %2774 = vst [vmem:[#allocation3 + $0x6b8] sm:$0xff] %v2758_v28 }
 0x3b5   : > { %v5790_v11 = vld [vmem:[#allocation3 + $0x414] sm:$0xf]  ;;  %2272 = vst [vmem:[#allocation3 + $0x518] sm:$0xff] %v2252_v14 }
 0x3b6   : > { %4351 = vmatpush.bf16.msrb.mxu2 %v4992_v8  ;;  %v5597_v63 = vld [vmem:[#allocation3 + $0x670] sm:$0xf0]  ;;  %v2316_v8 = vpop.permute.xlu0 %2315  ;;  %v5312_v40 = vor.u32 %v5790_v11, %v5309_v41  ;;  %v5715_v11 = vld [vmem:[#allocation3 + $0x1b4] sm:$0xf0] }
 0x3b7   : > { %4364 = vmatpush.bf16.msrb.mxu3 %v5248_v19  ;;  %v5694_v50 = vld [vmem:[#allocation3 + $0x114] sm:$0xf]  ;;  %v2326_v23 = vrot.slane %v2316_v8, 4  ;;  %4332 = vmatmul.bf16.vlgmr.msra.gmra.mxu1 %v7643_v18  ;;  %v2638_v55 = vpop.permute.xlu2 %2637 }
 0x3b8   : > { %4394 = vmatpush.bf16.msrb.mxu1 %v5632_v16  ;;  %v5766_v33 = vld [vmem:[#allocation3 + $0x354] sm:$0xf]  ;;  %v4928_v21 = vor.u32 %v5694_v50, %v4925_v15  ;;  %4383 = vmatpush.bf16.msrb.mxu0 %v5312_v40  ;;  %v2150_v16 = vpop.permute.xlu1 %2149  ;;  %v5028_v15 = vor.u32 %v5723_v1, %v5027_v5 }
 0x3b9   : > { %v5216_v3 = vor.u32 %v5766_v33, %v5213_v29  ;;  %v5862_v31 = vld [vmem:[#allocation3 + $0x654] sm:$0xf]  ;;  %v2342_v52 = vsel %vm666_vm0, %v8353_v27, %v2326_v23  ;;  %v4995_v23 = vld [vmem:[#allocation3 + $0x198] sm:$0xf]  ;;  %v8176_v27 = vpop.f32.mrf.mxu3 }
 0x3ba   : > { %4352 = vmatpush.bf16.msrb.mxu2 %v4960_v4  ;;  %v5600_v6 = vor.u32 %v5862_v31, %v5597_v63  ;;  %v4893_v53 = vld [vmem:[#allocation3 + $0xf0] sm:$0xf0]  ;;  %v2343_v56 = vsel %vm2328_vm3, %v7856_v37, %v2342_v52  ;;  %v2653_v4 = vrot.slane %v2638_v55, 4  ;;  %v2160_v37 = vrot.slane %v2150_v16, 4 }
 0x3bb   : > { %v5181_v7 = vld [vmem:[#allocation3 + $0x330] sm:$0xf0]  ;;  %4365 = vmatpush.bf16.msrb.mxu3 %v5216_v3  ;;  %2359 = vst [vmem:[#allocation3 + $0x578] sm:$0xff] %v2343_v56  ;;  %4384 = vmatmul.bf16.vlgmr.msrb.gmra.mxu0 %v7643_v18  ;;  %v4996_v28 = vor.u32 %v5715_v11, %v4995_v23  ;;  %v5779_v23 = vld [vmem:[#allocation3 + $0x3b4] sm:$0xf0] }
 0x3bc   : > { %v5854_v49 = vld [vmem:[#allocation3 + $0x614] sm:$0xf]  ;;  %4395 = vmatpush.bf16.msrb.mxu1 %v5600_v6  ;;  %v2666_v63 = vsel %vm666_vm0, %v2652_v17, %v2653_v4  ;;  %v2176_v33 = vsel %vm666_vm0, %v2159_v60, %v2160_v37  ;;  %v8354_v17 = vrot.slane %v7889_v22, 4  ;;  %v8180_v4 = vpop.f32.mrf.mxu2  ;;  %v4931_v37 = vld [vmem:[#allocation3 + $0x118] sm:$0xf] }
 0x3bd   : > { %v5565_v26 = vld [vmem:[#allocation3 + $0x630] sm:$0xf0]  ;;  %v2667_v50 = vsel %vm2660_vm9, %v7961_v47, %v2666_v63  ;;  %v2177_v3 = vsel %vm2162_vm5, %v7996_v51, %v2176_v33  ;;  %v5539_v33 = vld [vmem:[#allocation3 + $0x5d8] sm:$0xf] }
 0x3be   : > { %4353 = vmatpush.bf16.msrb.mxu2 %v4928_v21  ;;  %v5758_v10 = vld [vmem:[#allocation3 + $0x314] sm:$0xf]  ;;  %v5568_v41 = vor.u32 %v5854_v49, %v5565_v26  ;;  %v2140_v61 = vpop.permute.xlu0 %2139  ;;  %2687 = vst [vmem:[#allocation3 + $0x658] sm:$0xff] %v2667_v50  ;;  %v4963_v26 = vld [vmem:[#allocation3 + $0x158] sm:$0xf] }
 0x3bf   : > { %v5686_v42 = vld [vmem:[#allocation3 + $0xd4] sm:$0xf]  ;;  %v5184_v54 = vor.u32 %v5758_v10, %v5181_v7  ;;  %v2155_v24 = vrot.slane %v2140_v61, 4  ;;  %2193 = vst [vmem:[#allocation3 + $0x4f8] sm:$0xff] %v2177_v3  ;;  %v1901_v52 = vpop.permute.xlu2 %1900  ;;  %v8178_v10 = vpop.f32.mrf.mxu0  ;;  %v5691_v50 = vld [vmem:[#allocation3 + $0xf4] sm:$0xf0] }
 0x3c0   : > { %v4896_v19 = vor.u32 %v5686_v42, %v4893_v53  ;;  %v5149_v43 = vld [vmem:[#allocation3 + $0x2f0] sm:$0xf0]  ;;  %4396 = vmatpush.bf16.msrb.mxu1 %v5568_v41  ;;  %v5707_v53 = vld [vmem:[#allocation3 + $0x174] sm:$0xf0]  ;;  %v1911_v1 = vrot.slane %v1901_v52, 4  ;;  %v2721_v42 = vpop.permute.xlu1 %2720  ;;  %v8185_v61 = vpop.f32.mrf.mxu1 }
 0x3c1   : > { %4366 = vmatpush.bf16.msrb.mxu3 %v5184_v54  ;;  %v4861_v29 = vld [vmem:[#allocation3 + $0xb0] sm:$0xf0]  ;;  %v2168_v31 = vsel %vm666_vm0, %v8354_v17, %v2155_v24  ;;  %v5699_v54 = vld [vmem:[#allocation3 + $0x134] sm:$0xf0]  ;;  %v2736_v55 = vrot.slane %v2721_v42, 4  ;;  %v4140_v3 = vpop.f32.mrf.mxu3 }
 0x3c2   : > { %4354 = vmatpush.bf16.msrb.mxu2 %v4896_v19  ;;  %v5750_v59 = vld [vmem:[#allocation3 + $0x2d4] sm:$0xf]  ;;  %v2169_v47 = vsel %vm2162_vm5, %v7889_v22, %v2168_v31  ;;  %v4964_v22 = vor.u32 %v5707_v53, %v4963_v26  ;;  %v1927_v16 = vsel %vm666_vm0, %v1910_v39, %v1911_v1  ;;  %v4932_v63 = vor.u32 %v5699_v54, %v4931_v37  ;;  %v5283_v24 = vld [vmem:[#allocation3 + $0x3d8] sm:$0xf]  ;;  %v5285_v3 = vld [vmem:[#allocation3 + $0x3f8] sm:$0xf0] }
 0x3c3   : > { %v5678_v8 = vld [vmem:[#allocation3 + $0x94] sm:$0xf]  ;;  %v5152_v40 = vor.u32 %v5750_v59, %v5149_v43  ;;  %2189 = vst [vmem:[#allocation3 + $0x4d8] sm:$0xff] %v2169_v47  ;;  %v5787_v43 = vld [vmem:[#allocation3 + $0x3f4] sm:$0xf0]  ;;  %v1928_v59 = vsel %vm1913_vm10, %v8106_v48, %v1927_v16  ;;  %v2749_v11 = vsel %vm666_vm0, %v2735_v45, %v2736_v55 }
 0x3c4   : > { %4402 = vmatpush.bf16.msra.mxu1 %v5028_v15  ;;  %v4864_v58 = vor.u32 %v5678_v8, %v4861_v29  ;;  %v5117_v21 = vld [vmem:[#allocation3 + $0x2b0] sm:$0xf0]  ;;  %1944 = vst [vmem:[#allocation3 + $0x438] sm:$0xff] %v1928_v59  ;;  %v2750_v39 = vsel %vm2743_vm7, %v7994_v32, %v2749_v11  ;;  %v5284_v48 = vor.u32 %v5787_v43, %v5283_v24  ;;  %v5851_v32 = vld [vmem:[#allocation3 + $0x5f4] sm:$0xf0]  ;;  %v4127_v52 = vpop.f32.mrf.mxu2 }
 0x3c5   : > { %4367 = vmatpush.bf16.msrb.mxu3 %v5152_v40  ;;  %v5670_v36 = vld [vmem:[#allocation3 + $0x54] sm:$0xf]  ;;  %2770 = vst [vmem:[#allocation3 + $0x698] sm:$0xff] %v2750_v39  ;;  %v4899_v17 = vld [vmem:[#allocation3 + $0xd8] sm:$0xf]  ;;  %v4113_v52 = vadd.f32 %v8185_v61, %v8178_v10 }
 0x3c6   : > { %v4829_v6 = vld [vmem:[#allocation3 + $0x70] sm:$0xf0]  ;;  %4355 = vmatpush.bf16.msrb.mxu2 %v4864_v58  ;;  %v2067_v19 = vpop.permute.xlu0 %2066  ;;  %v5251_v31 = vld [vmem:[#allocation3 + $0x398] sm:$0xf] }
 0x3c7   : > { %v5742_v60 = vld [vmem:[#allocation3 + $0x294] sm:$0xf]  ;;  %v4832_v49 = vor.u32 %v5670_v36, %v4829_v6  ;;  %v2077_v15 = vrot.slane %v2067_v19, 4  ;;  %5646 = vmatmul.msk.bf16.vlgmr.msrb.gmra.mxu1 %vm4086_vm12, %v7678_v13  ;;  %v4900_v6 = vor.u32 %v5691_v50, %v4899_v17  ;;  %v5252_v47 = vor.u32 %v5779_v23, %v5251_v31  ;;  %v5843_v53 = vld [vmem:[#allocation3 + $0x5b4] sm:$0xf0] }
 0x3c8   : > { %4403 = vmatpush.bf16.msra.mxu1 %v4996_v28  ;;  %v5120_v7 = vor.u32 %v5742_v60, %v5117_v21  ;;  %v5662_v14 = vld [vmem:[#allocation3 + $0x14] sm:$0xf]  ;;  %v4101_v28 = vpop.f32.mrf.mxu0  ;;  %v1984_v36 = vpop.permute.xlu1 %1983  ;;  %v5507_v60 = vld [vmem:[#allocation3 + $0x598] sm:$0xf]  ;;  %v8356_v17 = vrot.slane %v8023_v25, 4 }
 0x3c9   : > { %v4797_v51 = vld [vmem:[#allocation3 + $0x30] sm:$0xf0]  ;;  %v2093_v40 = vsel %vm666_vm0, %v2076_v12, %v2077_v15  ;;  %v5540_v12 = vor.u32 %v5851_v32, %v5539_v33  ;;  %v4114_v26 = vpop.f32.mrf.mxu1  ;;  %v4867_v42 = vld [vmem:[#allocation3 + $0x98] sm:$0xf]  ;;  %v5508_v54 = vor.u32 %v5843_v53, %v5507_v60  ;;  %v5783_v60 = vld [vmem:[#allocation3 + $0x3dc] sm:$0xf] }
 0x3ca   : > { %v5085_v56 = vld [vmem:[#allocation3 + $0x270] sm:$0xf0]  ;;  %4368 = vmatpush.bf16.msrb.mxu3 %v5120_v7  ;;  %4356 = vmatpush.bf16.msrb.mxu2 %v4832_v49  ;;  %v4800_v41 = vor.u32 %v5662_v14, %v4797_v51  ;;  %v2094_v45 = vsel %vm2079_vm6, %v8026_v44, %v2093_v40  ;;  %v1994_v44 = vrot.slane %v1984_v36, 4  ;;  %v5683_v14 = vld [vmem:[#allocation3 + $0xb4] sm:$0xf0] }
 0x3cb   : > { %v5734_v5 = vld [vmem:[#allocation3 + $0x254] sm:$0xf]  ;;  %2110 = vst [vmem:[#allocation3 + $0x4b8] sm:$0xff] %v2094_v45  ;;  %v5771_v51 = vld [vmem:[#allocation3 + $0x374] sm:$0xf0] }
 0x3cc   : > { %4404 = vmatpush.bf16.msra.mxu1 %v4964_v22  ;;  %v5088_v29 = vor.u32 %v5734_v5, %v5085_v56  ;;  %v5053_v8 = vld [vmem:[#allocation3 + $0x230] sm:$0xf0]  ;;  %v8355_v56 = vrot.slane %v7991_v35, 4  ;;  %v5219_v22 = vld [vmem:[#allocation3 + $0x358] sm:$0xf] }
 0x3cd   : > { %v5726_v58 = vld [vmem:[#allocation3 + $0x214] sm:$0xf]  ;;  %v5220_v5 = vor.u32 %v5771_v51, %v5219_v22  ;;  %v5635_v43 = vld [vmem:[#allocation3 + $0x698] sm:$0xf] }
 0x3ce   : > { %4369 = vmatpush.bf16.msrb.mxu3 %v5088_v29  ;;  %4357 = vmatpush.bf16.msrb.mxu2 %v4800_v41  ;;  %v5056_v21 = vor.u32 %v5726_v58, %v5053_v8  ;;  %v1974_v7 = vpop.permute.xlu0 %1973  ;;  %v2010_v1 = vsel %vm666_vm0, %v8355_v56, %v1994_v44  ;;  %v4868_v41 = vor.u32 %v5683_v14, %v4867_v42  ;;  %v5875_v16 = vld [vmem:[#allocation3 + $0x6b4] sm:$0xf0] }
 0x3cf   : > { %v1989_v49 = vrot.slane %v1974_v7, 4  ;;  %v2011_v55 = vsel %vm1996_vm8, %v7991_v35, %v2010_v1  ;;  %v5835_v15 = vld [vmem:[#allocation3 + $0x574] sm:$0xf0]  ;;  %v5636_v37 = vor.u32 %v5875_v16, %v5635_v43  ;;  %v5288_v14 = vor.u32 %v5783_v60, %v5285_v3  ;;  %v5775_v1 = vld [vmem:[#allocation3 + $0x39c] sm:$0xf] }
 0x3d0   : > { %4405 = vmatpush.bf16.msra.mxu1 %v4932_v63  ;;  %2027 = vst [vmem:[#allocation3 + $0x478] sm:$0xff] %v2011_v55  ;;  %v5675_v59 = vld [vmem:[#allocation3 + $0x74] sm:$0xf0]  ;;  %v1891_v40 = vpop.permute.xlu1 %1890 }
 0x3d1   : > { %4358 = vmatmul.bf16.vlgmr.msrb.gmra.mxu2 %v7590_v34  ;;  %v2002_v19 = vsel %vm666_vm0, %v1988_v2, %v1989_v49  ;;  %v5763_v11 = vld [vmem:[#allocation3 + $0x334] sm:$0xf0]  ;;  %4446 = vmatpush.bf16.msra.mxu0 %v5636_v37  ;;  %v1906_v45 = vrot.slane %v1891_v40, 4  ;;  %v4177_v40 = vpop.f32.mrf.mxu1 }
 0x3d2   : > { %4415 = vmatpush.bf16.msra.mxu2 %v5284_v48  ;;  %4370 = vmatpush.bf16.msrb.mxu3 %v5056_v21  ;;  %v2003_v29 = vsel %vm1996_vm8, %v8053_v62, %v2002_v19  ;;  %v4835_v35 = vld [vmem:[#allocation3 + $0x58] sm:$0xf]  ;;  %v4126_v19 = vadd.f32 %v8180_v4, %v4113_v52  ;;  %v4151_v4 = vpop.f32.mrf.mxu3 }
 0x3d3   : > { %2023 = vst [vmem:[#allocation3 + $0x458] sm:$0xff] %v2003_v29  ;;  %v5475_v63 = vld [vmem:[#allocation3 + $0x558] sm:$0xf]  ;;  %v4836_v48 = vor.u32 %v5675_v59, %v4835_v35  ;;  %v1919_v31 = vsel %vm666_vm0, %v8356_v17, %v1906_v45 }
 0x3d4   : > { %4406 = vmatpush.bf16.msra.mxu1 %v4900_v6  ;;  %v5187_v2 = vld [vmem:[#allocation3 + $0x318] sm:$0xf]  ;;  %v5476_v24 = vor.u32 %v5835_v15, %v5475_v63  ;;  %v1920_v36 = vsel %vm1913_vm10, %v8023_v25, %v1919_v31  ;;  %v5253_v25 = vld [vmem:[#allocation3 + $0x3b8] sm:$0xf0] }
 0x3d5   : > { %4371 = vmatmul.bf16.vlgmr.msrb.gmra.mxu3 %v7723_v0  ;;  %v4803_v8 = vld [vmem:[#allocation3 + $0x18] sm:$0xf]  ;;  %v5188_v50 = vor.u32 %v5763_v11, %v5187_v2  ;;  %1940 = vst [vmem:[#allocation3 + $0x418] sm:$0xff] %v1920_v36  ;;  %v5767_v15 = vld [vmem:[#allocation3 + $0x35c] sm:$0xf] }
 0x3d6   : > { %4428 = vmatpush.bf16.msra.mxu3 %v5540_v12  ;;  %4416 = vmatpush.bf16.msra.mxu2 %v5252_v47  ;;  %v5667_v39 = vld [vmem:[#allocation3 + $0x34] sm:$0xf0]  ;;  %v2648_v62 = vpop.permute.xlu0 %2647 }
 0x3d7   : > { %v5443_v33 = vld [vmem:[#allocation3 + $0x518] sm:$0xf]  ;;  %v2658_v23 = vrot.slane %v2648_v62, 4  ;;  %v4804_v21 = vor.u32 %v5667_v39, %v4803_v8  ;;  %v4139_v39 = vadd.f32 %v8176_v27, %v4126_v19  ;;  %v4190_v62 = vpop.f32.mrf.mxu2  ;;  %v5125_v19 = vld [vmem:[#allocation3 + $0x2b8] sm:$0xf0] }
 0x3d8   : > { %4407 = vmatpush.bf16.msra.mxu1 %v4868_v41  ;;  %v5755_v58 = vld [vmem:[#allocation3 + $0x2f4] sm:$0xf0]  ;;  %v2565_v26 = vpop.permute.xlu1 %2564  ;;  %v5221_v41 = vld [vmem:[#allocation3 + $0x378] sm:$0xf0] }
 0x3d9   : > { %v5827_v32 = vld [vmem:[#allocation3 + $0x534] sm:$0xf0]  ;;  %v2674_v6 = vsel %vm666_vm0, %v2657_v30, %v2658_v23  ;;  %v2575_v22 = vrot.slane %v2565_v26, 4  ;;  %v5224_v2 = vor.u32 %v5767_v15, %v5221_v41 }
 0x3da   : > { %4429 = vmatpush.bf16.msra.mxu3 %v5508_v54  ;;  %4417 = vmatpush.bf16.msra.mxu2 %v5220_v5  ;;  %v5155_v12 = vld [vmem:[#allocation3 + $0x2d8] sm:$0xf]  ;;  %v5444_v28 = vor.u32 %v5827_v32, %v5443_v33  ;;  %v2675_v7 = vsel %vm2660_vm9, %v8055_v9, %v2674_v6  ;;  %v5256_v54 = vor.u32 %v5775_v1, %v5253_v25  ;;  %v5839_v6 = vld [vmem:[#allocation3 + $0x59c] sm:$0xf] }
 0x3db   : > { %v5156_v47 = vor.u32 %v5755_v58, %v5155_v12  ;;  %v5411_v53 = vld [vmem:[#allocation3 + $0x4d8] sm:$0xf]  ;;  %2691 = vst [vmem:[#allocation3 + $0x678] sm:$0xff] %v2675_v7  ;;  %v2591_v5 = vsel %vm666_vm0, %v2574_v38, %v2575_v22  ;;  %v4164_v58 = vpop.f32.mrf.mxu0  ;;  %v5157_v12 = vld [vmem:[#allocation3 + $0x2f8] sm:$0xf0] }
 0x3dc   : > { %4408 = vmatpush.bf16.msra.mxu1 %v4836_v48  ;;  %v5819_v44 = vld [vmem:[#allocation3 + $0x4f4] sm:$0xf0]  ;;  %v2592_v37 = vsel %vm2577_vm11, %v8080_v57, %v2591_v5  ;;  %v5847_v48 = vld [vmem:[#allocation3 + $0x5dc] sm:$0xf]  ;;  %v4165_v32 = vadd.f32 %v4164_v58, %v4151_v4 }
 0x3dd   : > { %v5747_v51 = vld [vmem:[#allocation3 + $0x2b4] sm:$0xf0]  ;;  %v5412_v49 = vor.u32 %v5819_v44, %v5411_v53  ;;  %2608 = vst [vmem:[#allocation3 + $0x638] sm:$0xff] %v2592_v37  ;;  %v5637_v44 = vld [vmem:[#allocation3 + $0x6b8] sm:$0xf0] }
 0x3de   : > { %4430 = vmatpush.bf16.msra.mxu3 %v5476_v24  ;;  %4418 = vmatpush.bf16.msra.mxu2 %v5188_v50  ;;  %v5123_v30 = vld [vmem:[#allocation3 + $0x298] sm:$0xf]  ;;  %v2555_v9 = vpop.permute.xlu0 %2554  ;;  %v8243_v50 = vpop.permute.xlu2 %4509  ;;  %v4178_v60 = vadd.f32 %v4177_v40, %v4165_v32  ;;  %v5029_v7 = vld [vmem:[#allocation3 + $0x1f8] sm:$0xf0] }
 0x3df   : > { %v5124_v56 = vor.u32 %v5747_v51, %v5123_v30  ;;  %v5811_v42 = vld [vmem:[#allocation3 + $0x4b4] sm:$0xf0]  ;;  %v2570_v10 = vrot.slane %v2555_v9, 4  ;;  %v4512_v31 = vmul.f32 %v8243_v50, %v4139_v39  ;;  %v5751_v51 = vld [vmem:[#allocation3 + $0x2dc] sm:$0xf]  ;;  %v4179_v9 = vpop.f32.mrf.mxu1 }
 0x3e0   : > { %4409 = vmatpush.bf16.msra.mxu1 %v4804_v21  ;;  %v5739_v55 = vld [vmem:[#allocation3 + $0x274] sm:$0xf0]  ;;  %v5541_v21 = vld [vmem:[#allocation3 + $0x5f8] sm:$0xf0]  ;;  %v5160_v26 = vor.u32 %v5751_v51, %v5157_v12 }
 0x3e1   : > { %v5379_v61 = vld [vmem:[#allocation3 + $0x498] sm:$0xf]  ;;  %v2583_v59 = vsel %vm666_vm0, %v2569_v20, %v2570_v10  ;;  %v5189_v20 = vld [vmem:[#allocation3 + $0x338] sm:$0xf0]  ;;  %v5544_v17 = vor.u32 %v5847_v48, %v5541_v21 }
 0x3e2   : > { %4431 = vmatpush.bf16.msra.mxu3 %v5444_v28  ;;  %4419 = vmatpush.bf16.msra.mxu2 %v5156_v47  ;;  %v5091_v43 = vld [vmem:[#allocation3 + $0x258] sm:$0xf]  ;;  %v5380_v16 = vor.u32 %v5811_v42, %v5379_v61  ;;  %v2584_v38 = vsel %vm2577_vm11, %v8082_v46, %v2583_v59  ;;  %v5759_v46 = vld [vmem:[#allocation3 + $0x31c] sm:$0xf] }
 0x3e3   : > { %4410 = vmatmul.bf16.vlgmr.msra.gmra.mxu1 %v7590_v34  ;;  %v5731_v29 = vld [vmem:[#allocation3 + $0x234] sm:$0xf0]  ;;  %v5092_v11 = vor.u32 %v5739_v55, %v5091_v43  ;;  %2604 = vst [vmem:[#allocation3 + $0x618] sm:$0xff] %v2584_v38  ;;  %v5192_v3 = vor.u32 %v5759_v46, %v5189_v20  ;;  %v5871_v28 = vld [vmem:[#allocation3 + $0x69c] sm:$0xf]  ;;  %v4166_v15 = vpop.f32.mrf.mxu0 }
 0x3e4   : > { %4467 = vmatpush.bf16.msrb.mxu1 %v5288_v14  ;;  %v5347_v35 = vld [vmem:[#allocation3 + $0x458] sm:$0xf]  ;;  %v5509_v47 = vld [vmem:[#allocation3 + $0x5b8] sm:$0xf0]  ;;  %v4153_v14 = vpop.f32.mrf.mxu3  ;;  %v5640_v52 = vor.u32 %v5871_v28, %v5637_v44 }
 0x3e5   : > { %v5803_v63 = vld [vmem:[#allocation3 + $0x474] sm:$0xf0]  ;;  %v5605_v22 = vld [vmem:[#allocation3 + $0x678] sm:$0xf0] }
 0x3e6   : > { %4432 = vmatpush.bf16.msra.mxu3 %v5412_v49  ;;  %4420 = vmatpush.bf16.msra.mxu2 %v5124_v56  ;;  %v5603_v24 = vld [vmem:[#allocation3 + $0x658] sm:$0xf]  ;;  %v5348_v45 = vor.u32 %v5803_v63, %v5347_v35  ;;  %v8252_v25 = vpop.permute.xlu0 %4523  ;;  %v4191_v49 = vadd.f32 %v4190_v62, %v4178_v60  ;;  %v5512_v56 = vor.u32 %v5839_v6, %v5509_v47  ;;  %v5719_v55 = vld [vmem:[#allocation3 + $0x1dc] sm:$0xf] }
 0x3e7   : > { %v5867_v8 = vld [vmem:[#allocation3 + $0x674] sm:$0xf0]  ;;  %v4526_v1 = vadd.f32 %v8252_v25, %v4512_v31  ;;  %v5477_v10 = vld [vmem:[#allocation3 + $0x578] sm:$0xf0]  ;;  %v5032_v5 = vor.u32 %v5719_v55, %v5029_v7  ;;  %v4242_v44 = vpop.f32.mrf.mxu1 }
 0x3e8   : > { %4468 = vmatpush.bf16.msrb.mxu1 %v5256_v54  ;;  %v5604_v57 = vor.u32 %v5867_v8, %v5603_v24  ;;  %v5059_v33 = vld [vmem:[#allocation3 + $0x218] sm:$0xf]  ;;  %v4513_v61 = vmul.f32 %v8243_v50, %v4191_v49  ;;  %v5863_v43 = vld [vmem:[#allocation3 + $0x65c] sm:$0xf] }
 0x3e9   : > { %v5060_v23 = vor.u32 %v5731_v29, %v5059_v33  ;;  %v5315_v27 = vld [vmem:[#allocation3 + $0x418] sm:$0xf]  ;;  %vm4534_vm0 = vcmp.gt.f32.partialorder %v4526_v1, 0.0  ;;  %v4542_v41 = vmul.f32 0.01, %v4526_v1  ;;  %v5608_v37 = vor.u32 %v5863_v43, %v5605_v22 }
 0x3ea   : > { %4433 = vmatpush.bf16.msra.mxu3 %v5380_v16  ;;  %4421 = vmatpush.bf16.msra.mxu2 %v5092_v11  ;;  %v5795_v36 = vld [vmem:[#allocation3 + $0x434] sm:$0xf0]  ;;  %v4192_v16 = vpop.f32.mrf.mxu2  ;;  %v5743_v29 = vld [vmem:[#allocation3 + $0x29c] sm:$0xf]  ;;  %v4527_v35 = vadd.f32 %v8252_v25, %v4513_v61 }
 0x3eb   : > { %4447 = vmatpush.bf16.msra.mxu0 %v5604_v57  ;;  %v5316_v53 = vor.u32 %v5795_v36, %v5315_v27  ;;  %v5859_v30 = vld [vmem:[#allocation3 + $0x634] sm:$0xf0]  ;;  %v5831_v4 = vld [vmem:[#allocation3 + $0x55c] sm:$0xf]  ;;  %v4550_v63 = vsel %vm4534_vm0, %v4526_v1, %v4542_v41  ;;  %v5128_v38 = vor.u32 %v5743_v29, %v5125_v19  ;;  %v4229_v36 = vpop.f32.mrf.mxu0 }
 0x3ec   : > { %4469 = vmatpush.bf16.msrb.mxu1 %v5224_v2  ;;  %v5571_v42 = vld [vmem:[#allocation3 + $0x618] sm:$0xf]  ;;  %v5711_v59 = vld [vmem:[#allocation3 + $0x19c] sm:$0xf]  ;;  %v5480_v2 = vor.u32 %v5831_v4, %v5477_v10  ;;  %4558 = vst [vmem:[%s8260_s8] sm:$0xff] %v4550_v63  ;;  %vm4535_vm13 = vcmp.gt.f32.partialorder %v4527_v35, 0.0 }
 0x3ed   : > { %v5572_v54 = vor.u32 %v5859_v30, %v5571_v42  ;;  %v4997_v11 = vld [vmem:[#allocation3 + $0x1b8] sm:$0xf0]  ;;  %v4543_v57 = vmul.f32 0.01, %v4527_v35 }
 0x3ee   : > { %4434 = vmatpush.bf16.msra.mxu3 %v5348_v45  ;;  %4422 = vmatpush.bf16.msra.mxu2 %v5060_v23  ;;  %v5093_v24 = vld [vmem:[#allocation3 + $0x278] sm:$0xf0]  ;;  %v5000_v20 = vor.u32 %v5711_v59, %v4997_v11 }
 0x3ef   : > { %4448 = vmatpush.bf16.msra.mxu0 %v5572_v54  ;;  %v5855_v8 = vld [vmem:[#allocation3 + $0x61c] sm:$0xf]  ;;  %v4551_v62 = vsel %vm4535_vm13, %v4527_v35, %v4543_v57  ;;  %v4244_v41 = vpop.f32.mrf.mxu1 }
 0x3f0   : > { %4470 = vmatpush.bf16.msrb.mxu1 %v5192_v3  ;;  %v5573_v39 = vld [vmem:[#allocation3 + $0x638] sm:$0xf0]  ;;  %4559 = vst [vmem:[%s8260_s8 + $0x8] sm:$0xff] %v4551_v62 }
 0x3f1   : > { %4423 = vmatmul.bf16.vlgmr.msra.gmra.mxu2 %v7723_v0  ;;  %v5823_v40 = vld [vmem:[#allocation3 + $0x51c] sm:$0xf]  ;;  %v5576_v45 = vor.u32 %v5855_v8, %v5573_v39  ;;  %v4203_v1 = vpop.f32.mrf.mxu3 }
 0x3f2   : > { %4480 = vmatpush.bf16.msrb.mxu2 %v5544_v17  ;;  %4435 = vmatpush.bf16.msra.mxu3 %v5316_v53  ;;  %v5735_v48 = vld [vmem:[#allocation3 + $0x25c] sm:$0xf]  ;;  %v4216_v31 = vpop.f32.mrf.mxu2 }
 0x3f3   : > { %4454 = vmatpush.bf16.msrb.mxu0 %v5032_v5  ;;  %v5445_v33 = vld [vmem:[#allocation3 + $0x538] sm:$0xf0]  ;;  %v5096_v58 = vor.u32 %v5735_v48, %v5093_v24  ;;  %v4217_v9 = vadd.f32 %v4216_v31, %v4203_v1  ;;  %v4231_v54 = vpop.f32.mrf.mxu0 }
 0x3f4   : > { %4471 = vmatpush.bf16.msrb.mxu1 %v5160_v26  ;;  %5647 = vmatmul.msk.bf16.vlgmr.msra.gmra.mxu0 %vm4086_vm12, %v7678_v13  ;;  %v4965_v46 = vld [vmem:[#allocation3 + $0x178] sm:$0xf0]  ;;  %v5448_v23 = vor.u32 %v5823_v40, %v5445_v33 }
 0x3f5   : > { %4436 = vmatmul.bf16.vlgmr.msra.gmra.mxu3 %v7643_v18  ;;  %v5703_v21 = vld [vmem:[#allocation3 + $0x15c] sm:$0xf]  ;;  %v4230_v61 = vadd.f32 %v4229_v36, %v4217_v9 }
 0x3f6   : > { %4498 = vmatpush.bf16.msrb.mxu3 %v5640_v52  ;;  %4481 = vmatpush.bf16.msrb.mxu2 %v5512_v56  ;;  %v5061_v27 = vld [vmem:[#allocation3 + $0x238] sm:$0xf0]  ;;  %v4968_v17 = vor.u32 %v5703_v21, %v4965_v46 }
 0x3f7   : > { %4455 = vmatpush.bf16.msrb.mxu0 %v5000_v20  ;;  %v5815_v32 = vld [vmem:[#allocation3 + $0x4dc] sm:$0xf]  ;;  %v4243_v16 = vadd.f32 %v4242_v44, %v4230_v61 }
 0x3f8   : > { %4472 = vmatpush.bf16.msrb.mxu1 %v5128_v38  ;;  %v5413_v3 = vld [vmem:[#allocation3 + $0x4f8] sm:$0xf0] }
 0x3f9   : > { %v5727_v12 = vld [vmem:[#allocation3 + $0x21c] sm:$0xf]  ;;  %v5416_v47 = vor.u32 %v5815_v32, %v5413_v3  ;;  %v4205_v11 = vpop.f32.mrf.mxu3 }
 0x3fa   : > { %4499 = vmatpush.bf16.msrb.mxu3 %v5608_v37  ;;  %4482 = vmatpush.bf16.msrb.mxu2 %v5480_v2  ;;  %v4933_v28 = vld [vmem:[#allocation3 + $0x138] sm:$0xf0]  ;;  %v5064_v6 = vor.u32 %v5727_v12, %v5061_v27  ;;  %v4218_v42 = vpop.f32.mrf.mxu2 }
 0x3fb   : > { %4456 = vmatpush.bf16.msrb.mxu0 %v4968_v17  ;;  %v5695_v60 = vld [vmem:[#allocation3 + $0x11c] sm:$0xf]  ;;  %v4294_v38 = vpop.f32.mrf.mxu0 }
 0x3fc   : > { %4473 = vmatpush.bf16.msrb.mxu1 %v5096_v58  ;;  %v5381_v53 = vld [vmem:[#allocation3 + $0x4b8] sm:$0xf0]  ;;  %v4936_v7 = vor.u32 %v5695_v60, %v4933_v28 }
 0x3fd   : > { %v5807_v14 = vld [vmem:[#allocation3 + $0x49c] sm:$0xf] }
 0x3fe   : > { %4500 = vmatpush.bf16.msrb.mxu3 %v5576_v45  ;;  %4483 = vmatpush.bf16.msrb.mxu2 %v5448_v23  ;;  %v4901_v51 = vld [vmem:[#allocation3 + $0xf8] sm:$0xf0]  ;;  %v5384_v52 = vor.u32 %v5807_v14, %v5381_v53 }
 0x3ff   : > { %4457 = vmatpush.bf16.msrb.mxu0 %v4936_v7  ;;  %v5687_v30 = vld [vmem:[#allocation3 + $0xdc] sm:$0xf] }
 0x400   : > { %4474 = vmatpush.bf16.msrb.mxu1 %v5064_v6  ;;  %v5799_v49 = vld [vmem:[#allocation3 + $0x45c] sm:$0xf]  ;;  %v4904_v56 = vor.u32 %v5687_v30, %v4901_v51 }
 0x401   : > { %v5349_v26 = vld [vmem:[#allocation3 + $0x478] sm:$0xf0] }
 0x402   : > { %4484 = vmatpush.bf16.msrb.mxu2 %v5416_v47  ;;  %v4869_v22 = vld [vmem:[#allocation3 + $0xb8] sm:$0xf0]  ;;  %v5352_v55 = vor.u32 %v5799_v49, %v5349_v26  ;;  %v4281_v35 = vpop.f32.mrf.mxu2 }
 0x403   : > { %4475 = vmatmul.bf16.vlgmr.msrb.gmra.mxu1 %v7723_v0  ;;  %4458 = vmatpush.bf16.msrb.mxu0 %v4904_v56  ;;  %v5679_v19 = vld [vmem:[#allocation3 + $0x9c] sm:$0xf]  ;;  %v4296_v40 = vpop.f32.mrf.mxu0 }
 0x404   : > { %v5791_v10 = vld [vmem:[#allocation3 + $0x41c] sm:$0xf]  ;;  %v4872_v5 = vor.u32 %v5679_v19, %v4869_v22 }
 0x405   : > { %5648 = vmatmul.msk.bf16.vlgmr.msrb.gmra.mxu3 %vm4086_vm12, %v7678_v13  ;;  %v5317_v43 = vld [vmem:[#allocation3 + $0x438] sm:$0xf0]  ;;  %v4514_v13 = vmul.f32 %v8243_v50, %v4243_v16 }
 0x406   : > { %4485 = vmatpush.bf16.msrb.mxu2 %v5384_v52  ;;  %v4837_v0 = vld [vmem:[#allocation3 + $0x78] sm:$0xf0]  ;;  %v5320_v15 = vor.u32 %v5791_v10, %v5317_v43 }
 0x407   : > { %4459 = vmatpush.bf16.msrb.mxu0 %v4872_v5  ;;  %v5671_v29 = vld [vmem:[#allocation3 + $0x5c] sm:$0xf]  ;;  %v4528_v63 = vadd.f32 %v8252_v25, %v4514_v13 }
 0x408   : > { %v5663_v4 = vld [vmem:[#allocation3 + $0x1c] sm:$0xf]  ;;  %v4840_v59 = vor.u32 %v5671_v29, %v4837_v0 }
 0x409   : > { %v4805_v37 = vld [vmem:[#allocation3 + $0x38] sm:$0xf0]  ;;  %vm4536_vm14 = vcmp.gt.f32.partialorder %v4528_v63, 0.0  ;;  %v4544_v24 = vmul.f32 0.01, %v4528_v63 }
 0x40a   : > { %4486 = vmatpush.bf16.msrb.mxu2 %v5352_v55  ;;  %v4808_v2 = vor.u32 %v5663_v4, %v4805_v37  ;;  %v4283_v39 = vpop.f32.mrf.mxu2  ;;  %v4268_v57 = vpop.f32.mrf.mxu1 }
 0x40b   : > { %4460 = vmatpush.bf16.msrb.mxu0 %v4840_v59  ;;  %v4552_v8 = vsel %vm4536_vm14, %v4528_v63, %v4544_v24 }
 0x40c   : > { %4560 = vst [vmem:[%s8260_s8 + $0x10] sm:$0xff] %v4552_v8 }
 0x40e   : > { %4487 = vmatpush.bf16.msrb.mxu2 %v5320_v15 }
 0x40f   : > { %4461 = vmatpush.bf16.msrb.mxu0 %v4808_v2 }
 0x411   : > { %4488 = vmatmul.bf16.vlgmr.msrb.gmra.mxu2 %v7643_v18  ;;  %v4255_v20 = vpop.f32.mrf.mxu3 }
 0x412   : > { %4462 = vmatmul.bf16.vlgmr.msrb.gmra.mxu0 %v7590_v34  ;;  %v4269_v48 = vadd.f32 %v4268_v57, %v4255_v20  ;;  %v4270_v33 = vpop.f32.mrf.mxu1 }
 0x414   : > { %v4282_v46 = vadd.f32 %v4281_v35, %v4269_v48 }
 0x416   : > { %v4295_v62 = vadd.f32 %v4294_v38, %v4282_v46 }
 0x417   : > { %v4320_v45 = vpop.f32.mrf.mxu0 }
 0x418   : > { %v4515_v58 = vmul.f32 %v8243_v50, %v4295_v62 }
 0x419   : > { %v4257_v18 = vpop.f32.mrf.mxu3 }
 0x41a   : > { %v4529_v23 = vadd.f32 %v8252_v25, %v4515_v58 }
 0x41c   : > { %vm4537_vm15 = vcmp.gt.f32.partialorder %v4529_v23, 0.0  ;;  %v4545_v27 = vmul.f32 0.01, %v4529_v23 }
 0x41e   : > { %v4553_v32 = vsel %vm4537_vm15, %v4529_v23, %v4545_v27 }
 0x41f   : > { %v4322_v21 = vpop.f32.mrf.mxu0  ;;  %4561 = vst [vmem:[%s8260_s8 + $0x18] sm:$0xff] %v4553_v32 }
 0x434   : > { %v4346_v34 = vpop.f32.mrf.mxu2  ;;  %v4333_v3 = vpop.f32.mrf.mxu1 }
 0x435   : > { %v4307_v17 = vpop.f32.mrf.mxu3 }
 0x436   : > { %v4321_v31 = vadd.f32 %v4320_v45, %v4307_v17 }
 0x438   : > { %v4385_v12 = vpop.f32.mrf.mxu0  ;;  %v4334_v28 = vadd.f32 %v4333_v3, %v4321_v31 }
 0x43a   : > { %v4347_v36 = vadd.f32 %v4346_v34, %v4334_v28 }
 0x43c   : > { %v4348_v6 = vpop.f32.mrf.mxu2  ;;  %v4516_v47 = vmul.f32 %v8243_v50, %v4347_v36  ;;  %v4335_v60 = vpop.f32.mrf.mxu1 }
 0x43d   : > { %v4309_v53 = vpop.f32.mrf.mxu3 }
 0x43e   : > { %v4530_v44 = vadd.f32 %v8252_v25, %v4516_v47 }
 0x440   : > { %v4387_v7 = vpop.f32.mrf.mxu0  ;;  %vm4538_vm1 = vcmp.gt.f32.partialorder %v4530_v44, 0.0  ;;  %v4546_v14 = vmul.f32 0.01, %v4530_v44 }
 0x442   : > { %v4554_v51 = vsel %vm4538_vm1, %v4530_v44, %v4546_v14 }
 0x443   : > { %4562 = vst [vmem:[%s8260_s8 + $0x20] sm:$0xff] %v4554_v51 }
 0x444   : > { %v4398_v52 = vpop.f32.mrf.mxu1 }
 0x44c   : > { %v4400_v30 = vpop.f32.mrf.mxu1 }
 0x454   : > { %v4359_v49 = vpop.f32.mrf.mxu2 }
 0x458   : > { %v4372_v26 = vpop.f32.mrf.mxu3 }
 0x459   : > { %v4373_v56 = vadd.f32 %v4372_v26, %v4359_v49 }
 0x45b   : > { %v4386_v1 = vadd.f32 %v4385_v12, %v4373_v56 }
 0x45c   : > { %v4361_v22 = vpop.f32.mrf.mxu2 }
 0x45d   : > { %v4399_v42 = vadd.f32 %v4398_v52, %v4386_v1 }
 0x45f   : > { %v4517_v9 = vmul.f32 %v8243_v50, %v4399_v42 }
 0x460   : > { %v4374_v54 = vpop.f32.mrf.mxu3  ;;  %v4411_v55 = vpop.f32.mrf.mxu1 }
 0x461   : > { %v4531_v19 = vadd.f32 %v8252_v25, %v4517_v9 }
 0x463   : > { %vm4539_vm2 = vcmp.gt.f32.partialorder %v4531_v19, 0.0  ;;  %v4547_v10 = vmul.f32 0.01, %v4531_v19 }
 0x465   : > { %v4555_v61 = vsel %vm4539_vm2, %v4531_v19, %v4547_v10 }
 0x466   : > { %4563 = vst [vmem:[%s8260_s8 + $0x28] sm:$0xff] %v4555_v61 }
 0x468   : > { %v4413_v41 = vpop.f32.mrf.mxu1 }
 0x471   : > { %v4450_v43 = vpop.f32.mrf.mxu0 }
 0x474   : > { %v4424_v5 = vpop.f32.mrf.mxu2 }
 0x475   : > { %v4425_v0 = vadd.f32 %v4424_v5, %v4411_v55 }
 0x478   : > { %v4437_v16 = vpop.f32.mrf.mxu3 }
 0x479   : > { %v4438_v15 = vadd.f32 %v4437_v16, %v4425_v0  ;;  %v4452_v13 = vpop.f32.mrf.mxu0 }
 0x47b   : > { %v4451_v29 = vadd.f32 %v4450_v43, %v4438_v15 }
 0x47c   : > { %v4426_v37 = vpop.f32.mrf.mxu2 }
 0x47d   : > { %v4518_v4 = vmul.f32 %v8243_v50, %v4451_v29 }
 0x47f   : > { %v4532_v59 = vadd.f32 %v8252_v25, %v4518_v4 }
 0x480   : > { %v4439_v11 = vpop.f32.mrf.mxu3  ;;  %v4476_v35 = vpop.f32.mrf.mxu1 }
 0x481   : > { %vm4540_vm3 = vcmp.gt.f32.partialorder %v4532_v59, 0.0  ;;  %v4548_v63 = vmul.f32 0.01, %v4532_v59 }
 0x483   : > { %v4556_v38 = vsel %vm4540_vm3, %v4532_v59, %v4548_v63 }
 0x484   : > { %4564 = vst [vmem:[%s8260_s8 + $0x30] sm:$0xff] %v4556_v38 }
 0x488   : > { %v4502_v2 = vpop.f32.mrf.mxu3  ;;  %v4478_v24 = vpop.f32.mrf.mxu1 }
 0x48f   : > { %v4463_v39 = vpop.f32.mrf.mxu0 }
 0x490   : > { %v4504_v8 = vpop.f32.mrf.mxu3  ;;  %v4477_v57 = vadd.f32 %v4476_v35, %v4463_v39 }
 0x494   : > { %v4489_v40 = vpop.f32.mrf.mxu2 }
 0x495   : > { %v4490_v20 = vadd.f32 %v4489_v40, %v4477_v57 }
 0x497   : > { %v4503_v48 = vadd.f32 %v4502_v2, %v4490_v20  ;;  %v4465_v45 = vpop.f32.mrf.mxu0 }
 0x499   : > { %v4519_v33 = vmul.f32 %v8243_v50, %v4503_v48 }
 0x49b   : > { %v4533_v62 = vadd.f32 %v8252_v25, %v4519_v33 }
 0x49c   : > { %v4491_v46 = vpop.f32.mrf.mxu2 }
 0x49d   : > { %vm4541_vm4 = vcmp.gt.f32.partialorder %v4533_v62, 0.0  ;;  %v4549_v58 = vmul.f32 0.01, %v4533_v62 }
 0x49f   : > { %v4557_v18 = vsel %vm4541_vm4, %v4533_v62, %v4549_v58 }
 0x4a0   : > { %4565 = vst [vmem:[%s8260_s8 + $0x38] sm:$0xff] %v4557_v18 }
 0x4a1 PF: > { %s8358_s20 = sld [smem:[#allocation6_spill]]  ;;  %p12_p2 = scmp.ge.s32.totalorder %s6331_s24, 4  }
 0x4a2   : > { %s8359_s21 = sld [smem:[#allocation7_spill]]  ;;  %s8360_s18 = smov %s6167_s19 }
 0x4a3   : > { %s8361_s19 = smov %s6351_s9  ;;  %s8362_s22 = smov %s6331_s24 }
 0x4a4   :  { %14 = sbr.rel (!%p12_p2) target bundleno = 5 (0x5), region = 249 }

</bundles_post_ra>
